<compile_context>
chip_gen: v6e
topology: v6e:2x2x1
jax: 0.10.0
libtpu: 0.0.40
codegen_flags: <defaults>
</compile_context>

<pallas_src>
import functools

import jax
import jax.numpy as jnp
from jax import lax
from jax.experimental import pallas as pl
from jax.experimental.pallas import tpu as pltpu


def _modl_cg_kernel(grt_ref, git_ref, b_ref, x_ref, *, num_cg_iterations: int,
                    tol: float):
    """Batched CG solve of (A^H A + lambda I) x = b.

    grt_ref : (N, N)   f32   Re(G^T)  (row-vector operator, lambda on diagonal)
    git_ref : (N, N)   f32   Im(G^T)
    b_ref   : (BB, 2N) f32   [Re(b) | Im(b)] rows, one DC problem per row
    x_ref   : (BB, 2N) f32   output, [Re(x) | Im(x)] rows
    """
    n = grt_ref.shape[1]
    dot = functools.partial(jnp.dot, preferred_element_type=jnp.float32)
    tol_sq = tol * tol  # Python-time constant: no sqrt on the critical path.

    br = b_ref[:, :n]           # (BB, N) lane-aligned slices (n % 128 == 0)
    bi = b_ref[:, n:]

    def gram(pr, pi):
        # Read the operator at the point of use (streamed VMEM -> MXU each
        # iteration; never a long-lived >256-vreg value).
        grt = grt_ref[...]
        git = git_ref[...]
        apr = dot(pr, grt) - dot(pi, git)
        api = dot(pr, git) + dot(pi, grt)
        return apr, api

    # CG with x0 = 0  =>  r0 = p0 = b.
    xr = jnp.zeros_like(br)
    xi = jnp.zeros_like(bi)
    rr, ri = br, bi
    pr, pi = br, bi
    rs_old = jnp.sum(rr * rr + ri * ri, axis=-1, keepdims=True)   # (BB,1) ||r||^2
    done = rs_old < 0.0                                            # (BB,1) sticky flag

    def body(_, carry):
        xr, xi, rr, ri, pr, pi, rs_old, done = carry

        apr, api = gram(pr, pi)                                    # (BB, N) x2

        den = jnp.sum(pr * apr + pi * api, axis=-1, keepdims=True)  # Re<p, Ap>
        den_break = jnp.abs(den) < 1e-12
        active = jnp.logical_not(jnp.logical_or(done, den_break))

        # Per-row scalar masking: inactive rows become arithmetic no-ops, so
        # all vector updates run unconditionally (no full-vector selects).
        alpha = jnp.where(active, rs_old / jnp.where(den_break, 1.0, den), 0.0)
        xr = xr + alpha * pr
        xi = xi + alpha * pi
        rr = rr - alpha * apr
        ri = ri - alpha * api

        rs_new = jnp.sum(rr * rr + ri * ri, axis=-1, keepdims=True)
        res_break = rs_new < tol_sq

        # NOTE: when res_break fires, the reference breaks BEFORE updating
        # p / rs_old; here they are still updated.  Benign: `done` zeroes
        # alpha/beta in every later iteration, so x never changes again.
        beta = jnp.where(active,
                         rs_new / jnp.where(rs_old > 0.0, rs_old, 1.0), 0.0)
        pr = rr + beta * pr
        pi = ri + beta * pi
        rs_old = jnp.where(active, rs_new, rs_old)

        done = jnp.logical_or(
            done, jnp.logical_or(den_break, jnp.logical_and(active, res_break)))
        return (xr, xi, rr, ri, pr, pi, rs_old, done)

    # Static trip count -> fully unroll so the LLO scheduler sees across
    # iterations (matmul / reduction interleave).
    carry = lax.fori_loop(0, num_cg_iterations, body,
                          (xr, xi, rr, ri, pr, pi, rs_old, done), unroll=True)

    x_ref[:, :n] = carry[0]
    x_ref[:, n:] = carry[1]


def _round_up(x, m):
    return ((x + m - 1) // m) * m


def modl_data_consistency_batched(z, y, a_mat, lambda_dc, num_cg_iterations=5,
                                  tol=1e-5):
    """Batched MoDL DC: z (B,H,W) complex64, y (B,M) complex64,
    a_mat (M, H*W) complex64 explicit NUFFT matrix. Returns (B,H,W) complex64."""
    B, H, W = z.shape
    N = H * W
    a = a_mat.astype(jnp.complex64)
    hp = lax.Precision.HIGHEST

    # ---- one-time precompute (plain XLA) -----------------------------------
    # Gram operator with lambda folded into the diagonal.
    g = jnp.matmul(jnp.conj(a).T, a, precision=hp) \
        + lambda_dc * jnp.eye(N, dtype=jnp.complex64)              # (N, N)
    # Row-vector convention: q_row = p_row @ G^T.  Pass G^T split into Re/Im
    # (stored ONCE -> half the operator bytes of the 2Nx2N embedding).
    gt = g.T
    grt = jnp.real(gt).astype(jnp.float32)
    git = jnp.imag(gt).astype(jnp.float32)
    # NOTE: bf16 operator would halve matrix bytes again (native MXU input on
    # v6e/v7x) but needs a rel-err re-validation; kept f32 here.

    # RHS: b = A^H y + lambda * z   (per problem).
    b = jnp.matmul(y.astype(jnp.complex64), jnp.conj(a), precision=hp) \
        + lambda_dc * z.reshape(B, N).astype(jnp.complex64)         # (B, N)

    # ---- pad to TPU-friendly shapes (lane-dense, sublane-full) -------------
    BB = 8                                   # rows per grid step (f32 sublane tile)
    n_pad = max(_round_up(N, 128), 128)
    b_pad = _round_up(max(B, 1), BB)

    grt_p = jnp.zeros((n_pad, n_pad), jnp.float32).at[:N, :N].set(grt)
    git_p = jnp.zeros((n_pad, n_pad), jnp.float32).at[:N, :N].set(git)
    b_real = jnp.zeros((b_pad, 2 * n_pad), jnp.float32)
    b_real = b_real.at[:B, :N].set(jnp.real(b))
    b_real = b_real.at[:B, n_pad:n_pad + N].set(jnp.imag(b))

    kernel = functools.partial(_modl_cg_kernel,
                               num_cg_iterations=num_cg_iterations, tol=tol)

    # Explicit scoped-VMEM budget: operator (double-buffered) + vector blocks
    # + CG state + headroom; capped at 64 MiB so it stays v7x-safe.
    operator_bytes = 2 * (2 * n_pad * n_pad * 4)
    vector_bytes = 16 * (BB * 2 * n_pad * 4)
    vmem_limit = int(min(64 << 20,
                         max(operator_bytes + vector_bytes + (4 << 20), 32 << 20)))

    x_real = pl.pallas_call(
        kernel,
        out_shape=jax.ShapeDtypeStruct((b_pad, 2 * n_pad), jnp.float32),
        grid=(b_pad // BB,),
        in_specs=[
            pl.BlockSpec((n_pad, n_pad), lambda i: (0, 0)),     # Re(G^T), resident
            pl.BlockSpec((n_pad, n_pad), lambda i: (0, 0)),     # Im(G^T), resident
            pl.BlockSpec((BB, 2 * n_pad), lambda i: (i, 0)),    # RHS rows for block i
        ],
        out_specs=pl.BlockSpec((BB, 2 * n_pad), lambda i: (i, 0)),
        compiler_params=pltpu.CompilerParams(
            dimension_semantics=("parallel",),   # batch axis splits across TCs (v7x)
            vmem_limit_bytes=vmem_limit,
        ),
    )(grt_p, git_p, b_real)

    xr = x_real[:B, :N]
    xi = x_real[:B, n_pad:n_pad + N]
    return (xr + 1j * xi).reshape(B, H, W).astype(jnp.complex64)


def modl_data_consistency(z, y, a_mat, lambda_dc, num_cg_iterations=5, tol=1e-5):
    """Single-problem forward matching the PyTorch module's forward()."""
    return modl_data_consistency_batched(z[None], y[None], a_mat, lambda_dc,
                                         num_cg_iterations, tol)[0]


def modl_data_consistency_ref(z, y, a_mat, lambda_dc, num_cg_iterations=5,
                              tol=1e-5):
    """Pure-JAX reference mirroring the PyTorch module (eager, early breaks).
    Applies A then A^H per iteration (different computation path than the
    kernel's precomputed Gram operator), so it also validates that rewrite."""
    hp = lax.Precision.HIGHEST
    ah = jnp.conj(a_mat).T

    def op(v):
        return jnp.matmul(ah, jnp.matmul(a_mat, v, precision=hp),
                          precision=hp) + lambda_dc * v

    b = jnp.matmul(ah, y, precision=hp) + lambda_dc * z.reshape(-1)
    x = jnp.zeros_like(b)
    r = b
    p = b
    rs_old = jnp.sum(jnp.conj(r) * r).real
    for _ in range(num_cg_iterations):
        Ap = op(p)
        den = jnp.sum(jnp.conj(p) * Ap).real
        if abs(float(den)) < 1e-12:
            break
        alpha = rs_old / den
        x = x + alpha * p
        r = r - alpha * Ap
        rs_new = jnp.sum(jnp.conj(r) * r).real
        if float(jnp.sqrt(rs_new)) < tol:
            break
        p = r + (rs_new / rs_old) * p
        rs_old = rs_new
    return x.reshape(z.shape)


if __name__ == "__main__":
    key = jax.random.PRNGKey(0)
    B = 4                       # batch of DC problems (coils / slices / unroll steps)
    H = W = 16                  # image_shape
    N = H * W                   # 256 (already a multiple of 128)
    M = 512                     # num_k_points
    lambda_dc = 0.05
    num_cg_iterations = 5

    keys = jax.random.split(key, 6)

    # Deterministic synthetic NUFFT operator: non-uniform DFT matrix (M, N).
    kx = jax.random.uniform(keys[0], (M,), minval=-jnp.pi, maxval=jnp.pi)
    ky = jax.random.uniform(keys[1], (M,), minval=-jnp.pi, maxval=jnp.pi)
    gy, gx = jnp.meshgrid(jnp.arange(H, dtype=jnp.float32),
                          jnp.arange(W, dtype=jnp.float32), indexing="ij")
    phase = (kx[:, None] * gx.reshape(-1)[None, :]
             + ky[:, None] * gy.reshape(-1)[None, :])
    a_mat = (jnp.exp(-1j * phase) / jnp.sqrt(N)).astype(jnp.complex64)   # (M, N)

    # Inputs: denoiser outputs z_k (images) and observed k-space y per problem.
    z = (jax.random.normal(keys[2], (B, H, W)) +
         1j * jax.random.normal(keys[3], (B, H, W))).astype(jnp.complex64)
    y = (jax.random.normal(keys[4], (B, M)) +
         1j * jax.random.normal(keys[5], (B, M))).astype(jnp.complex64)

    out = modl_data_consistency_batched(z, y, a_mat, lambda_dc, num_cg_iterations)
    out = jax.block_until_ready(out)

    max_rel = 0.0
    for bi in range(B):
        ref = modl_data_consistency_ref(z[bi], y[bi], a_mat, lambda_dc,
                                        num_cg_iterations)
        rel = float(jnp.max(jnp.abs(out[bi] - ref))
                    / (jnp.max(jnp.abs(ref)) + 1e-8))
        max_rel = max(max_rel, rel)
    assert max_rel < 5e-3, f"kernel/reference mismatch: rel_err={max_rel}"
    print("KERNEL_OK")
</pallas_src>

<mosaic_0001>
module attributes {stable_mosaic.version = 11 : i64} {
  func.func @_modl_cg_kernel(%arg0: i32, %arg1: memref<256x256xf32, #tpu.memory_space<vmem>>, %arg2: memref<256x256xf32, #tpu.memory_space<vmem>>, %arg3: memref<8x512xf32, #tpu.memory_space<vmem>>, %arg4: memref<8x512xf32, #tpu.memory_space<vmem>>) attributes {dimension_semantics = [#tpu.dimension_semantics<parallel>], iteration_bounds = array<i64: 1>, scalar_prefetch = 0 : i64, scratch_operands = 0 : i64, tpu.core_type = #tpu.core_type<tc>, window_params = [{pipeline_mode = #tpu.pipeline_mode<synchronous>, transform_indices = @transform_0, window_bounds = array<i64: 256, 256>}, {pipeline_mode = #tpu.pipeline_mode<synchronous>, transform_indices = @transform_1, window_bounds = array<i64: 256, 256>}, {transform_indices = @transform_2, window_bounds = array<i64: 8, 512>}, {transform_indices = @transform_3, window_bounds = array<i64: 8, 512>}]} {
    %c0 = arith.constant 0 : index
    %c0_0 = arith.constant 0 : index
    %0 = vector.load %arg3[%c0, %c0_0] : memref<8x512xf32, #tpu.memory_space<vmem>>, vector<8x256xf32>
    %c0_1 = arith.constant 0 : index
    %c256 = arith.constant 256 : index
    %1 = vector.load %arg3[%c0_1, %c256] : memref<8x512xf32, #tpu.memory_space<vmem>>, vector<8x256xf32>
    %cst = arith.constant 0.000000e+00 : f32
    %2 = vector.broadcast %cst : f32 to vector<8x256xf32>
    %cst_2 = arith.constant 0.000000e+00 : f32
    %3 = vector.broadcast %cst_2 : f32 to vector<8x256xf32>
    %4 = arith.mulf %0, %0 : vector<8x256xf32>
    %5 = arith.mulf %1, %1 : vector<8x256xf32>
    %6 = arith.addf %4, %5 : vector<8x256xf32>
    %cst_3 = arith.constant dense<0.000000e+00> : vector<8xf32>
    %7 = vector.multi_reduction <add>, %6, %cst_3 [1] : vector<8x256xf32> to vector<8xf32>
    %8 = vector.shape_cast %7 : vector<8xf32> to vector<8x1xf32>
    %cst_4 = arith.constant 0.000000e+00 : f32
    %9 = vector.broadcast %cst_4 : f32 to vector<8x1xf32>
    %10 = arith.cmpf olt, %8, %9 : vector<8x1xf32>
    %c0_i32 = arith.constant 0 : i32
    %c0_5 = arith.constant 0 : index
    %c0_6 = arith.constant 0 : index
    %11 = vector.load %arg1[%c0_5, %c0_6] : memref<256x256xf32, #tpu.memory_space<vmem>>, vector<256x256xf32>
    %c0_7 = arith.constant 0 : index
    %c0_8 = arith.constant 0 : index
    %12 = vector.load %arg2[%c0_7, %c0_8] : memref<256x256xf32, #tpu.memory_space<vmem>>, vector<256x256xf32>
    %cst_9 = arith.constant dense<0.000000e+00> : vector<8x256xf32>
    %13 = tpu.matmul %0, %11, %cst_9 {dimension_numbers = #tpu.dot_dimension_numbers<[1], [0], [0], [1], [0, 0, 1, 1], [], []>} : vector<8x256xf32>, vector<256x256xf32>, vector<8x256xf32> -> vector<8x256xf32>
    %cst_10 = arith.constant dense<0.000000e+00> : vector<8x256xf32>
    %14 = tpu.matmul %1, %12, %cst_10 {dimension_numbers = #tpu.dot_dimension_numbers<[1], [0], [0], [1], [0, 0, 1, 1], [], []>} : vector<8x256xf32>, vector<256x256xf32>, vector<8x256xf32> -> vector<8x256xf32>
    %15 = arith.subf %13, %14 : vector<8x256xf32>
    %cst_11 = arith.constant dense<0.000000e+00> : vector<8x256xf32>
    %16 = tpu.matmul %0, %12, %cst_11 {dimension_numbers = #tpu.dot_dimension_numbers<[1], [0], [0], [1], [0, 0, 1, 1], [], []>} : vector<8x256xf32>, vector<256x256xf32>, vector<8x256xf32> -> vector<8x256xf32>
    %cst_12 = arith.constant dense<0.000000e+00> : vector<8x256xf32>
    %17 = tpu.matmul %1, %11, %cst_12 {dimension_numbers = #tpu.dot_dimension_numbers<[1], [0], [0], [1], [0, 0, 1, 1], [], []>} : vector<8x256xf32>, vector<256x256xf32>, vector<8x256xf32> -> vector<8x256xf32>
    %18 = arith.addf %16, %17 : vector<8x256xf32>
    %19 = arith.mulf %0, %15 : vector<8x256xf32>
    %20 = arith.mulf %1, %18 : vector<8x256xf32>
    %21 = arith.addf %19, %20 : vector<8x256xf32>
    %cst_13 = arith.constant dense<0.000000e+00> : vector<8xf32>
    %22 = vector.multi_reduction <add>, %21, %cst_13 [1] : vector<8x256xf32> to vector<8xf32>
    %23 = vector.shape_cast %22 : vector<8xf32> to vector<8x1xf32>
    %24 = math.absf %23 : vector<8x1xf32>
    %cst_14 = arith.constant 9.99999996E-13 : f32
    %25 = vector.broadcast %cst_14 : f32 to vector<8x1xf32>
    %26 = arith.cmpf olt, %24, %25 : vector<8x1xf32>
    %27 = arith.ori %10, %26 : vector<8x1xi1>
    %cst_15 = arith.constant dense<true> : vector<8x1xi1>
    %28 = arith.xori %27, %cst_15 : vector<8x1xi1>
    %cst_16 = arith.constant 1.000000e+00 : f32
    %29 = vector.broadcast %cst_16 : f32 to vector<8x1xf32>
    %30 = arith.select %26, %29, %23 : vector<8x1xi1>, vector<8x1xf32>
    %31 = arith.divf %8, %30 : vector<8x1xf32>
    %cst_17 = arith.constant 0.000000e+00 : f32
    %32 = vector.broadcast %cst_17 : f32 to vector<8x1xf32>
    %33 = arith.select %28, %31, %32 : vector<8x1xi1>, vector<8x1xf32>
    %34 = vector.broadcast %33 : vector<8x1xf32> to vector<8x256xf32>
    %35 = arith.mulf %34, %0 : vector<8x256xf32>
    %36 = arith.addf %2, %35 : vector<8x256xf32>
    %37 = vector.broadcast %33 : vector<8x1xf32> to vector<8x256xf32>
    %38 = arith.mulf %37, %1 : vector<8x256xf32>
    %39 = arith.addf %3, %38 : vector<8x256xf32>
    %40 = vector.broadcast %33 : vector<8x1xf32> to vector<8x256xf32>
    %41 = arith.mulf %40, %15 : vector<8x256xf32>
    %42 = arith.subf %0, %41 : vector<8x256xf32>
    %43 = vector.broadcast %33 : vector<8x1xf32> to vector<8x256xf32>
    %44 = arith.mulf %43, %18 : vector<8x256xf32>
    %45 = arith.subf %1, %44 : vector<8x256xf32>
    %46 = arith.mulf %42, %42 : vector<8x256xf32>
    %47 = arith.mulf %45, %45 : vector<8x256xf32>
    %48 = arith.addf %46, %47 : vector<8x256xf32>
    %cst_18 = arith.constant dense<0.000000e+00> : vector<8xf32>
    %49 = vector.multi_reduction <add>, %48, %cst_18 [1] : vector<8x256xf32> to vector<8xf32>
    %50 = vector.shape_cast %49 : vector<8xf32> to vector<8x1xf32>
    %cst_19 = arith.constant 1.000000e-10 : f32
    %51 = vector.broadcast %cst_19 : f32 to vector<8x1xf32>
    %52 = arith.cmpf olt, %50, %51 : vector<8x1xf32>
    %cst_20 = arith.constant 0.000000e+00 : f32
    %53 = vector.broadcast %cst_20 : f32 to vector<8x1xf32>
    %54 = arith.cmpf ogt, %8, %53 : vector<8x1xf32>
    %cst_21 = arith.constant 1.000000e+00 : f32
    %55 = vector.broadcast %cst_21 : f32 to vector<8x1xf32>
    %56 = arith.select %54, %8, %55 : vector<8x1xi1>, vector<8x1xf32>
    %57 = arith.divf %50, %56 : vector<8x1xf32>
    %cst_22 = arith.constant 0.000000e+00 : f32
    %58 = vector.broadcast %cst_22 : f32 to vector<8x1xf32>
    %59 = arith.select %28, %57, %58 : vector<8x1xi1>, vector<8x1xf32>
    %60 = vector.broadcast %59 : vector<8x1xf32> to vector<8x256xf32>
    %61 = arith.mulf %60, %0 : vector<8x256xf32>
    %62 = arith.addf %42, %61 : vector<8x256xf32>
    %63 = vector.broadcast %59 : vector<8x1xf32> to vector<8x256xf32>
    %64 = arith.mulf %63, %1 : vector<8x256xf32>
    %65 = arith.addf %45, %64 : vector<8x256xf32>
    %66 = arith.select %28, %50, %8 : vector<8x1xi1>, vector<8x1xf32>
    %67 = arith.andi %28, %52 : vector<8x1xi1>
    %68 = arith.ori %26, %67 : vector<8x1xi1>
    %69 = arith.ori %10, %68 : vector<8x1xi1>
    %c1_i32 = arith.constant 1 : i32
    %c0_23 = arith.constant 0 : index
    %c0_24 = arith.constant 0 : index
    %70 = vector.load %arg1[%c0_23, %c0_24] : memref<256x256xf32, #tpu.memory_space<vmem>>, vector<256x256xf32>
    %c0_25 = arith.constant 0 : index
    %c0_26 = arith.constant 0 : index
    %71 = vector.load %arg2[%c0_25, %c0_26] : memref<256x256xf32, #tpu.memory_space<vmem>>, vector<256x256xf32>
    %cst_27 = arith.constant dense<0.000000e+00> : vector<8x256xf32>
    %72 = tpu.matmul %62, %70, %cst_27 {dimension_numbers = #tpu.dot_dimension_numbers<[1], [0], [0], [1], [0, 0, 1, 1], [], []>} : vector<8x256xf32>, vector<256x256xf32>, vector<8x256xf32> -> vector<8x256xf32>
    %cst_28 = arith.constant dense<0.000000e+00> : vector<8x256xf32>
    %73 = tpu.matmul %65, %71, %cst_28 {dimension_numbers = #tpu.dot_dimension_numbers<[1], [0], [0], [1], [0, 0, 1, 1], [], []>} : vector<8x256xf32>, vector<256x256xf32>, vector<8x256xf32> -> vector<8x256xf32>
    %74 = arith.subf %72, %73 : vector<8x256xf32>
    %cst_29 = arith.constant dense<0.000000e+00> : vector<8x256xf32>
    %75 = tpu.matmul %62, %71, %cst_29 {dimension_numbers = #tpu.dot_dimension_numbers<[1], [0], [0], [1], [0, 0, 1, 1], [], []>} : vector<8x256xf32>, vector<256x256xf32>, vector<8x256xf32> -> vector<8x256xf32>
    %cst_30 = arith.constant dense<0.000000e+00> : vector<8x256xf32>
    %76 = tpu.matmul %65, %70, %cst_30 {dimension_numbers = #tpu.dot_dimension_numbers<[1], [0], [0], [1], [0, 0, 1, 1], [], []>} : vector<8x256xf32>, vector<256x256xf32>, vector<8x256xf32> -> vector<8x256xf32>
    %77 = arith.addf %75, %76 : vector<8x256xf32>
    %78 = arith.mulf %62, %74 : vector<8x256xf32>
    %79 = arith.mulf %65, %77 : vector<8x256xf32>
    %80 = arith.addf %78, %79 : vector<8x256xf32>
    %cst_31 = arith.constant dense<0.000000e+00> : vector<8xf32>
    %81 = vector.multi_reduction <add>, %80, %cst_31 [1] : vector<8x256xf32> to vector<8xf32>
    %82 = vector.shape_cast %81 : vector<8xf32> to vector<8x1xf32>
    %83 = math.absf %82 : vector<8x1xf32>
    %cst_32 = arith.constant 9.99999996E-13 : f32
    %84 = vector.broadcast %cst_32 : f32 to vector<8x1xf32>
    %85 = arith.cmpf olt, %83, %84 : vector<8x1xf32>
    %86 = arith.ori %69, %85 : vector<8x1xi1>
    %cst_33 = arith.constant dense<true> : vector<8x1xi1>
    %87 = arith.xori %86, %cst_33 : vector<8x1xi1>
    %cst_34 = arith.constant 1.000000e+00 : f32
    %88 = vector.broadcast %cst_34 : f32 to vector<8x1xf32>
    %89 = arith.select %85, %88, %82 : vector<8x1xi1>, vector<8x1xf32>
    %90 = arith.divf %66, %89 : vector<8x1xf32>
    %cst_35 = arith.constant 0.000000e+00 : f32
    %91 = vector.broadcast %cst_35 : f32 to vector<8x1xf32>
    %92 = arith.select %87, %90, %91 : vector<8x1xi1>, vector<8x1xf32>
    %93 = vector.broadcast %92 : vector<8x1xf32> to vector<8x256xf32>
    %94 = arith.mulf %93, %62 : vector<8x256xf32>
    %95 = arith.addf %36, %94 : vector<8x256xf32>
    %96 = vector.broadcast %92 : vector<8x1xf32> to vector<8x256xf32>
    %97 = arith.mulf %96, %65 : vector<8x256xf32>
    %98 = arith.addf %39, %97 : vector<8x256xf32>
    %99 = vector.broadcast %92 : vector<8x1xf32> to vector<8x256xf32>
    %100 = arith.mulf %99, %74 : vector<8x256xf32>
    %101 = arith.subf %42, %100 : vector<8x256xf32>
    %102 = vector.broadcast %92 : vector<8x1xf32> to vector<8x256xf32>
    %103 = arith.mulf %102, %77 : vector<8x256xf32>
    %104 = arith.subf %45, %103 : vector<8x256xf32>
    %105 = arith.mulf %101, %101 : vector<8x256xf32>
    %106 = arith.mulf %104, %104 : vector<8x256xf32>
    %107 = arith.addf %105, %106 : vector<8x256xf32>
    %cst_36 = arith.constant dense<0.000000e+00> : vector<8xf32>
    %108 = vector.multi_reduction <add>, %107, %cst_36 [1] : vector<8x256xf32> to vector<8xf32>
    %109 = vector.shape_cast %108 : vector<8xf32> to vector<8x1xf32>
    %cst_37 = arith.constant 1.000000e-10 : f32
    %110 = vector.broadcast %cst_37 : f32 to vector<8x1xf32>
    %111 = arith.cmpf olt, %109, %110 : vector<8x1xf32>
    %cst_38 = arith.constant 0.000000e+00 : f32
    %112 = vector.broadcast %cst_38 : f32 to vector<8x1xf32>
    %113 = arith.cmpf ogt, %66, %112 : vector<8x1xf32>
    %cst_39 = arith.constant 1.000000e+00 : f32
    %114 = vector.broadcast %cst_39 : f32 to vector<8x1xf32>
    %115 = arith.select %113, %66, %114 : vector<8x1xi1>, vector<8x1xf32>
    %116 = arith.divf %109, %115 : vector<8x1xf32>
    %cst_40 = arith.constant 0.000000e+00 : f32
    %117 = vector.broadcast %cst_40 : f32 to vector<8x1xf32>
    %118 = arith.select %87, %116, %117 : vector<8x1xi1>, vector<8x1xf32>
    %119 = vector.broadcast %118 : vector<8x1xf32> to vector<8x256xf32>
    %120 = arith.mulf %119, %62 : vector<8x256xf32>
    %121 = arith.addf %101, %120 : vector<8x256xf32>
    %122 = vector.broadcast %118 : vector<8x1xf32> to vector<8x256xf32>
    %123 = arith.mulf %122, %65 : vector<8x256xf32>
    %124 = arith.addf %104, %123 : vector<8x256xf32>
    %125 = arith.select %87, %109, %66 : vector<8x1xi1>, vector<8x1xf32>
    %126 = arith.andi %87, %111 : vector<8x1xi1>
    %127 = arith.ori %85, %126 : vector<8x1xi1>
    %128 = arith.ori %69, %127 : vector<8x1xi1>
    %c2_i32 = arith.constant 2 : i32
    %c0_41 = arith.constant 0 : index
    %c0_42 = arith.constant 0 : index
    %129 = vector.load %arg1[%c0_41, %c0_42] : memref<256x256xf32, #tpu.memory_space<vmem>>, vector<256x256xf32>
    %c0_43 = arith.constant 0 : index
    %c0_44 = arith.constant 0 : index
    %130 = vector.load %arg2[%c0_43, %c0_44] : memref<256x256xf32, #tpu.memory_space<vmem>>, vector<256x256xf32>
    %cst_45 = arith.constant dense<0.000000e+00> : vector<8x256xf32>
    %131 = tpu.matmul %121, %129, %cst_45 {dimension_numbers = #tpu.dot_dimension_numbers<[1], [0], [0], [1], [0, 0, 1, 1], [], []>} : vector<8x256xf32>, vector<256x256xf32>, vector<8x256xf32> -> vector<8x256xf32>
    %cst_46 = arith.constant dense<0.000000e+00> : vector<8x256xf32>
    %132 = tpu.matmul %124, %130, %cst_46 {dimension_numbers = #tpu.dot_dimension_numbers<[1], [0], [0], [1], [0, 0, 1, 1], [], []>} : vector<8x256xf32>, vector<256x256xf32>, vector<8x256xf32> -> vector<8x256xf32>
    %133 = arith.subf %131, %132 : vector<8x256xf32>
    %cst_47 = arith.constant dense<0.000000e+00> : vector<8x256xf32>
    %134 = tpu.matmul %121, %130, %cst_47 {dimension_numbers = #tpu.dot_dimension_numbers<[1], [0], [0], [1], [0, 0, 1, 1], [], []>} : vector<8x256xf32>, vector<256x256xf32>, vector<8x256xf32> -> vector<8x256xf32>
    %cst_48 = arith.constant dense<0.000000e+00> : vector<8x256xf32>
    %135 = tpu.matmul %124, %129, %cst_48 {dimension_numbers = #tpu.dot_dimension_numbers<[1], [0], [0], [1], [0, 0, 1, 1], [], []>} : vector<8x256xf32>, vector<256x256xf32>, vector<8x256xf32> -> vector<8x256xf32>
    %136 = arith.addf %134, %135 : vector<8x256xf32>
    %137 = arith.mulf %121, %133 : vector<8x256xf32>
    %138 = arith.mulf %124, %136 : vector<8x256xf32>
    %139 = arith.addf %137, %138 : vector<8x256xf32>
    %cst_49 = arith.constant dense<0.000000e+00> : vector<8xf32>
    %140 = vector.multi_reduction <add>, %139, %cst_49 [1] : vector<8x256xf32> to vector<8xf32>
    %141 = vector.shape_cast %140 : vector<8xf32> to vector<8x1xf32>
    %142 = math.absf %141 : vector<8x1xf32>
    %cst_50 = arith.constant 9.99999996E-13 : f32
    %143 = vector.broadcast %cst_50 : f32 to vector<8x1xf32>
    %144 = arith.cmpf olt, %142, %143 : vector<8x1xf32>
    %145 = arith.ori %128, %144 : vector<8x1xi1>
    %cst_51 = arith.constant dense<true> : vector<8x1xi1>
    %146 = arith.xori %145, %cst_51 : vector<8x1xi1>
    %cst_52 = arith.constant 1.000000e+00 : f32
    %147 = vector.broadcast %cst_52 : f32 to vector<8x1xf32>
    %148 = arith.select %144, %147, %141 : vector<8x1xi1>, vector<8x1xf32>
    %149 = arith.divf %125, %148 : vector<8x1xf32>
    %cst_53 = arith.constant 0.000000e+00 : f32
    %150 = vector.broadcast %cst_53 : f32 to vector<8x1xf32>
    %151 = arith.select %146, %149, %150 : vector<8x1xi1>, vector<8x1xf32>
    %152 = vector.broadcast %151 : vector<8x1xf32> to vector<8x256xf32>
    %153 = arith.mulf %152, %121 : vector<8x256xf32>
    %154 = arith.addf %95, %153 : vector<8x256xf32>
    %155 = vector.broadcast %151 : vector<8x1xf32> to vector<8x256xf32>
    %156 = arith.mulf %155, %124 : vector<8x256xf32>
    %157 = arith.addf %98, %156 : vector<8x256xf32>
    %158 = vector.broadcast %151 : vector<8x1xf32> to vector<8x256xf32>
    %159 = arith.mulf %158, %133 : vector<8x256xf32>
    %160 = arith.subf %101, %159 : vector<8x256xf32>
    %161 = vector.broadcast %151 : vector<8x1xf32> to vector<8x256xf32>
    %162 = arith.mulf %161, %136 : vector<8x256xf32>
    %163 = arith.subf %104, %162 : vector<8x256xf32>
    %164 = arith.mulf %160, %160 : vector<8x256xf32>
    %165 = arith.mulf %163, %163 : vector<8x256xf32>
    %166 = arith.addf %164, %165 : vector<8x256xf32>
    %cst_54 = arith.constant dense<0.000000e+00> : vector<8xf32>
    %167 = vector.multi_reduction <add>, %166, %cst_54 [1] : vector<8x256xf32> to vector<8xf32>
    %168 = vector.shape_cast %167 : vector<8xf32> to vector<8x1xf32>
    %cst_55 = arith.constant 1.000000e-10 : f32
    %169 = vector.broadcast %cst_55 : f32 to vector<8x1xf32>
    %170 = arith.cmpf olt, %168, %169 : vector<8x1xf32>
    %cst_56 = arith.constant 0.000000e+00 : f32
    %171 = vector.broadcast %cst_56 : f32 to vector<8x1xf32>
    %172 = arith.cmpf ogt, %125, %171 : vector<8x1xf32>
    %cst_57 = arith.constant 1.000000e+00 : f32
    %173 = vector.broadcast %cst_57 : f32 to vector<8x1xf32>
    %174 = arith.select %172, %125, %173 : vector<8x1xi1>, vector<8x1xf32>
    %175 = arith.divf %168, %174 : vector<8x1xf32>
    %cst_58 = arith.constant 0.000000e+00 : f32
    %176 = vector.broadcast %cst_58 : f32 to vector<8x1xf32>
    %177 = arith.select %146, %175, %176 : vector<8x1xi1>, vector<8x1xf32>
    %178 = vector.broadcast %177 : vector<8x1xf32> to vector<8x256xf32>
    %179 = arith.mulf %178, %121 : vector<8x256xf32>
    %180 = arith.addf %160, %179 : vector<8x256xf32>
    %181 = vector.broadcast %177 : vector<8x1xf32> to vector<8x256xf32>
    %182 = arith.mulf %181, %124 : vector<8x256xf32>
    %183 = arith.addf %163, %182 : vector<8x256xf32>
    %184 = arith.select %146, %168, %125 : vector<8x1xi1>, vector<8x1xf32>
    %185 = arith.andi %146, %170 : vector<8x1xi1>
    %186 = arith.ori %144, %185 : vector<8x1xi1>
    %187 = arith.ori %128, %186 : vector<8x1xi1>
    %c3_i32 = arith.constant 3 : i32
    %c0_59 = arith.constant 0 : index
    %c0_60 = arith.constant 0 : index
    %188 = vector.load %arg1[%c0_59, %c0_60] : memref<256x256xf32, #tpu.memory_space<vmem>>, vector<256x256xf32>
    %c0_61 = arith.constant 0 : index
    %c0_62 = arith.constant 0 : index
    %189 = vector.load %arg2[%c0_61, %c0_62] : memref<256x256xf32, #tpu.memory_space<vmem>>, vector<256x256xf32>
    %cst_63 = arith.constant dense<0.000000e+00> : vector<8x256xf32>
    %190 = tpu.matmul %180, %188, %cst_63 {dimension_numbers = #tpu.dot_dimension_numbers<[1], [0], [0], [1], [0, 0, 1, 1], [], []>} : vector<8x256xf32>, vector<256x256xf32>, vector<8x256xf32> -> vector<8x256xf32>
    %cst_64 = arith.constant dense<0.000000e+00> : vector<8x256xf32>
    %191 = tpu.matmul %183, %189, %cst_64 {dimension_numbers = #tpu.dot_dimension_numbers<[1], [0], [0], [1], [0, 0, 1, 1], [], []>} : vector<8x256xf32>, vector<256x256xf32>, vector<8x256xf32> -> vector<8x256xf32>
    %192 = arith.subf %190, %191 : vector<8x256xf32>
    %cst_65 = arith.constant dense<0.000000e+00> : vector<8x256xf32>
    %193 = tpu.matmul %180, %189, %cst_65 {dimension_numbers = #tpu.dot_dimension_numbers<[1], [0], [0], [1], [0, 0, 1, 1], [], []>} : vector<8x256xf32>, vector<256x256xf32>, vector<8x256xf32> -> vector<8x256xf32>
    %cst_66 = arith.constant dense<0.000000e+00> : vector<8x256xf32>
    %194 = tpu.matmul %183, %188, %cst_66 {dimension_numbers = #tpu.dot_dimension_numbers<[1], [0], [0], [1], [0, 0, 1, 1], [], []>} : vector<8x256xf32>, vector<256x256xf32>, vector<8x256xf32> -> vector<8x256xf32>
    %195 = arith.addf %193, %194 : vector<8x256xf32>
    %196 = arith.mulf %180, %192 : vector<8x256xf32>
    %197 = arith.mulf %183, %195 : vector<8x256xf32>
    %198 = arith.addf %196, %197 : vector<8x256xf32>
    %cst_67 = arith.constant dense<0.000000e+00> : vector<8xf32>
    %199 = vector.multi_reduction <add>, %198, %cst_67 [1] : vector<8x256xf32> to vector<8xf32>
    %200 = vector.shape_cast %199 : vector<8xf32> to vector<8x1xf32>
    %201 = math.absf %200 : vector<8x1xf32>
    %cst_68 = arith.constant 9.99999996E-13 : f32
    %202 = vector.broadcast %cst_68 : f32 to vector<8x1xf32>
    %203 = arith.cmpf olt, %201, %202 : vector<8x1xf32>
    %204 = arith.ori %187, %203 : vector<8x1xi1>
    %cst_69 = arith.constant dense<true> : vector<8x1xi1>
    %205 = arith.xori %204, %cst_69 : vector<8x1xi1>
    %cst_70 = arith.constant 1.000000e+00 : f32
    %206 = vector.broadcast %cst_70 : f32 to vector<8x1xf32>
    %207 = arith.select %203, %206, %200 : vector<8x1xi1>, vector<8x1xf32>
    %208 = arith.divf %184, %207 : vector<8x1xf32>
    %cst_71 = arith.constant 0.000000e+00 : f32
    %209 = vector.broadcast %cst_71 : f32 to vector<8x1xf32>
    %210 = arith.select %205, %208, %209 : vector<8x1xi1>, vector<8x1xf32>
    %211 = vector.broadcast %210 : vector<8x1xf32> to vector<8x256xf32>
    %212 = arith.mulf %211, %180 : vector<8x256xf32>
    %213 = arith.addf %154, %212 : vector<8x256xf32>
    %214 = vector.broadcast %210 : vector<8x1xf32> to vector<8x256xf32>
    %215 = arith.mulf %214, %183 : vector<8x256xf32>
    %216 = arith.addf %157, %215 : vector<8x256xf32>
    %217 = vector.broadcast %210 : vector<8x1xf32> to vector<8x256xf32>
    %218 = arith.mulf %217, %192 : vector<8x256xf32>
    %219 = arith.subf %160, %218 : vector<8x256xf32>
    %220 = vector.broadcast %210 : vector<8x1xf32> to vector<8x256xf32>
    %221 = arith.mulf %220, %195 : vector<8x256xf32>
    %222 = arith.subf %163, %221 : vector<8x256xf32>
    %223 = arith.mulf %219, %219 : vector<8x256xf32>
    %224 = arith.mulf %222, %222 : vector<8x256xf32>
    %225 = arith.addf %223, %224 : vector<8x256xf32>
    %cst_72 = arith.constant dense<0.000000e+00> : vector<8xf32>
    %226 = vector.multi_reduction <add>, %225, %cst_72 [1] : vector<8x256xf32> to vector<8xf32>
    %227 = vector.shape_cast %226 : vector<8xf32> to vector<8x1xf32>
    %cst_73 = arith.constant 1.000000e-10 : f32
    %228 = vector.broadcast %cst_73 : f32 to vector<8x1xf32>
    %229 = arith.cmpf olt, %227, %228 : vector<8x1xf32>
    %cst_74 = arith.constant 0.000000e+00 : f32
    %230 = vector.broadcast %cst_74 : f32 to vector<8x1xf32>
    %231 = arith.cmpf ogt, %184, %230 : vector<8x1xf32>
    %cst_75 = arith.constant 1.000000e+00 : f32
    %232 = vector.broadcast %cst_75 : f32 to vector<8x1xf32>
    %233 = arith.select %231, %184, %232 : vector<8x1xi1>, vector<8x1xf32>
    %234 = arith.divf %227, %233 : vector<8x1xf32>
    %cst_76 = arith.constant 0.000000e+00 : f32
    %235 = vector.broadcast %cst_76 : f32 to vector<8x1xf32>
    %236 = arith.select %205, %234, %235 : vector<8x1xi1>, vector<8x1xf32>
    %237 = vector.broadcast %236 : vector<8x1xf32> to vector<8x256xf32>
    %238 = arith.mulf %237, %180 : vector<8x256xf32>
    %239 = arith.addf %219, %238 : vector<8x256xf32>
    %240 = vector.broadcast %236 : vector<8x1xf32> to vector<8x256xf32>
    %241 = arith.mulf %240, %183 : vector<8x256xf32>
    %242 = arith.addf %222, %241 : vector<8x256xf32>
    %243 = arith.select %205, %227, %184 : vector<8x1xi1>, vector<8x1xf32>
    %244 = arith.andi %205, %229 : vector<8x1xi1>
    %245 = arith.ori %203, %244 : vector<8x1xi1>
    %246 = arith.ori %187, %245 : vector<8x1xi1>
    %c4_i32 = arith.constant 4 : i32
    %c0_77 = arith.constant 0 : index
    %c0_78 = arith.constant 0 : index
    %247 = vector.load %arg1[%c0_77, %c0_78] : memref<256x256xf32, #tpu.memory_space<vmem>>, vector<256x256xf32>
    %c0_79 = arith.constant 0 : index
    %c0_80 = arith.constant 0 : index
    %248 = vector.load %arg2[%c0_79, %c0_80] : memref<256x256xf32, #tpu.memory_space<vmem>>, vector<256x256xf32>
    %cst_81 = arith.constant dense<0.000000e+00> : vector<8x256xf32>
    %249 = tpu.matmul %239, %247, %cst_81 {dimension_numbers = #tpu.dot_dimension_numbers<[1], [0], [0], [1], [0, 0, 1, 1], [], []>} : vector<8x256xf32>, vector<256x256xf32>, vector<8x256xf32> -> vector<8x256xf32>
    %cst_82 = arith.constant dense<0.000000e+00> : vector<8x256xf32>
    %250 = tpu.matmul %242, %248, %cst_82 {dimension_numbers = #tpu.dot_dimension_numbers<[1], [0], [0], [1], [0, 0, 1, 1], [], []>} : vector<8x256xf32>, vector<256x256xf32>, vector<8x256xf32> -> vector<8x256xf32>
    %251 = arith.subf %249, %250 : vector<8x256xf32>
    %cst_83 = arith.constant dense<0.000000e+00> : vector<8x256xf32>
    %252 = tpu.matmul %239, %248, %cst_83 {dimension_numbers = #tpu.dot_dimension_numbers<[1], [0], [0], [1], [0, 0, 1, 1], [], []>} : vector<8x256xf32>, vector<256x256xf32>, vector<8x256xf32> -> vector<8x256xf32>
    %cst_84 = arith.constant dense<0.000000e+00> : vector<8x256xf32>
    %253 = tpu.matmul %242, %247, %cst_84 {dimension_numbers = #tpu.dot_dimension_numbers<[1], [0], [0], [1], [0, 0, 1, 1], [], []>} : vector<8x256xf32>, vector<256x256xf32>, vector<8x256xf32> -> vector<8x256xf32>
    %254 = arith.addf %252, %253 : vector<8x256xf32>
    %255 = arith.mulf %239, %251 : vector<8x256xf32>
    %256 = arith.mulf %242, %254 : vector<8x256xf32>
    %257 = arith.addf %255, %256 : vector<8x256xf32>
    %cst_85 = arith.constant dense<0.000000e+00> : vector<8xf32>
    %258 = vector.multi_reduction <add>, %257, %cst_85 [1] : vector<8x256xf32> to vector<8xf32>
    %259 = vector.shape_cast %258 : vector<8xf32> to vector<8x1xf32>
    %260 = math.absf %259 : vector<8x1xf32>
    %cst_86 = arith.constant 9.99999996E-13 : f32
    %261 = vector.broadcast %cst_86 : f32 to vector<8x1xf32>
    %262 = arith.cmpf olt, %260, %261 : vector<8x1xf32>
    %263 = arith.ori %246, %262 : vector<8x1xi1>
    %cst_87 = arith.constant dense<true> : vector<8x1xi1>
    %264 = arith.xori %263, %cst_87 : vector<8x1xi1>
    %cst_88 = arith.constant 1.000000e+00 : f32
    %265 = vector.broadcast %cst_88 : f32 to vector<8x1xf32>
    %266 = arith.select %262, %265, %259 : vector<8x1xi1>, vector<8x1xf32>
    %267 = arith.divf %243, %266 : vector<8x1xf32>
    %cst_89 = arith.constant 0.000000e+00 : f32
    %268 = vector.broadcast %cst_89 : f32 to vector<8x1xf32>
    %269 = arith.select %264, %267, %268 : vector<8x1xi1>, vector<8x1xf32>
    %270 = vector.broadcast %269 : vector<8x1xf32> to vector<8x256xf32>
    %271 = arith.mulf %270, %239 : vector<8x256xf32>
    %272 = arith.addf %213, %271 : vector<8x256xf32>
    %273 = vector.broadcast %269 : vector<8x1xf32> to vector<8x256xf32>
    %274 = arith.mulf %273, %242 : vector<8x256xf32>
    %275 = arith.addf %216, %274 : vector<8x256xf32>
    %276 = vector.broadcast %269 : vector<8x1xf32> to vector<8x256xf32>
    %277 = arith.mulf %276, %251 : vector<8x256xf32>
    %278 = arith.subf %219, %277 : vector<8x256xf32>
    %279 = vector.broadcast %269 : vector<8x1xf32> to vector<8x256xf32>
    %280 = arith.mulf %279, %254 : vector<8x256xf32>
    %281 = arith.subf %222, %280 : vector<8x256xf32>
    %282 = arith.mulf %278, %278 : vector<8x256xf32>
    %283 = arith.mulf %281, %281 : vector<8x256xf32>
    %284 = arith.addf %282, %283 : vector<8x256xf32>
    %cst_90 = arith.constant dense<0.000000e+00> : vector<8xf32>
    %285 = vector.multi_reduction <add>, %284, %cst_90 [1] : vector<8x256xf32> to vector<8xf32>
    %286 = vector.shape_cast %285 : vector<8xf32> to vector<8x1xf32>
    %cst_91 = arith.constant 1.000000e-10 : f32
    %287 = vector.broadcast %cst_91 : f32 to vector<8x1xf32>
    %288 = arith.cmpf olt, %286, %287 : vector<8x1xf32>
    %cst_92 = arith.constant 0.000000e+00 : f32
    %289 = vector.broadcast %cst_92 : f32 to vector<8x1xf32>
    %290 = arith.cmpf ogt, %243, %289 : vector<8x1xf32>
    %cst_93 = arith.constant 1.000000e+00 : f32
    %291 = vector.broadcast %cst_93 : f32 to vector<8x1xf32>
    %292 = arith.select %290, %243, %291 : vector<8x1xi1>, vector<8x1xf32>
    %293 = arith.divf %286, %292 : vector<8x1xf32>
    %cst_94 = arith.constant 0.000000e+00 : f32
    %294 = vector.broadcast %cst_94 : f32 to vector<8x1xf32>
    %295 = arith.select %264, %293, %294 : vector<8x1xi1>, vector<8x1xf32>
    %296 = vector.broadcast %295 : vector<8x1xf32> to vector<8x256xf32>
    %297 = arith.mulf %296, %239 : vector<8x256xf32>
    %298 = arith.addf %278, %297 : vector<8x256xf32>
    %299 = vector.broadcast %295 : vector<8x1xf32> to vector<8x256xf32>
    %300 = arith.mulf %299, %242 : vector<8x256xf32>
    %301 = arith.addf %281, %300 : vector<8x256xf32>
    %302 = arith.select %264, %286, %243 : vector<8x1xi1>, vector<8x1xf32>
    %303 = arith.andi %264, %288 : vector<8x1xi1>
    %304 = arith.ori %262, %303 : vector<8x1xi1>
    %305 = arith.ori %246, %304 : vector<8x1xi1>
    %c0_95 = arith.constant 0 : index
    %c0_96 = arith.constant 0 : index
    %306 = vector.load %arg4[%c0_95, %c0_96] : memref<8x512xf32, #tpu.memory_space<vmem>>, vector<8x256xf32>
    tpu.vector_store %arg4[%c0_95, %c0_96], %272 {strides = array<i32>} : memref<8x512xf32, #tpu.memory_space<vmem>>, vector<8x256xf32>,
    %c0_97 = arith.constant 0 : index
    %c256_98 = arith.constant 256 : index
    %307 = vector.load %arg4[%c0_97, %c256_98] : memref<8x512xf32, #tpu.memory_space<vmem>>, vector<8x256xf32>
    tpu.vector_store %arg4[%c0_97, %c256_98], %275 {strides = array<i32>} : memref<8x512xf32, #tpu.memory_space<vmem>>, vector<8x256xf32>,
    return
  }
  func.func @transform_0(%arg0: i32) -> (i32, i32) {
    %c0_i32 = arith.constant 0 : i32
    %c0_i32_0 = arith.constant 0 : i32
    %c0_i32_1 = arith.constant 0 : i32
    return %c0_i32, %c0_i32_0 : i32, i32
  }
  func.func @transform_1(%arg0: i32) -> (i32, i32) {
    %c0_i32 = arith.constant 0 : i32
    %c0_i32_0 = arith.constant 0 : i32
    %c0_i32_1 = arith.constant 0 : i32
    return %c0_i32, %c0_i32_0 : i32, i32
  }
  func.func @transform_2(%arg0: i32) -> (i32, i32) {
    %c0_i32 = arith.constant 0 : i32
    %c0_i32_0 = arith.constant 0 : i32
    return %arg0, %c0_i32 : i32, i32
  }
  func.func @transform_3(%arg0: i32) -> (i32, i32) {
    %c0_i32 = arith.constant 0 : i32
    %c0_i32_0 = arith.constant 0 : i32
    return %arg0, %c0_i32 : i32, i32
  }
}

</mosaic_0001>

<bundles_post_ra>
// kernel: tpu_custom_call.1
= control target key start
LH: loop header
LB: loop body
LE: loop exit
PB: predicated region body
PF: predicated region fallthrough
CT: control target
= control target key end

     0   :  { %8 = vsyncpa [#allocation3], 0  ;;  %s4797_s0 = inlined_call_operand.hbm [shape: f32[256,256], index: 0, kind: input, shape index: {}]   ;;  %s4798_s1 = inlined_call_operand.hbm [shape: f32[256,256], index: 1, kind: input, shape index: {}]   ;;  %s4799_s2 = inlined_call_operand.hbm [shape: f32[8,512], index: 2, kind: input, shape index: {}]   ;;  %s4800_s3 = inlined_call_operand.hbm [shape: f32[8,512], index: 3, kind: output, shape index: {}]  }
   0x1   :  { %9 = vsyncpa [#allocation6], 0 }
   0x2   :  { %10 = vsyncpa [#allocation4], 0  ;;  %s2282_s12 = smov [#allocation5]   ;;  %s2283_s14 = smov [#allocation2]  }
   0x3   :  { %s28_s13 = sshll.u32 %s2282_s12, 4  ;;  %s16_s15 = sshll.u32 %s2283_s14, 4  ;;  %s29_s13 = int_to_ptr.vmem [resolvable:$true] %s28_s13  ;;  %s17_s15 = int_to_ptr.vmem [resolvable:$true] %s16_s15 }
   0x4   :  { %s2204_s16 = scalar_lea.vmem %s29_s13, 8192  ;;  %p2209_p1 = scmp.lt.s32.totalorder %s29_s13, %s29_s13 }
   0x5   :  { %p2205_p0 = scmp.ne.s32.totalorder %s29_s13, %s2204_s16  ;;  %p2210_p2 = scmp.lt.s32.totalorder %s2204_s16, %s2204_s16 }
   0x7   :  { %p2211_p3 = por %p2210_p2, %p2209_p1 }
   0x9   :  { %p2212_p4 = pnand %p2211_p3, %p2205_p0 }
   0xb   :  { %2215 = shalt.err (!%p2212_p4)
}
   0xc   :  { %s2284_s17 = smov 256   ;;  %s2285_s18 = smov 16  }
   0xd   :  { %34 = dma.hbm_to_vmem [thread:$0]  %s4798_s1, 8192, %s29_s13, [#allocation6], %s2284_s17, %s2284_s17, %s2285_s18  }
   0xe   :  { %s2224_s21 = scalar_lea.vmem %s17_s15, 8192  ;;  %p2229_p6 = scmp.lt.s32.totalorder %s17_s15, %s17_s15 }
   0xf   :  { %p2225_p5 = scmp.ne.s32.totalorder %s17_s15, %s2224_s21  ;;  %p2230_p7 = scmp.lt.s32.totalorder %s2224_s21, %s2224_s21 }
  0x11   :  { %p2231_p8 = por %p2230_p7, %p2229_p6 }
  0x13   :  { %p2232_p9 = pnand %p2231_p8, %p2225_p5 }
  0x15   :  { %2235 = shalt.err (!%p2232_p9)
}
  0x16   :  { %22 = dma.hbm_to_vmem [thread:$0]  %s4797_s0, 8192, %s17_s15, [#allocation3], %s2284_s17, %s2284_s17, %s2285_s18  }
  0x17   :  { %s2286_s24 = smov [#allocation7]  }
  0x18   :  { %s41_s25 = sshll.u32 %s2286_s24, 4  ;;  %s42_s25 = int_to_ptr.vmem [resolvable:$true] %s41_s25 }
  0x19   :  { %s2244_s26 = scalar_lea.vmem %s42_s25, 512  ;;  %p2249_p11 = scmp.lt.s32.totalorder %s42_s25, %s42_s25 }
  0x1a   :  { %p2245_p10 = scmp.ne.s32.totalorder %s42_s25, %s2244_s26  ;;  %p2250_p12 = scmp.lt.s32.totalorder %s2244_s26, %s2244_s26 }
  0x1c   :  { %p2251_p13 = por %p2250_p12, %p2249_p11 }
  0x1e   :  { %p2252_p0 = pnand %p2251_p13, %p2245_p10 }
  0x20   :  { %2255 = shalt.err (!%p2252_p0)
}
  0x21   :  { %44 = dma.hbm_to_vmem [thread:$0]  %s4799_s2, 512, %s42_s25, [#allocation6]  }
  0x22   :  { %2276 = dma.done.wait [#allocation3], 8192  }
  0x23   :  { %2277 = vsyncadd [#allocation3], 4294959104 }
  0x24   :  { %2278 = dma.done.wait [#allocation6], 8704  }
  0x25   :  { %2279 = vsyncadd [#allocation6], 4294958592  ;;  %v2318_v0 = vld [vmem:[#allocation2 + $0xf8] sm:$0xff]  ;;  %v2322_v2 = vld [vmem:[#allocation2 + $0xf0] sm:$0xff]  ;;  %vm2287_vm3 = vmmov 1   ;;  %s2288_s0 = smov [#allocation8]  }
  0x26   :  { %v2320_v1 = vld [vmem:[#allocation5 + $0xf8] sm:$0xff]  ;;  %196 = vmatprep.subr.mxu0 %v2318_v0  ;;  %v2326_v3 = vld [vmem:[#allocation5 + $0xf0] sm:$0xff]  ;;  %v2328_v4 = vld [vmem:[#allocation2 + $0xe8] sm:$0xff]  ;;  %s1901_s2 = sshll.u32 %s2288_s0, 4  ;;  %s1902_s2 = int_to_ptr.vmem [resolvable:$true] %s1901_s2 }
  0x27   :  { %267 = vmatprep.subr.mxu1 %v2320_v1  ;;  %v2330_v5 = vld [vmem:[#allocation5 + $0xe8] sm:$0xff]  ;;  %197 = vmatpush1.msra.mxu0 %v2322_v2  ;;  %v2334_v6 = vld [vmem:[#allocation2 + $0xe0] sm:$0xff]  ;;  %v2338_v8 = vld [vmem:[#allocation2 + $0xd8] sm:$0xff]  ;;  %s2256_s28 = scalar_lea.vmem %s1902_s2, 512  ;;  %p2261_p2 = scmp.lt.s32.totalorder %s1902_s2, %s1902_s2 }
  0x28   :  { %268 = vmatpush1.msra.mxu1 %v2326_v3  ;;  %v2336_v7 = vld [vmem:[#allocation5 + $0xe0] sm:$0xff]  ;;  %198 = vmatprep.subr.mxu0 %v2328_v4  ;;  %v2342_v9 = vld [vmem:[#allocation5 + $0xd8] sm:$0xff]  ;;  %v2344_v10 = vld [vmem:[#allocation2 + $0xd0] sm:$0xff]  ;;  %p2257_p1 = scmp.ne.s32.totalorder %s1902_s2, %s2256_s28  ;;  %p2262_p3 = scmp.lt.s32.totalorder %s2256_s28, %s2256_s28 }
  0x29   :  { %269 = vmatprep.subr.mxu1 %v2330_v5  ;;  %v2346_v11 = vld [vmem:[#allocation5 + $0xd0] sm:$0xff]  ;;  %199 = vmatpush1.msra.mxu0 %v2334_v6  ;;  %v2350_v12 = vld [vmem:[#allocation2 + $0xc8] sm:$0xff]  ;;  %v2356_v14 = vld [vmem:[#allocation2 + $0xc0] sm:$0xff] }
  0x2a   :  { %270 = vmatpush1.msra.mxu1 %v2336_v7  ;;  %v2352_v13 = vld [vmem:[#allocation5 + $0xc8] sm:$0xff]  ;;  %200 = vmatprep.subr.mxu0 %v2338_v8  ;;  %v2358_v15 = vld [vmem:[#allocation5 + $0xc0] sm:$0xff]  ;;  %v2362_v16 = vld [vmem:[#allocation2 + $0xb8] sm:$0xff]  ;;  %p2263_p4 = por %p2262_p3, %p2261_p2 }
  0x2b   :  { %271 = vmatprep.subr.mxu1 %v2342_v9  ;;  %201 = vmatpush1.msra.mxu0 %v2344_v10  ;;  %v2364_v17 = vld [vmem:[#allocation5 + $0xb8] sm:$0xff]  ;;  %v2368_v18 = vld [vmem:[#allocation2 + $0xb0] sm:$0xff]  ;;  %v2374_v20 = vld [vmem:[#allocation2 + $0xa8] sm:$0xff] }
  0x2c   :  { %272 = vmatpush1.msra.mxu1 %v2346_v11  ;;  %202 = vmatprep.subr.mxu0 %v2350_v12  ;;  %v2370_v19 = vld [vmem:[#allocation5 + $0xb0] sm:$0xff]  ;;  %v2376_v21 = vld [vmem:[#allocation5 + $0xa8] sm:$0xff]  ;;  %v2380_v22 = vld [vmem:[#allocation2 + $0xa0] sm:$0xff]  ;;  %p2264_p5 = pnand %p2263_p4, %p2257_p1 }
  0x2d   :  { %273 = vmatprep.subr.mxu1 %v2352_v13  ;;  %203 = vmatpush1.msra.mxu0 %v2356_v14  ;;  %v2382_v23 = vld [vmem:[#allocation5 + $0xa0] sm:$0xff]  ;;  %v2386_v24 = vld [vmem:[#allocation2 + $0x98] sm:$0xff]  ;;  %v2392_v26 = vld [vmem:[#allocation2 + $0x90] sm:$0xff] }
  0x2e   :  { %274 = vmatpush1.msra.mxu1 %v2358_v15  ;;  %204 = vmatprep.subr.mxu0 %v2362_v16  ;;  %v2388_v25 = vld [vmem:[#allocation5 + $0x98] sm:$0xff]  ;;  %v2394_v27 = vld [vmem:[#allocation5 + $0x90] sm:$0xff]  ;;  %v2398_v28 = vld [vmem:[#allocation2 + $0x88] sm:$0xff] }
  0x2f   :  { %275 = vmatprep.subr.mxu1 %v2364_v17  ;;  %205 = vmatpush1.msra.mxu0 %v2368_v18  ;;  %v2400_v29 = vld [vmem:[#allocation5 + $0x88] sm:$0xff]  ;;  %v2404_v30 = vld [vmem:[#allocation2 + $0x80] sm:$0xff]  ;;  %v2410_v32 = vld [vmem:[#allocation2 + $0x78] sm:$0xff] }
  0x30   :  { %276 = vmatpush1.msra.mxu1 %v2370_v19  ;;  %206 = vmatprep.subr.mxu0 %v2374_v20  ;;  %v2406_v31 = vld [vmem:[#allocation5 + $0x80] sm:$0xff]  ;;  %v2412_v33 = vld [vmem:[#allocation5 + $0x78] sm:$0xff]  ;;  %v2416_v34 = vld [vmem:[#allocation2 + $0x70] sm:$0xff] }
  0x31   :  { %277 = vmatprep.subr.mxu1 %v2376_v21  ;;  %207 = vmatpush1.msra.mxu0 %v2380_v22  ;;  %v2418_v35 = vld [vmem:[#allocation5 + $0x70] sm:$0xff]  ;;  %v2422_v36 = vld [vmem:[#allocation2 + $0x68] sm:$0xff]  ;;  %v2428_v38 = vld [vmem:[#allocation2 + $0x60] sm:$0xff] }
  0x32   :  { %278 = vmatpush1.msra.mxu1 %v2382_v23  ;;  %208 = vmatprep.subr.mxu0 %v2386_v24  ;;  %v2424_v37 = vld [vmem:[#allocation5 + $0x68] sm:$0xff]  ;;  %v2430_v39 = vld [vmem:[#allocation5 + $0x60] sm:$0xff]  ;;  %v2434_v40 = vld [vmem:[#allocation2 + $0x58] sm:$0xff] }
  0x33   :  { %279 = vmatprep.subr.mxu1 %v2388_v25  ;;  %209 = vmatpush1.msra.mxu0 %v2392_v26  ;;  %v2436_v41 = vld [vmem:[#allocation5 + $0x58] sm:$0xff]  ;;  %v2440_v42 = vld [vmem:[#allocation2 + $0x50] sm:$0xff]  ;;  %v2446_v44 = vld [vmem:[#allocation2 + $0x48] sm:$0xff] }
  0x34   :  { %280 = vmatpush1.msra.mxu1 %v2394_v27  ;;  %210 = vmatprep.subr.mxu0 %v2398_v28  ;;  %5364 = vst [vmem:[#allocation12_spill] sm:$0xff] %v2440_v42  ;;  %v2442_v43 = vld [vmem:[#allocation5 + $0x50] sm:$0xff]  ;;  %5366 = vst [vmem:[#allocation14_spill] sm:$0xff] %v2446_v44  ;;  %v2448_v45 = vld [vmem:[#allocation5 + $0x48] sm:$0xff] }
  0x35   :  { %281 = vmatprep.subr.mxu1 %v2400_v29  ;;  %211 = vmatpush1.msra.mxu0 %v2404_v30  ;;  %5365 = vst [vmem:[#allocation13_spill] sm:$0xff] %v2442_v43  ;;  %5367 = vst [vmem:[#allocation15_spill] sm:$0xff] %v2448_v45  ;;  %v2452_v46 = vld [vmem:[#allocation2 + $0x40] sm:$0xff]  ;;  %v2458_v48 = vld [vmem:[#allocation2 + $0x38] sm:$0xff] }
  0x36   :  { %282 = vmatpush1.msra.mxu1 %v2406_v31  ;;  %212 = vmatprep.subr.mxu0 %v2410_v32  ;;  %5368 = vst [vmem:[#allocation16_spill] sm:$0xff] %v2452_v46  ;;  %v2454_v47 = vld [vmem:[#allocation5 + $0x40] sm:$0xff]  ;;  %5370 = vst [vmem:[#allocation18_spill] sm:$0xff] %v2458_v48  ;;  %v2460_v49 = vld [vmem:[#allocation5 + $0x38] sm:$0xff] }
  0x37   :  { %283 = vmatprep.subr.mxu1 %v2412_v33  ;;  %213 = vmatpush1.msra.mxu0 %v2416_v34  ;;  %5369 = vst [vmem:[#allocation17_spill] sm:$0xff] %v2454_v47  ;;  %5371 = vst [vmem:[#allocation19_spill] sm:$0xff] %v2460_v49  ;;  %v2464_v50 = vld [vmem:[#allocation2 + $0x30] sm:$0xff]  ;;  %v2470_v52 = vld [vmem:[#allocation2 + $0x28] sm:$0xff] }
  0x38   :  { %284 = vmatpush1.msra.mxu1 %v2418_v35  ;;  %214 = vmatprep.subr.mxu0 %v2422_v36  ;;  %5372 = vst [vmem:[#allocation20_spill] sm:$0xff] %v2464_v50  ;;  %v2466_v51 = vld [vmem:[#allocation5 + $0x30] sm:$0xff]  ;;  %5374 = vst [vmem:[#allocation22_spill] sm:$0xff] %v2470_v52  ;;  %v2472_v53 = vld [vmem:[#allocation5 + $0x28] sm:$0xff] }
  0x39   :  { %285 = vmatprep.subr.mxu1 %v2424_v37  ;;  %215 = vmatpush1.msra.mxu0 %v2428_v38  ;;  %5373 = vst [vmem:[#allocation21_spill] sm:$0xff] %v2466_v51  ;;  %5375 = vst [vmem:[#allocation23_spill] sm:$0xff] %v2472_v53  ;;  %v2476_v54 = vld [vmem:[#allocation2 + $0x20] sm:$0xff]  ;;  %v2482_v56 = vld [vmem:[#allocation2 + $0x18] sm:$0xff] }
  0x3a   :  { %286 = vmatpush1.msra.mxu1 %v2430_v39  ;;  %216 = vmatprep.subr.mxu0 %v2434_v40  ;;  %5376 = vst [vmem:[#allocation24_spill] sm:$0xff] %v2476_v54  ;;  %v2478_v55 = vld [vmem:[#allocation5 + $0x20] sm:$0xff]  ;;  %5378 = vst [vmem:[#allocation26_spill] sm:$0xff] %v2482_v56  ;;  %v2484_v57 = vld [vmem:[#allocation5 + $0x18] sm:$0xff] }
  0x3b   :  { %287 = vmatprep.subr.mxu1 %v2436_v41  ;;  %217 = vmatpush1.msra.mxu0 %v2440_v42  ;;  %5377 = vst [vmem:[#allocation25_spill] sm:$0xff] %v2478_v55  ;;  %5379 = vst [vmem:[#allocation27_spill] sm:$0xff] %v2484_v57  ;;  %v2488_v58 = vld [vmem:[#allocation2 + $0x10] sm:$0xff]  ;;  %v2494_v60 = vld [vmem:[#allocation2 + $0x8] sm:$0xff] }
  0x3c   :  { %288 = vmatpush1.msra.mxu1 %v2442_v43  ;;  %218 = vmatprep.subr.mxu0 %v2446_v44  ;;  %5380 = vst [vmem:[#allocation28_spill] sm:$0xff] %v2488_v58  ;;  %v2490_v59 = vld [vmem:[#allocation5 + $0x10] sm:$0xff]  ;;  %5382 = vst [vmem:[#allocation30_spill] sm:$0xff] %v2494_v60  ;;  %v2496_v61 = vld [vmem:[#allocation5 + $0x8] sm:$0xff] }
  0x3d   :  { %289 = vmatprep.subr.mxu1 %v2448_v45  ;;  %219 = vmatpush1.msra.mxu0 %v2452_v46  ;;  %5381 = vst [vmem:[#allocation29_spill] sm:$0xff] %v2490_v59  ;;  %5383 = vst [vmem:[#allocation31_spill] sm:$0xff] %v2496_v61  ;;  %v2500_v62 = vld [vmem:[#allocation2] sm:$0xff] }
  0x3e   :  { %290 = vmatpush1.msra.mxu1 %v2454_v47  ;;  %220 = vmatprep.subr.mxu0 %v2458_v48  ;;  %5384 = vst [vmem:[#allocation32_spill] sm:$0xff] %v2500_v62  ;;  %v2502_v63 = vld [vmem:[#allocation5] sm:$0xff] }
  0x3f   :  { %291 = vmatprep.subr.mxu1 %v2460_v49  ;;  %221 = vmatpush1.msra.mxu0 %v2464_v50  ;;  %5385 = vst [vmem:[#allocation33_spill] sm:$0xff] %v2502_v63 }
  0x40   :  { %292 = vmatpush1.msra.mxu1 %v2466_v51  ;;  %222 = vmatprep.subr.mxu0 %v2470_v52 }
  0x41   :  { %293 = vmatprep.subr.mxu1 %v2472_v53  ;;  %223 = vmatpush1.msra.mxu0 %v2476_v54  ;;  %v2506_v53 = vld [vmem:[#allocation2 + $0x1f8] sm:$0xff] }
  0x42   :  { %294 = vmatpush1.msra.mxu1 %v2478_v55  ;;  %224 = vmatprep.subr.mxu0 %v2482_v56  ;;  %5386 = vst [vmem:[#allocation34_spill] sm:$0xff] %v2506_v53  ;;  %v2508_v54 = vld [vmem:[#allocation5 + $0x1f8] sm:$0xff]  ;;  %v2512_v55 = vld [vmem:[#allocation2 + $0x1f0] sm:$0xff] }
  0x43   :  { %295 = vmatprep.subr.mxu1 %v2484_v57  ;;  %225 = vmatpush1.msra.mxu0 %v2488_v58  ;;  %5387 = vst [vmem:[#allocation35_spill] sm:$0xff] %v2508_v54  ;;  %5388 = vst [vmem:[#allocation36_spill] sm:$0xff] %v2512_v55  ;;  %v2514_v56 = vld [vmem:[#allocation5 + $0x1f0] sm:$0xff]  ;;  %v2518_v57 = vld [vmem:[#allocation2 + $0x1e8] sm:$0xff] }
  0x44   :  { %296 = vmatpush1.msra.mxu1 %v2490_v59  ;;  %226 = vmatprep.subr.mxu0 %v2494_v60  ;;  %5389 = vst [vmem:[#allocation37_spill] sm:$0xff] %v2514_v56  ;;  %5390 = vst [vmem:[#allocation38_spill] sm:$0xff] %v2518_v57  ;;  %v2520_v58 = vld [vmem:[#allocation5 + $0x1e8] sm:$0xff]  ;;  %v2524_v59 = vld [vmem:[#allocation2 + $0x1e0] sm:$0xff] }
  0x45   :  { %297 = vmatprep.subr.mxu1 %v2496_v61  ;;  %227 = vmatpush1.msra.mxu0 %v2500_v62  ;;  %5391 = vst [vmem:[#allocation39_spill] sm:$0xff] %v2520_v58  ;;  %5392 = vst [vmem:[#allocation40_spill] sm:$0xff] %v2524_v59  ;;  %v2526_v60 = vld [vmem:[#allocation5 + $0x1e0] sm:$0xff]  ;;  %v2530_v61 = vld [vmem:[#allocation2 + $0x1d8] sm:$0xff] }
  0x46   :  { %298 = vmatpush1.msra.mxu1 %v2502_v63  ;;  %228 = vmatprep.subr.mxu0 %v2506_v53  ;;  %5393 = vst [vmem:[#allocation41_spill] sm:$0xff] %v2526_v60  ;;  %5394 = vst [vmem:[#allocation42_spill] sm:$0xff] %v2530_v61  ;;  %v2532_v62 = vld [vmem:[#allocation5 + $0x1d8] sm:$0xff]  ;;  %v2536_v63 = vld [vmem:[#allocation2 + $0x1d0] sm:$0xff] }
  0x47   :  { %299 = vmatprep.subr.mxu1 %v2508_v54  ;;  %229 = vmatpush2.msra.mxu0 %v2512_v55  ;;  %5395 = vst [vmem:[#allocation43_spill] sm:$0xff] %v2532_v62  ;;  %5396 = vst [vmem:[#allocation44_spill] sm:$0xff] %v2536_v63  ;;  %v2538_v53 = vld [vmem:[#allocation5 + $0x1d0] sm:$0xff]  ;;  %v2542_v54 = vld [vmem:[#allocation2 + $0x1c8] sm:$0xff] }
  0x48   :  { %300 = vmatpush2.msra.mxu1 %v2514_v56  ;;  %230 = vmatprep.subr.mxu0 %v2518_v57  ;;  %5397 = vst [vmem:[#allocation45_spill] sm:$0xff] %v2538_v53  ;;  %5398 = vst [vmem:[#allocation46_spill] sm:$0xff] %v2542_v54  ;;  %v2544_v55 = vld [vmem:[#allocation5 + $0x1c8] sm:$0xff]  ;;  %v2548_v56 = vld [vmem:[#allocation2 + $0x1c0] sm:$0xff] }
  0x49   :  { %301 = vmatprep.subr.mxu1 %v2520_v58  ;;  %231 = vmatpush2.msra.mxu0 %v2524_v59  ;;  %5399 = vst [vmem:[#allocation47_spill] sm:$0xff] %v2544_v55  ;;  %5400 = vst [vmem:[#allocation48_spill] sm:$0xff] %v2548_v56  ;;  %v2550_v57 = vld [vmem:[#allocation5 + $0x1c0] sm:$0xff]  ;;  %v2554_v58 = vld [vmem:[#allocation2 + $0x1b8] sm:$0xff] }
  0x4a   :  { %302 = vmatpush2.msra.mxu1 %v2526_v60  ;;  %232 = vmatprep.subr.mxu0 %v2530_v61  ;;  %5401 = vst [vmem:[#allocation49_spill] sm:$0xff] %v2550_v57  ;;  %5402 = vst [vmem:[#allocation50_spill] sm:$0xff] %v2554_v58  ;;  %v2556_v59 = vld [vmem:[#allocation5 + $0x1b8] sm:$0xff]  ;;  %v2560_v60 = vld [vmem:[#allocation2 + $0x1b0] sm:$0xff] }
  0x4b   :  { %303 = vmatprep.subr.mxu1 %v2532_v62  ;;  %233 = vmatpush2.msra.mxu0 %v2536_v63  ;;  %5403 = vst [vmem:[#allocation51_spill] sm:$0xff] %v2556_v59  ;;  %5404 = vst [vmem:[#allocation52_spill] sm:$0xff] %v2560_v60  ;;  %v2562_v61 = vld [vmem:[#allocation5 + $0x1b0] sm:$0xff]  ;;  %v2566_v62 = vld [vmem:[#allocation2 + $0x1a8] sm:$0xff] }
  0x4c   :  { %304 = vmatpush2.msra.mxu1 %v2538_v53  ;;  %234 = vmatprep.subr.mxu0 %v2542_v54  ;;  %5405 = vst [vmem:[#allocation53_spill] sm:$0xff] %v2562_v61  ;;  %5406 = vst [vmem:[#allocation54_spill] sm:$0xff] %v2566_v62  ;;  %v2568_v63 = vld [vmem:[#allocation5 + $0x1a8] sm:$0xff]  ;;  %v2572_v53 = vld [vmem:[#allocation2 + $0x1a0] sm:$0xff] }
  0x4d   :  { %305 = vmatprep.subr.mxu1 %v2544_v55  ;;  %235 = vmatpush2.msra.mxu0 %v2548_v56  ;;  %5407 = vst [vmem:[#allocation55_spill] sm:$0xff] %v2568_v63  ;;  %5408 = vst [vmem:[#allocation56_spill] sm:$0xff] %v2572_v53  ;;  %v2574_v54 = vld [vmem:[#allocation5 + $0x1a0] sm:$0xff]  ;;  %v2578_v55 = vld [vmem:[#allocation2 + $0x198] sm:$0xff] }
  0x4e   :  { %306 = vmatpush2.msra.mxu1 %v2550_v57  ;;  %236 = vmatprep.subr.mxu0 %v2554_v58  ;;  %5409 = vst [vmem:[#allocation57_spill] sm:$0xff] %v2574_v54  ;;  %5410 = vst [vmem:[#allocation58_spill] sm:$0xff] %v2578_v55  ;;  %v2580_v56 = vld [vmem:[#allocation5 + $0x198] sm:$0xff]  ;;  %v2584_v57 = vld [vmem:[#allocation2 + $0x190] sm:$0xff] }
  0x4f   :  { %307 = vmatprep.subr.mxu1 %v2556_v59  ;;  %237 = vmatpush2.msra.mxu0 %v2560_v60  ;;  %5411 = vst [vmem:[#allocation59_spill] sm:$0xff] %v2580_v56  ;;  %5412 = vst [vmem:[#allocation60_spill] sm:$0xff] %v2584_v57  ;;  %v2586_v58 = vld [vmem:[#allocation5 + $0x190] sm:$0xff]  ;;  %v2590_v59 = vld [vmem:[#allocation2 + $0x188] sm:$0xff] }
  0x50   :  { %308 = vmatpush2.msra.mxu1 %v2562_v61  ;;  %238 = vmatprep.subr.mxu0 %v2566_v62  ;;  %5413 = vst [vmem:[#allocation61_spill] sm:$0xff] %v2586_v58  ;;  %5414 = vst [vmem:[#allocation62_spill] sm:$0xff] %v2590_v59  ;;  %v2592_v60 = vld [vmem:[#allocation5 + $0x188] sm:$0xff]  ;;  %v2596_v61 = vld [vmem:[#allocation2 + $0x180] sm:$0xff] }
  0x51   :  { %309 = vmatprep.subr.mxu1 %v2568_v63  ;;  %239 = vmatpush2.msra.mxu0 %v2572_v53  ;;  %5415 = vst [vmem:[#allocation63_spill] sm:$0xff] %v2592_v60  ;;  %5416 = vst [vmem:[#allocation64_spill] sm:$0xff] %v2596_v61  ;;  %v2598_v62 = vld [vmem:[#allocation5 + $0x180] sm:$0xff]  ;;  %v2602_v63 = vld [vmem:[#allocation2 + $0x178] sm:$0xff] }
  0x52   :  { %310 = vmatpush2.msra.mxu1 %v2574_v54  ;;  %240 = vmatprep.subr.mxu0 %v2578_v55  ;;  %5417 = vst [vmem:[#allocation65_spill] sm:$0xff] %v2598_v62  ;;  %5418 = vst [vmem:[#allocation66_spill] sm:$0xff] %v2602_v63  ;;  %v2604_v53 = vld [vmem:[#allocation5 + $0x178] sm:$0xff]  ;;  %v2608_v54 = vld [vmem:[#allocation2 + $0x170] sm:$0xff] }
  0x53   :  { %311 = vmatprep.subr.mxu1 %v2580_v56  ;;  %241 = vmatpush2.msra.mxu0 %v2584_v57  ;;  %5419 = vst [vmem:[#allocation67_spill] sm:$0xff] %v2604_v53  ;;  %5420 = vst [vmem:[#allocation68_spill] sm:$0xff] %v2608_v54  ;;  %v2610_v55 = vld [vmem:[#allocation5 + $0x170] sm:$0xff]  ;;  %v2614_v56 = vld [vmem:[#allocation2 + $0x168] sm:$0xff] }
  0x54   :  { %312 = vmatpush2.msra.mxu1 %v2586_v58  ;;  %242 = vmatprep.subr.mxu0 %v2590_v59  ;;  %5421 = vst [vmem:[#allocation69_spill] sm:$0xff] %v2610_v55  ;;  %5422 = vst [vmem:[#allocation70_spill] sm:$0xff] %v2614_v56  ;;  %v2616_v57 = vld [vmem:[#allocation5 + $0x168] sm:$0xff]  ;;  %v2620_v58 = vld [vmem:[#allocation2 + $0x160] sm:$0xff] }
  0x55   :  { %313 = vmatprep.subr.mxu1 %v2592_v60  ;;  %243 = vmatpush2.msra.mxu0 %v2596_v61  ;;  %5423 = vst [vmem:[#allocation71_spill] sm:$0xff] %v2616_v57  ;;  %5424 = vst [vmem:[#allocation72_spill] sm:$0xff] %v2620_v58  ;;  %v2622_v59 = vld [vmem:[#allocation5 + $0x160] sm:$0xff]  ;;  %v2626_v60 = vld [vmem:[#allocation2 + $0x158] sm:$0xff] }
  0x56   :  { %314 = vmatpush2.msra.mxu1 %v2598_v62  ;;  %244 = vmatprep.subr.mxu0 %v2602_v63  ;;  %5425 = vst [vmem:[#allocation73_spill] sm:$0xff] %v2622_v59  ;;  %5426 = vst [vmem:[#allocation74_spill] sm:$0xff] %v2626_v60  ;;  %v2628_v61 = vld [vmem:[#allocation5 + $0x158] sm:$0xff]  ;;  %v2632_v62 = vld [vmem:[#allocation2 + $0x150] sm:$0xff] }
  0x57   :  { %315 = vmatprep.subr.mxu1 %v2604_v53  ;;  %245 = vmatpush2.msra.mxu0 %v2608_v54  ;;  %5427 = vst [vmem:[#allocation75_spill] sm:$0xff] %v2628_v61  ;;  %5428 = vst [vmem:[#allocation76_spill] sm:$0xff] %v2632_v62  ;;  %v2634_v63 = vld [vmem:[#allocation5 + $0x150] sm:$0xff]  ;;  %v2638_v53 = vld [vmem:[#allocation2 + $0x148] sm:$0xff] }
  0x58   :  { %316 = vmatpush2.msra.mxu1 %v2610_v55  ;;  %246 = vmatprep.subr.mxu0 %v2614_v56  ;;  %5429 = vst [vmem:[#allocation77_spill] sm:$0xff] %v2634_v63  ;;  %5430 = vst [vmem:[#allocation78_spill] sm:$0xff] %v2638_v53  ;;  %v2640_v54 = vld [vmem:[#allocation5 + $0x148] sm:$0xff]  ;;  %v2644_v55 = vld [vmem:[#allocation2 + $0x140] sm:$0xff] }
  0x59   :  { %317 = vmatprep.subr.mxu1 %v2616_v57  ;;  %247 = vmatpush2.msra.mxu0 %v2620_v58  ;;  %5431 = vst [vmem:[#allocation79_spill] sm:$0xff] %v2640_v54  ;;  %5432 = vst [vmem:[#allocation80_spill] sm:$0xff] %v2644_v55  ;;  %v2646_v56 = vld [vmem:[#allocation5 + $0x140] sm:$0xff]  ;;  %v2650_v57 = vld [vmem:[#allocation2 + $0x138] sm:$0xff] }
  0x5a   :  { %318 = vmatpush2.msra.mxu1 %v2622_v59  ;;  %248 = vmatprep.subr.mxu0 %v2626_v60  ;;  %5433 = vst [vmem:[#allocation81_spill] sm:$0xff] %v2646_v56  ;;  %5434 = vst [vmem:[#allocation82_spill] sm:$0xff] %v2650_v57  ;;  %v2652_v58 = vld [vmem:[#allocation5 + $0x138] sm:$0xff]  ;;  %v2656_v59 = vld [vmem:[#allocation2 + $0x130] sm:$0xff] }
  0x5b   :  { %319 = vmatprep.subr.mxu1 %v2628_v61  ;;  %249 = vmatpush2.msra.mxu0 %v2632_v62  ;;  %5435 = vst [vmem:[#allocation83_spill] sm:$0xff] %v2652_v58  ;;  %5436 = vst [vmem:[#allocation84_spill] sm:$0xff] %v2656_v59  ;;  %v2658_v60 = vld [vmem:[#allocation5 + $0x130] sm:$0xff]  ;;  %v2662_v61 = vld [vmem:[#allocation2 + $0x128] sm:$0xff] }
  0x5c   :  { %320 = vmatpush2.msra.mxu1 %v2634_v63  ;;  %250 = vmatprep.subr.mxu0 %v2638_v53  ;;  %5437 = vst [vmem:[#allocation85_spill] sm:$0xff] %v2658_v60  ;;  %5438 = vst [vmem:[#allocation86_spill] sm:$0xff] %v2662_v61  ;;  %v2664_v62 = vld [vmem:[#allocation5 + $0x128] sm:$0xff]  ;;  %v2668_v63 = vld [vmem:[#allocation2 + $0x120] sm:$0xff] }
  0x5d   :  { %321 = vmatprep.subr.mxu1 %v2640_v54  ;;  %251 = vmatpush2.msra.mxu0 %v2644_v55  ;;  %5439 = vst [vmem:[#allocation87_spill] sm:$0xff] %v2664_v62  ;;  %5440 = vst [vmem:[#allocation88_spill] sm:$0xff] %v2668_v63  ;;  %v2670_v53 = vld [vmem:[#allocation5 + $0x120] sm:$0xff]  ;;  %v2674_v54 = vld [vmem:[#allocation2 + $0x118] sm:$0xff] }
  0x5e   :  { %322 = vmatpush2.msra.mxu1 %v2646_v56  ;;  %252 = vmatprep.subr.mxu0 %v2650_v57  ;;  %5441 = vst [vmem:[#allocation89_spill] sm:$0xff] %v2670_v53  ;;  %5442 = vst [vmem:[#allocation90_spill] sm:$0xff] %v2674_v54  ;;  %v2676_v55 = vld [vmem:[#allocation5 + $0x118] sm:$0xff]  ;;  %v2680_v56 = vld [vmem:[#allocation2 + $0x110] sm:$0xff] }
  0x5f   :  { %323 = vmatprep.subr.mxu1 %v2652_v58  ;;  %253 = vmatpush2.msra.mxu0 %v2656_v59  ;;  %v2682_v57 = vld [vmem:[#allocation5 + $0x110] sm:$0xff]  ;;  %v2686_v58 = vld [vmem:[#allocation2 + $0x108] sm:$0xff] }
  0x60   :  { %324 = vmatpush2.msra.mxu1 %v2658_v60  ;;  %254 = vmatprep.subr.mxu0 %v2662_v61  ;;  %v2688_v59 = vld [vmem:[#allocation5 + $0x108] sm:$0xff]  ;;  %v2692_v60 = vld [vmem:[#allocation2 + $0x100] sm:$0xff] }
  0x61   :  { %325 = vmatprep.subr.mxu1 %v2664_v62  ;;  %255 = vmatpush2.msra.mxu0 %v2668_v63  ;;  %v2694_v61 = vld [vmem:[#allocation7 + $0x8] sm:$0xff]  ;;  %v2698_v62 = vld [vmem:[#allocation5 + $0x100] sm:$0xff]  ;;  %v2700_v63 = vld [vmem:[#allocation7 + $0x18] sm:$0xff] }
  0x62   :  { %326 = vmatpush2.msra.mxu1 %v2670_v53  ;;  %256 = vmatprep.subr.mxu0 %v2674_v54  ;;  %v2704_v53 = vld [vmem:[#allocation7] sm:$0xff]  ;;  %v2706_v54 = vld [vmem:[#allocation7 + $0x10] sm:$0xff] }
  0x63   :  { %327 = vmatprep.subr.mxu1 %v2676_v55  ;;  %257 = vmatpush2.msra.mxu0 %v2680_v56 }
  0x64   :  { %328 = vmatpush2.msra.mxu1 %v2682_v57  ;;  %258 = vmatprep.subr.mxu0 %v2686_v58 }
  0x65   :  { %329 = vmatprep.subr.mxu1 %v2688_v59  ;;  %259 = vmatpush2.msra.mxu0 %v2692_v60 }
  0x66   :  { %260 = vmatprep.mubr.f32.mxu0 %v2694_v61  ;;  %330 = vmatpush2.msra.mxu1 %v2698_v62 }
  0x67   :  { %331 = vmatprep.mubr.f32.mxu1 %v2700_v63  ;;  %261 = vmatmul.mubr.f32.vlgmr.msra.gmra.mxu0 %v2704_v53 }
  0x68   :  { %332 = vmatmul.mubr.f32.vlgmr.msra.gmra.mxu1 %v2706_v54  ;;  %340 = vmatprep.subr.mxu0 %v2318_v0 }
  0x69   :  { %411 = vmatprep.subr.mxu1 %v2320_v1  ;;  %341 = vmatpush1.msra.mxu0 %v2322_v2 }
  0x6a   :  { %412 = vmatpush1.msra.mxu1 %v2326_v3  ;;  %342 = vmatprep.subr.mxu0 %v2328_v4 }
  0x6b   :  { %413 = vmatprep.subr.mxu1 %v2330_v5  ;;  %343 = vmatpush1.msra.mxu0 %v2334_v6 }
  0x6c   :  { %414 = vmatpush1.msra.mxu1 %v2336_v7  ;;  %344 = vmatprep.subr.mxu0 %v2338_v8 }
  0x6d   :  { %415 = vmatprep.subr.mxu1 %v2342_v9  ;;  %345 = vmatpush1.msra.mxu0 %v2344_v10 }
  0x6e   :  { %416 = vmatpush1.msra.mxu1 %v2346_v11  ;;  %346 = vmatprep.subr.mxu0 %v2350_v12 }
  0x6f   :  { %417 = vmatprep.subr.mxu1 %v2352_v13  ;;  %347 = vmatpush1.msra.mxu0 %v2356_v14 }
  0x70   :  { %418 = vmatpush1.msra.mxu1 %v2358_v15  ;;  %348 = vmatprep.subr.mxu0 %v2362_v16 }
  0x71   :  { %419 = vmatprep.subr.mxu1 %v2364_v17  ;;  %349 = vmatpush1.msra.mxu0 %v2368_v18 }
  0x72   :  { %420 = vmatpush1.msra.mxu1 %v2370_v19  ;;  %350 = vmatprep.subr.mxu0 %v2374_v20 }
  0x73   :  { %421 = vmatprep.subr.mxu1 %v2376_v21  ;;  %351 = vmatpush1.msra.mxu0 %v2380_v22 }
  0x74   :  { %422 = vmatpush1.msra.mxu1 %v2382_v23  ;;  %352 = vmatprep.subr.mxu0 %v2386_v24 }
  0x75   :  { %423 = vmatprep.subr.mxu1 %v2388_v25  ;;  %353 = vmatpush1.msra.mxu0 %v2392_v26 }
  0x76   :  { %424 = vmatpush1.msra.mxu1 %v2394_v27  ;;  %354 = vmatprep.subr.mxu0 %v2398_v28 }
  0x77   :  { %425 = vmatprep.subr.mxu1 %v2400_v29  ;;  %355 = vmatpush1.msra.mxu0 %v2404_v30 }
  0x78   :  { %426 = vmatpush1.msra.mxu1 %v2406_v31  ;;  %356 = vmatprep.subr.mxu0 %v2410_v32 }
  0x79   :  { %427 = vmatprep.subr.mxu1 %v2412_v33  ;;  %357 = vmatpush1.msra.mxu0 %v2416_v34 }
  0x7a   :  { %428 = vmatpush1.msra.mxu1 %v2418_v35  ;;  %358 = vmatprep.subr.mxu0 %v2422_v36 }
  0x7b   :  { %429 = vmatprep.subr.mxu1 %v2424_v37  ;;  %359 = vmatpush1.msra.mxu0 %v2428_v38 }
  0x7c   :  { %430 = vmatpush1.msra.mxu1 %v2430_v39  ;;  %360 = vmatprep.subr.mxu0 %v2434_v40 }
  0x7d   :  { %431 = vmatprep.subr.mxu1 %v2436_v41  ;;  %361 = vmatpush1.msra.mxu0 %v2440_v42  ;;  %v5443_v42 = vld [vmem:[#allocation23_spill] sm:$0xff] }
  0x7e   :  { %432 = vmatpush1.msra.mxu1 %v2442_v43  ;;  %362 = vmatprep.subr.mxu0 %v2446_v44  ;;  %v5444_v43 = vld [vmem:[#allocation24_spill] sm:$0xff]  ;;  %v5445_v44 = vld [vmem:[#allocation25_spill] sm:$0xff] }
  0x7f   :  { %433 = vmatprep.subr.mxu1 %v2448_v45  ;;  %363 = vmatpush1.msra.mxu0 %v2452_v46  ;;  %v5446_v45 = vld [vmem:[#allocation26_spill] sm:$0xff]  ;;  %v5447_v46 = vld [vmem:[#allocation27_spill] sm:$0xff] }
  0x80   :  { %434 = vmatpush1.msra.mxu1 %v2454_v47  ;;  %364 = vmatprep.subr.mxu0 %v2458_v48  ;;  %v5448_v47 = vld [vmem:[#allocation28_spill] sm:$0xff]  ;;  %v5449_v48 = vld [vmem:[#allocation29_spill] sm:$0xff] }
  0x81   :  { %435 = vmatprep.subr.mxu1 %v2460_v49  ;;  %365 = vmatpush1.msra.mxu0 %v2464_v50  ;;  %v5450_v49 = vld [vmem:[#allocation30_spill] sm:$0xff]  ;;  %v5451_v50 = vld [vmem:[#allocation31_spill] sm:$0xff] }
  0x82   :  { %436 = vmatpush1.msra.mxu1 %v2466_v51  ;;  %366 = vmatprep.subr.mxu0 %v2470_v52  ;;  %v5452_v51 = vld [vmem:[#allocation32_spill] sm:$0xff]  ;;  %v5453_v52 = vld [vmem:[#allocation33_spill] sm:$0xff] }
  0x83   :  { %437 = vmatprep.subr.mxu1 %v5443_v42  ;;  %367 = vmatpush1.msra.mxu0 %v5444_v43  ;;  %v5454_v42 = vld [vmem:[#allocation34_spill] sm:$0xff]  ;;  %v5455_v43 = vld [vmem:[#allocation35_spill] sm:$0xff] }
  0x84   :  { %438 = vmatpush1.msra.mxu1 %v5445_v44  ;;  %368 = vmatprep.subr.mxu0 %v5446_v45  ;;  %v5456_v44 = vld [vmem:[#allocation36_spill] sm:$0xff]  ;;  %v5457_v45 = vld [vmem:[#allocation37_spill] sm:$0xff] }
  0x85   :  { %439 = vmatprep.subr.mxu1 %v5447_v46  ;;  %369 = vmatpush1.msra.mxu0 %v5448_v47  ;;  %v5458_v46 = vld [vmem:[#allocation38_spill] sm:$0xff]  ;;  %v5459_v47 = vld [vmem:[#allocation39_spill] sm:$0xff] }
  0x86   :  { %440 = vmatpush1.msra.mxu1 %v5449_v48  ;;  %370 = vmatprep.subr.mxu0 %v5450_v49  ;;  %v5460_v48 = vld [vmem:[#allocation40_spill] sm:$0xff]  ;;  %v5461_v49 = vld [vmem:[#allocation41_spill] sm:$0xff] }
  0x87   :  { %441 = vmatprep.subr.mxu1 %v5451_v50  ;;  %371 = vmatpush1.msra.mxu0 %v5452_v51  ;;  %v5462_v50 = vld [vmem:[#allocation42_spill] sm:$0xff]  ;;  %v5463_v51 = vld [vmem:[#allocation43_spill] sm:$0xff] }
  0x88   :  { %442 = vmatpush1.msra.mxu1 %v5453_v52  ;;  %372 = vmatprep.subr.mxu0 %v5454_v42  ;;  %v5464_v52 = vld [vmem:[#allocation44_spill] sm:$0xff]  ;;  %v5465_v42 = vld [vmem:[#allocation45_spill] sm:$0xff] }
  0x89   :  { %443 = vmatprep.subr.mxu1 %v5455_v43  ;;  %373 = vmatpush2.msra.mxu0 %v5456_v44  ;;  %v5466_v43 = vld [vmem:[#allocation46_spill] sm:$0xff]  ;;  %v5467_v44 = vld [vmem:[#allocation47_spill] sm:$0xff] }
  0x8a   :  { %444 = vmatpush2.msra.mxu1 %v5457_v45  ;;  %374 = vmatprep.subr.mxu0 %v5458_v46  ;;  %v5468_v45 = vld [vmem:[#allocation48_spill] sm:$0xff]  ;;  %v5469_v46 = vld [vmem:[#allocation49_spill] sm:$0xff] }
  0x8b   :  { %445 = vmatprep.subr.mxu1 %v5459_v47  ;;  %375 = vmatpush2.msra.mxu0 %v5460_v48  ;;  %v5470_v47 = vld [vmem:[#allocation50_spill] sm:$0xff]  ;;  %v5471_v48 = vld [vmem:[#allocation51_spill] sm:$0xff] }
  0x8c   :  { %446 = vmatpush2.msra.mxu1 %v5461_v49  ;;  %376 = vmatprep.subr.mxu0 %v5462_v50  ;;  %v5472_v49 = vld [vmem:[#allocation52_spill] sm:$0xff]  ;;  %v5473_v50 = vld [vmem:[#allocation53_spill] sm:$0xff] }
  0x8d   :  { %447 = vmatprep.subr.mxu1 %v5463_v51  ;;  %377 = vmatpush2.msra.mxu0 %v5464_v52  ;;  %v5474_v51 = vld [vmem:[#allocation54_spill] sm:$0xff]  ;;  %v5475_v52 = vld [vmem:[#allocation55_spill] sm:$0xff] }
  0x8e   :  { %448 = vmatpush2.msra.mxu1 %v5465_v42  ;;  %378 = vmatprep.subr.mxu0 %v5466_v43  ;;  %v5476_v42 = vld [vmem:[#allocation56_spill] sm:$0xff]  ;;  %v5477_v43 = vld [vmem:[#allocation57_spill] sm:$0xff] }
  0x8f   :  { %449 = vmatprep.subr.mxu1 %v5467_v44  ;;  %379 = vmatpush2.msra.mxu0 %v5468_v45  ;;  %v5478_v44 = vld [vmem:[#allocation58_spill] sm:$0xff]  ;;  %v5479_v45 = vld [vmem:[#allocation59_spill] sm:$0xff] }
  0x90   :  { %450 = vmatpush2.msra.mxu1 %v5469_v46  ;;  %380 = vmatprep.subr.mxu0 %v5470_v47  ;;  %v5480_v46 = vld [vmem:[#allocation60_spill] sm:$0xff]  ;;  %v5481_v47 = vld [vmem:[#allocation61_spill] sm:$0xff] }
  0x91   :  { %451 = vmatprep.subr.mxu1 %v5471_v48  ;;  %381 = vmatpush2.msra.mxu0 %v5472_v49  ;;  %v5482_v48 = vld [vmem:[#allocation62_spill] sm:$0xff]  ;;  %v5483_v49 = vld [vmem:[#allocation63_spill] sm:$0xff] }
  0x92   :  { %452 = vmatpush2.msra.mxu1 %v5473_v50  ;;  %382 = vmatprep.subr.mxu0 %v5474_v51  ;;  %v5484_v50 = vld [vmem:[#allocation64_spill] sm:$0xff]  ;;  %v5485_v51 = vld [vmem:[#allocation65_spill] sm:$0xff] }
  0x93   :  { %453 = vmatprep.subr.mxu1 %v5475_v52  ;;  %383 = vmatpush2.msra.mxu0 %v5476_v42  ;;  %v5486_v52 = vld [vmem:[#allocation66_spill] sm:$0xff]  ;;  %v5487_v42 = vld [vmem:[#allocation67_spill] sm:$0xff] }
  0x94   :  { %454 = vmatpush2.msra.mxu1 %v5477_v43  ;;  %384 = vmatprep.subr.mxu0 %v5478_v44  ;;  %v5488_v43 = vld [vmem:[#allocation68_spill] sm:$0xff]  ;;  %v5489_v44 = vld [vmem:[#allocation69_spill] sm:$0xff] }
  0x95   :  { %455 = vmatprep.subr.mxu1 %v5479_v45  ;;  %385 = vmatpush2.msra.mxu0 %v5480_v46  ;;  %v5490_v45 = vld [vmem:[#allocation70_spill] sm:$0xff]  ;;  %v5491_v46 = vld [vmem:[#allocation71_spill] sm:$0xff] }
  0x96   :  { %456 = vmatpush2.msra.mxu1 %v5481_v47  ;;  %386 = vmatprep.subr.mxu0 %v5482_v48  ;;  %v5492_v47 = vld [vmem:[#allocation72_spill] sm:$0xff]  ;;  %v5493_v48 = vld [vmem:[#allocation73_spill] sm:$0xff] }
  0x97   :  { %457 = vmatprep.subr.mxu1 %v5483_v49  ;;  %387 = vmatpush2.msra.mxu0 %v5484_v50  ;;  %v5494_v49 = vld [vmem:[#allocation74_spill] sm:$0xff]  ;;  %v5495_v50 = vld [vmem:[#allocation75_spill] sm:$0xff] }
  0x98   :  { %458 = vmatpush2.msra.mxu1 %v5485_v51  ;;  %388 = vmatprep.subr.mxu0 %v5486_v52  ;;  %v5496_v51 = vld [vmem:[#allocation76_spill] sm:$0xff]  ;;  %v5497_v52 = vld [vmem:[#allocation77_spill] sm:$0xff] }
  0x99   :  { %459 = vmatprep.subr.mxu1 %v5487_v42  ;;  %389 = vmatpush2.msra.mxu0 %v5488_v43  ;;  %v5498_v42 = vld [vmem:[#allocation78_spill] sm:$0xff]  ;;  %v5499_v43 = vld [vmem:[#allocation79_spill] sm:$0xff] }
  0x9a   :  { %460 = vmatpush2.msra.mxu1 %v5489_v44  ;;  %390 = vmatprep.subr.mxu0 %v5490_v45  ;;  %v5500_v44 = vld [vmem:[#allocation80_spill] sm:$0xff]  ;;  %v5501_v45 = vld [vmem:[#allocation81_spill] sm:$0xff] }
  0x9b   :  { %461 = vmatprep.subr.mxu1 %v5491_v46  ;;  %391 = vmatpush2.msra.mxu0 %v5492_v47  ;;  %v5502_v46 = vld [vmem:[#allocation82_spill] sm:$0xff]  ;;  %v5503_v47 = vld [vmem:[#allocation83_spill] sm:$0xff] }
  0x9c   :  { %462 = vmatpush2.msra.mxu1 %v5493_v48  ;;  %392 = vmatprep.subr.mxu0 %v5494_v49  ;;  %v5504_v48 = vld [vmem:[#allocation84_spill] sm:$0xff]  ;;  %v5505_v49 = vld [vmem:[#allocation85_spill] sm:$0xff] }
  0x9d   :  { %463 = vmatprep.subr.mxu1 %v5495_v50  ;;  %393 = vmatpush2.msra.mxu0 %v5496_v51  ;;  %v5506_v50 = vld [vmem:[#allocation86_spill] sm:$0xff]  ;;  %v5507_v51 = vld [vmem:[#allocation87_spill] sm:$0xff] }
  0x9e   :  { %464 = vmatpush2.msra.mxu1 %v5497_v52  ;;  %394 = vmatprep.subr.mxu0 %v5498_v42  ;;  %v5508_v52 = vld [vmem:[#allocation88_spill] sm:$0xff]  ;;  %v5509_v42 = vld [vmem:[#allocation89_spill] sm:$0xff] }
  0x9f   :  { %465 = vmatprep.subr.mxu1 %v5499_v43  ;;  %395 = vmatpush2.msra.mxu0 %v5500_v44  ;;  %v5510_v43 = vld [vmem:[#allocation90_spill] sm:$0xff] }
  0xa0   :  { %466 = vmatpush2.msra.mxu1 %v5501_v45  ;;  %396 = vmatprep.subr.mxu0 %v5502_v46 }
  0xa1   :  { %467 = vmatprep.subr.mxu1 %v5503_v47  ;;  %397 = vmatpush2.msra.mxu0 %v5504_v48 }
  0xa2   :  { %468 = vmatpush2.msra.mxu1 %v5505_v49  ;;  %398 = vmatprep.subr.mxu0 %v5506_v50 }
  0xa3   :  { %469 = vmatprep.subr.mxu1 %v5507_v51  ;;  %399 = vmatpush2.msra.mxu0 %v5508_v52 }
  0xa4   :  { %470 = vmatpush2.msra.mxu1 %v5509_v42  ;;  %400 = vmatprep.subr.mxu0 %v5510_v43 }
  0xa5   :  { %471 = vmatprep.subr.mxu1 %v2676_v55  ;;  %401 = vmatpush2.msra.mxu0 %v2680_v56 }
  0xa6   :  { %472 = vmatpush2.msra.mxu1 %v2682_v57  ;;  %402 = vmatprep.subr.mxu0 %v2686_v58 }
  0xa7   :  { %473 = vmatprep.subr.mxu1 %v2688_v59  ;;  %403 = vmatpush2.msra.mxu0 %v2692_v60 }
  0xa8   :  { %404 = vmatprep.mubr.f32.mxu0 %v2700_v63  ;;  %474 = vmatpush2.msra.mxu1 %v2698_v62 }
  0xa9   :  { %475 = vmatprep.mubr.f32.mxu1 %v2694_v61  ;;  %405 = vmatmul.mubr.f32.vlgmr.msra.gmra.mxu0 %v2706_v54 }
  0xaa   :  { %476 = vmatmul.mubr.f32.vlgmr.msra.gmra.mxu1 %v2704_v53  ;;  %542 = vmatprep.subr.mxu0 %v2318_v0  ;;  %v5511_v0 = vld [vmem:[#allocation12_spill] sm:$0xff] }
  0xab   :  { %613 = vmatprep.subr.mxu1 %v2320_v1  ;;  %543 = vmatpush1.msra.mxu0 %v2322_v2  ;;  %v5512_v1 = vld [vmem:[#allocation13_spill] sm:$0xff]  ;;  %v5513_v2 = vld [vmem:[#allocation14_spill] sm:$0xff] }
  0xac   :  { %614 = vmatpush1.msra.mxu1 %v2326_v3  ;;  %544 = vmatprep.subr.mxu0 %v2328_v4  ;;  %v5514_v3 = vld [vmem:[#allocation15_spill] sm:$0xff]  ;;  %v5515_v4 = vld [vmem:[#allocation16_spill] sm:$0xff] }
  0xad   :  { %615 = vmatprep.subr.mxu1 %v2330_v5  ;;  %545 = vmatpush1.msra.mxu0 %v2334_v6  ;;  %v5516_v5 = vld [vmem:[#allocation17_spill] sm:$0xff]  ;;  %v5517_v6 = vld [vmem:[#allocation18_spill] sm:$0xff] }
  0xae   :  { %616 = vmatpush1.msra.mxu1 %v2336_v7  ;;  %546 = vmatprep.subr.mxu0 %v2338_v8  ;;  %v5518_v7 = vld [vmem:[#allocation19_spill] sm:$0xff]  ;;  %v5519_v8 = vld [vmem:[#allocation20_spill] sm:$0xff] }
  0xaf   :  { %617 = vmatprep.subr.mxu1 %v2342_v9  ;;  %547 = vmatpush1.msra.mxu0 %v2344_v10  ;;  %v5520_v9 = vld [vmem:[#allocation21_spill] sm:$0xff]  ;;  %v5521_v10 = vld [vmem:[#allocation22_spill] sm:$0xff] }
  0xb0   :  { %618 = vmatpush1.msra.mxu1 %v2346_v11  ;;  %548 = vmatprep.subr.mxu0 %v2350_v12  ;;  %v5522_v11 = vld [vmem:[#allocation23_spill] sm:$0xff]  ;;  %v5523_v12 = vld [vmem:[#allocation24_spill] sm:$0xff] }
  0xb1   :  { %619 = vmatprep.subr.mxu1 %v2352_v13  ;;  %549 = vmatpush1.msra.mxu0 %v2356_v14  ;;  %v5524_v13 = vld [vmem:[#allocation25_spill] sm:$0xff]  ;;  %v5525_v14 = vld [vmem:[#allocation26_spill] sm:$0xff] }
  0xb2   :  { %620 = vmatpush1.msra.mxu1 %v2358_v15  ;;  %550 = vmatprep.subr.mxu0 %v2362_v16  ;;  %v5526_v15 = vld [vmem:[#allocation27_spill] sm:$0xff]  ;;  %v5527_v16 = vld [vmem:[#allocation28_spill] sm:$0xff] }
  0xb3   :  { %621 = vmatprep.subr.mxu1 %v2364_v17  ;;  %551 = vmatpush1.msra.mxu0 %v2368_v18  ;;  %v5528_v17 = vld [vmem:[#allocation29_spill] sm:$0xff]  ;;  %v5529_v18 = vld [vmem:[#allocation30_spill] sm:$0xff] }
  0xb4   :  { %622 = vmatpush1.msra.mxu1 %v2370_v19  ;;  %552 = vmatprep.subr.mxu0 %v2374_v20  ;;  %v5530_v19 = vld [vmem:[#allocation31_spill] sm:$0xff]  ;;  %v5531_v20 = vld [vmem:[#allocation32_spill] sm:$0xff] }
  0xb5   :  { %623 = vmatprep.subr.mxu1 %v2376_v21  ;;  %553 = vmatpush1.msra.mxu0 %v2380_v22  ;;  %v5532_v21 = vld [vmem:[#allocation33_spill] sm:$0xff]  ;;  %v5533_v22 = vld [vmem:[#allocation34_spill] sm:$0xff] }
  0xb6   :  { %624 = vmatpush1.msra.mxu1 %v2382_v23  ;;  %554 = vmatprep.subr.mxu0 %v2386_v24  ;;  %v5534_v23 = vld [vmem:[#allocation35_spill] sm:$0xff]  ;;  %v5535_v24 = vld [vmem:[#allocation36_spill] sm:$0xff] }
  0xb7   :  { %625 = vmatprep.subr.mxu1 %v2388_v25  ;;  %555 = vmatpush1.msra.mxu0 %v2392_v26  ;;  %v5536_v25 = vld [vmem:[#allocation37_spill] sm:$0xff]  ;;  %v5537_v26 = vld [vmem:[#allocation38_spill] sm:$0xff] }
  0xb8   :  { %626 = vmatpush1.msra.mxu1 %v2394_v27  ;;  %556 = vmatprep.subr.mxu0 %v2398_v28  ;;  %v5538_v27 = vld [vmem:[#allocation39_spill] sm:$0xff]  ;;  %v5539_v28 = vld [vmem:[#allocation40_spill] sm:$0xff] }
  0xb9   :  { %627 = vmatprep.subr.mxu1 %v2400_v29  ;;  %557 = vmatpush1.msra.mxu0 %v2404_v30  ;;  %v5540_v29 = vld [vmem:[#allocation41_spill] sm:$0xff]  ;;  %v5541_v30 = vld [vmem:[#allocation42_spill] sm:$0xff] }
  0xba   :  { %628 = vmatpush1.msra.mxu1 %v2406_v31  ;;  %558 = vmatprep.subr.mxu0 %v2410_v32  ;;  %v5542_v31 = vld [vmem:[#allocation43_spill] sm:$0xff]  ;;  %v5543_v32 = vld [vmem:[#allocation44_spill] sm:$0xff] }
  0xbb   :  { %629 = vmatprep.subr.mxu1 %v2412_v33  ;;  %559 = vmatpush1.msra.mxu0 %v2416_v34  ;;  %v5544_v33 = vld [vmem:[#allocation45_spill] sm:$0xff]  ;;  %v5545_v34 = vld [vmem:[#allocation46_spill] sm:$0xff] }
  0xbc   :  { %630 = vmatpush1.msra.mxu1 %v2418_v35  ;;  %560 = vmatprep.subr.mxu0 %v2422_v36  ;;  %v5546_v35 = vld [vmem:[#allocation47_spill] sm:$0xff]  ;;  %v5547_v36 = vld [vmem:[#allocation48_spill] sm:$0xff] }
  0xbd   :  { %631 = vmatprep.subr.mxu1 %v2424_v37  ;;  %561 = vmatpush1.msra.mxu0 %v2428_v38  ;;  %v5548_v37 = vld [vmem:[#allocation49_spill] sm:$0xff]  ;;  %v5549_v38 = vld [vmem:[#allocation50_spill] sm:$0xff] }
  0xbe   :  { %632 = vmatpush1.msra.mxu1 %v2430_v39  ;;  %562 = vmatprep.subr.mxu0 %v2434_v40  ;;  %v5550_v39 = vld [vmem:[#allocation51_spill] sm:$0xff]  ;;  %v5551_v40 = vld [vmem:[#allocation52_spill] sm:$0xff] }
  0xbf   :  { %633 = vmatprep.subr.mxu1 %v2436_v41  ;;  %563 = vmatpush1.msra.mxu0 %v5511_v0  ;;  %v5552_v41 = vld [vmem:[#allocation53_spill] sm:$0xff]  ;;  %v5553_v0 = vld [vmem:[#allocation54_spill] sm:$0xff] }
  0xc0   :  { %634 = vmatpush1.msra.mxu1 %v5512_v1  ;;  %564 = vmatprep.subr.mxu0 %v5513_v2  ;;  %v5554_v1 = vld [vmem:[#allocation55_spill] sm:$0xff]  ;;  %v5555_v2 = vld [vmem:[#allocation56_spill] sm:$0xff] }
  0xc1   :  { %635 = vmatprep.subr.mxu1 %v5514_v3  ;;  %565 = vmatpush1.msra.mxu0 %v5515_v4  ;;  %v5556_v3 = vld [vmem:[#allocation57_spill] sm:$0xff]  ;;  %v5557_v4 = vld [vmem:[#allocation58_spill] sm:$0xff] }
  0xc2   :  { %636 = vmatpush1.msra.mxu1 %v5516_v5  ;;  %566 = vmatprep.subr.mxu0 %v5517_v6  ;;  %v5558_v5 = vld [vmem:[#allocation59_spill] sm:$0xff]  ;;  %v5559_v6 = vld [vmem:[#allocation60_spill] sm:$0xff] }
  0xc3   :  { %637 = vmatprep.subr.mxu1 %v5518_v7  ;;  %567 = vmatpush1.msra.mxu0 %v5519_v8  ;;  %v5560_v7 = vld [vmem:[#allocation61_spill] sm:$0xff]  ;;  %v5561_v8 = vld [vmem:[#allocation62_spill] sm:$0xff] }
  0xc4   :  { %638 = vmatpush1.msra.mxu1 %v5520_v9  ;;  %568 = vmatprep.subr.mxu0 %v5521_v10  ;;  %v5562_v9 = vld [vmem:[#allocation63_spill] sm:$0xff]  ;;  %v5563_v10 = vld [vmem:[#allocation64_spill] sm:$0xff] }
  0xc5   :  { %639 = vmatprep.subr.mxu1 %v5522_v11  ;;  %569 = vmatpush1.msra.mxu0 %v5523_v12  ;;  %v5564_v11 = vld [vmem:[#allocation65_spill] sm:$0xff]  ;;  %v5565_v12 = vld [vmem:[#allocation66_spill] sm:$0xff] }
  0xc6   :  { %640 = vmatpush1.msra.mxu1 %v5524_v13  ;;  %570 = vmatprep.subr.mxu0 %v5525_v14  ;;  %v5566_v13 = vld [vmem:[#allocation67_spill] sm:$0xff]  ;;  %v5567_v14 = vld [vmem:[#allocation68_spill] sm:$0xff] }
  0xc7   :  { %641 = vmatprep.subr.mxu1 %v5526_v15  ;;  %571 = vmatpush1.msra.mxu0 %v5527_v16  ;;  %v5568_v15 = vld [vmem:[#allocation69_spill] sm:$0xff]  ;;  %v5569_v16 = vld [vmem:[#allocation70_spill] sm:$0xff] }
  0xc8   :  { %642 = vmatpush1.msra.mxu1 %v5528_v17  ;;  %572 = vmatprep.subr.mxu0 %v5529_v18  ;;  %v5570_v17 = vld [vmem:[#allocation71_spill] sm:$0xff]  ;;  %v5571_v18 = vld [vmem:[#allocation72_spill] sm:$0xff] }
  0xc9   :  { %643 = vmatprep.subr.mxu1 %v5530_v19  ;;  %573 = vmatpush1.msra.mxu0 %v5531_v20  ;;  %v5572_v19 = vld [vmem:[#allocation73_spill] sm:$0xff]  ;;  %v5573_v20 = vld [vmem:[#allocation74_spill] sm:$0xff] }
  0xca   :  { %644 = vmatpush1.msra.mxu1 %v5532_v21  ;;  %574 = vmatprep.subr.mxu0 %v5533_v22  ;;  %v5574_v21 = vld [vmem:[#allocation75_spill] sm:$0xff]  ;;  %v5575_v22 = vld [vmem:[#allocation76_spill] sm:$0xff] }
  0xcb   :  { %645 = vmatprep.subr.mxu1 %v5534_v23  ;;  %575 = vmatpush2.msra.mxu0 %v5535_v24  ;;  %v5576_v23 = vld [vmem:[#allocation77_spill] sm:$0xff]  ;;  %v5577_v24 = vld [vmem:[#allocation78_spill] sm:$0xff] }
  0xcc   :  { %646 = vmatpush2.msra.mxu1 %v5536_v25  ;;  %576 = vmatprep.subr.mxu0 %v5537_v26  ;;  %v5578_v25 = vld [vmem:[#allocation79_spill] sm:$0xff] }
  0xcd   :  { %647 = vmatprep.subr.mxu1 %v5538_v27  ;;  %577 = vmatpush2.msra.mxu0 %v5539_v28  ;;  %v2974_v26 = vld [vmem:[#allocation2 + $0xf8] sm:$0xff] }
  0xce   :  { %648 = vmatpush2.msra.mxu1 %v5540_v29  ;;  %578 = vmatprep.subr.mxu0 %v5541_v30  ;;  %v2977_v27 = vld [vmem:[#allocation5 + $0xf8] sm:$0xff] }
  0xcf   :  { %649 = vmatprep.subr.mxu1 %v5542_v31  ;;  %579 = vmatpush2.msra.mxu0 %v5543_v32 }
  0xd0   :  { %650 = vmatpush2.msra.mxu1 %v5544_v33  ;;  %580 = vmatprep.subr.mxu0 %v5545_v34 }
  0xd1   :  { %651 = vmatprep.subr.mxu1 %v5546_v35  ;;  %581 = vmatpush2.msra.mxu0 %v5547_v36 }
  0xd2   :  { %652 = vmatpush2.msra.mxu1 %v5548_v37  ;;  %582 = vmatprep.subr.mxu0 %v5549_v38 }
  0xd3   :  { %653 = vmatprep.subr.mxu1 %v5550_v39  ;;  %583 = vmatpush2.msra.mxu0 %v5551_v40  ;;  %v58_v39 = vmul.f32 %v2704_v53, %v2704_v53  ;;  %v59_v40 = vmul.f32 %v2694_v61, %v2694_v61 }
  0xd4   :  { %654 = vmatpush2.msra.mxu1 %v5552_v41  ;;  %584 = vmatprep.subr.mxu0 %v5553_v0 }
  0xd5   :  { %655 = vmatprep.subr.mxu1 %v5554_v1  ;;  %585 = vmatpush2.msra.mxu0 %v5555_v2  ;;  %v60_v1 = vmul.f32 %v2706_v54, %v2706_v54  ;;  %v61_v2 = vmul.f32 %v2700_v63, %v2700_v63 }
  0xd6   :  { %656 = vmatpush2.msra.mxu1 %v5556_v3  ;;  %586 = vmatprep.subr.mxu0 %v5557_v4 }
  0xd7   :  { %657 = vmatprep.subr.mxu1 %v5558_v5  ;;  %587 = vmatpush2.msra.mxu0 %v5559_v6 }
  0xd8   :  { %658 = vmatpush2.msra.mxu1 %v5560_v7  ;;  %588 = vmatprep.subr.mxu0 %v5561_v8  ;;  %v62_v8 = vadd.f32 %v60_v1, %v58_v39 }
  0xd9   :  { %659 = vmatprep.subr.mxu1 %v5562_v9  ;;  %589 = vmatpush2.msra.mxu0 %v5563_v10  ;;  %v63_v9 = vadd.f32 %v61_v2, %v59_v40 }
  0xda   :  { %660 = vmatpush2.msra.mxu1 %v5564_v11  ;;  %590 = vmatprep.subr.mxu0 %v5565_v12 }
  0xdb   :  { %661 = vmatprep.subr.mxu1 %v5566_v13  ;;  %591 = vmatpush2.msra.mxu0 %v5567_v14  ;;  %v64_v11 = vadd.f32 %v63_v9, %v62_v8 }
  0xdc   :  { %662 = vmatpush2.msra.mxu1 %v5568_v15  ;;  %592 = vmatprep.subr.mxu0 %v5569_v16 }
  0xdd   :  { %663 = vmatprep.subr.mxu1 %v5570_v17  ;;  %593 = vmatpush2.msra.mxu0 %v5571_v18 }
  0xde   :  { %664 = vmatpush2.msra.mxu1 %v5572_v19  ;;  %594 = vmatprep.subr.mxu0 %v5573_v20 }
  0xdf   :  { %665 = vmatprep.subr.mxu1 %v5574_v21  ;;  %595 = vmatpush2.msra.mxu0 %v5575_v22 }
  0xe0   :  { %666 = vmatpush2.msra.mxu1 %v5576_v23  ;;  %596 = vmatprep.subr.mxu0 %v5577_v24 }
  0xe1   :  { %667 = vmatprep.subr.mxu1 %v5578_v25  ;;  %597 = vmatpush2.msra.mxu0 %v5500_v44 }
  0xe2   :  { %668 = vmatpush2.msra.mxu1 %v5501_v45  ;;  %598 = vmatprep.subr.mxu0 %v5502_v46 }
  0xe3   :  { %669 = vmatprep.subr.mxu1 %v5503_v47  ;;  %599 = vmatpush2.msra.mxu0 %v5504_v48 }
  0xe4   :  { %670 = vmatpush2.msra.mxu1 %v5505_v49  ;;  %600 = vmatprep.subr.mxu0 %v5506_v50 }
  0xe5   :  { %671 = vmatprep.subr.mxu1 %v5507_v51  ;;  %601 = vmatpush2.msra.mxu0 %v5508_v52 }
  0xe6   :  { %672 = vmatpush2.msra.mxu1 %v5509_v42  ;;  %602 = vmatprep.subr.mxu0 %v5510_v43 }
  0xe7   :  { %673 = vmatprep.subr.mxu1 %v2676_v55  ;;  %603 = vmatpush2.msra.mxu0 %v2680_v56 }
  0xe8   :  { %674 = vmatpush2.msra.mxu1 %v2682_v57  ;;  %604 = vmatprep.subr.mxu0 %v2686_v58 }
  0xe9   :  { %675 = vmatprep.subr.mxu1 %v2688_v59  ;;  %605 = vmatpush2.msra.mxu0 %v2692_v60 }
  0xea   :  { %676 = vmatpush2.msra.mxu1 %v2698_v62  ;;  %686 = vmatprep.subr.mxu0 %v2974_v26 }
  0xeb   :  { %757 = vmatprep.subr.mxu1 %v2977_v27 }
 0x127   :  { %v262_v28 = vpop.f32.mrf.mxu0 }
 0x128   :  { %v333_v29 = vpop.f32.mrf.mxu1 }
 0x129   :  { %v264_v30 = vpop.f32.mrf.mxu0  ;;  %v338_v34 = vsub.f32 %v262_v28, %v333_v29 }
 0x12a   :  { %v335_v31 = vpop.f32.mrf.mxu1 }
 0x12b   :  { %v339_v35 = vsub.f32 %v264_v30, %v335_v31  ;;  %v482_v3 = vmul.f32 %v338_v34, %v2704_v53  ;;  %v5579_v30 = vmov 0 }
 0x12d   :  { %v483_v4 = vmul.f32 %v339_v35, %v2694_v61 }
 0x169   :  { %v406_v32 = vpop.f32.mrf.mxu0 }
 0x16a   :  { %v477_v33 = vpop.f32.mrf.mxu1 }
 0x16b   :  { %v478_v36 = vadd.f32 %v477_v33, %v406_v32  ;;  %v408_v37 = vpop.f32.mrf.mxu0 }
 0x16c   :  { %v479_v38 = vpop.f32.mrf.mxu1 }
 0x16d   :  { %v484_v41 = vmul.f32 %v478_v36, %v2706_v54  ;;  %v480_v0 = vadd.f32 %v479_v38, %v408_v37  ;;  %v5583_v38 = vmov 0 }
 0x16f   :  { %v485_v5 = vmul.f32 %v480_v0, %v2700_v63  ;;  %v486_v6 = vadd.f32 %v484_v41, %v482_v3 }
 0x171   :  { %v487_v7 = vadd.f32 %v485_v5, %v483_v4 }
 0x173   :  { %v488_v10 = vadd.f32 %v487_v7, %v486_v6 }
 0x175   :  { %489 = vadd.xlane.f32.xlu0 %v488_v10 }
 0x179   :  { %65 = vadd.xlane.f32.xlu0 %v64_v11 }
 0x1fe   :  { %v490_v28 = vpop.xlane.xlu0 %489 }
 0x1ff   :  { %v491_v29 = vand.u32 2147483647, %v490_v28 }
 0x201   :  { %vm2992_vm0 = vcmp.lt.f32.partialorder %v491_v29, 1e-12 }
 0x202   :  { %v5580_v30 = vsel %vm2992_vm0, 4294967295, %v5579_v30  ;;  %v495_v31 = vsel %vm2992_vm0, 1.0, %v490_v28  ;;  %v2998_v32 = vpop.xlane.xlu0 %65 }
 0x203   :  { %5581 = vst [vmem:[#allocation80_spill] sm:$0xff] %v5580_v30  ;;  %1918 = vrcp.f32 %v495_v31  ;;  %5582 = vst [vmem:[#allocation81_spill] sm:$0xff] %v2998_v32  ;;  %vm67_vm1 = vcmp.lt.f32.partialorder %v2998_v32, 0.0  ;;  %vm525_vm5 = vcmp.gt.f32.partialorder %v2998_v32, 0.0  ;;  %v3137_v30 = vld [vmem:[#allocation5 + $0x98] sm:$0xff] }
 0x204   :  { %vm493_vm2 = vmor %vm67_vm1, %vm2992_vm0  ;;  %v526_v10 = vsel %vm525_vm5, %v2998_v32, 1.0  ;;  %5595 = vst [vmem:[#allocation13_spill] sm:$0xff] %v3137_v30 }
 0x205   :  { %vm3007_vm4 = vmxor %vm493_vm2, %vm2287_vm3  ;;  %1920 = vrcp.f32 %v526_v10  ;;  %v3095_v10 = vld [vmem:[#allocation5 + $0xd0] sm:$0xff] }
 0x206   :  { %v5584_v38 = vsel %vm3007_vm4, 4294967295, %v5583_v38 }
 0x207   :  { %5585 = vst [vmem:[#allocation82_spill] sm:$0xff] %v5584_v38  ;;  %v3140_v38 = vld [vmem:[#allocation2 + $0x90] sm:$0xff] }
 0x208   :  { %5596 = vst [vmem:[#allocation14_spill] sm:$0xff] %v3140_v38 }
 0x210   :  { %v1919_v33 = vpop.eup %1918 }
 0x211   :  { %v497_v37 = vmul.f32 %v1919_v33, %v2998_v32  ;;  %v3134_v32 = vld [vmem:[#allocation2 + $0x98] sm:$0xff] }
 0x212   :  { %v1921_v11 = vpop.eup %1920  ;;  %5594 = vst [vmem:[#allocation12_spill] sm:$0xff] %v3134_v32 }
 0x213   :  { %v3013_v39 = vsel %vm3007_vm4, %v497_v37, 0.0 }
 0x214   :  { %5586 = vst [vmem:[#allocation83_spill] sm:$0xff] %v3013_v39  ;;  %v507_v40 = vmul.f32 %v3013_v39, %v338_v34  ;;  %v508_v41 = vmul.f32 %v3013_v39, %v339_v35  ;;  %v511_v1 = vmul.f32 %v3013_v39, %v478_v36  ;;  %v512_v2 = vmul.f32 %v3013_v39, %v480_v0  ;;  %v3131_v39 = vld [vmem:[#allocation5 + $0xa0] sm:$0xff] }
 0x216   :  { %v3020_v3 = vsub.f32 %v2704_v53, %v507_v40  ;;  %v3023_v4 = vsub.f32 %v2694_v61, %v508_v41  ;;  %v3026_v5 = vsub.f32 %v2706_v54, %v511_v1  ;;  %v3029_v6 = vsub.f32 %v2700_v63, %v512_v2 }
 0x218   :  { %5587 = vst [vmem:[#allocation84_spill] sm:$0xff] %v3020_v3  ;;  %5588 = vst [vmem:[#allocation85_spill] sm:$0xff] %v3023_v4  ;;  %v515_v34 = vmul.f32 %v3020_v3, %v3020_v3  ;;  %v516_v35 = vmul.f32 %v3023_v4, %v3023_v4  ;;  %v517_v36 = vmul.f32 %v3026_v5, %v3026_v5 }
 0x219   :  { %5589 = vst [vmem:[#allocation86_spill] sm:$0xff] %v3026_v5  ;;  %5590 = vst [vmem:[#allocation87_spill] sm:$0xff] %v3029_v6  ;;  %v518_v0 = vmul.f32 %v3029_v6, %v3029_v6 }
 0x21a   :  { %v519_v7 = vadd.f32 %v517_v36, %v515_v34  ;;  %v3080_v36 = vld [vmem:[#allocation2 + $0xe0] sm:$0xff] }
 0x21b   :  { %v520_v8 = vadd.f32 %v518_v0, %v516_v35  ;;  %v3083_v0 = vld [vmem:[#allocation5 + $0xe0] sm:$0xff] }
 0x21d   :  { %v521_v9 = vadd.f32 %v520_v8, %v519_v7  ;;  %v3086_v7 = vld [vmem:[#allocation2 + $0xd8] sm:$0xff] }
 0x21e   :  { %v3089_v8 = vld [vmem:[#allocation5 + $0xd8] sm:$0xff] }
 0x21f   :  { %522 = vadd.xlane.f32.xlu1 %v521_v9  ;;  %v3092_v9 = vld [vmem:[#allocation2 + $0xd0] sm:$0xff] }
 0x2a8   :  { %v3041_v28 = vpop.xlane.xlu1 %522 }
 0x2a9   :  { %5591 = vst [vmem:[#allocation88_spill] sm:$0xff] %v3041_v28  ;;  %v528_v29 = vmul.f32 %v1921_v11, %v3041_v28  ;;  %v3098_v11 = vld [vmem:[#allocation2 + $0xc8] sm:$0xff]  ;;  %v3143_v28 = vld [vmem:[#allocation5 + $0x90] sm:$0xff] }
 0x2aa   :  { %5597 = vst [vmem:[#allocation15_spill] sm:$0xff] %v3143_v28 }
 0x2ab   :  { %v529_v31 = vsel %vm3007_vm4, %v528_v29, 0.0  ;;  %v3101_v29 = vld [vmem:[#allocation5 + $0xc8] sm:$0xff] }
 0x2ac   :  { %v530_v33 = vmul.f32 %v529_v31, %v2704_v53  ;;  %v531_v37 = vmul.f32 %v529_v31, %v2694_v61  ;;  %v534_v40 = vmul.f32 %v529_v31, %v2706_v54  ;;  %v535_v41 = vmul.f32 %v529_v31, %v2700_v63  ;;  %v3066_v53 = vld [vmem:[#allocation2 + $0xf0] sm:$0xff]  ;;  %v3072_v61 = vld [vmem:[#allocation2 + $0xe8] sm:$0xff]  ;;  %v3104_v31 = vld [vmem:[#allocation2 + $0xc0] sm:$0xff] }
 0x2ad   :  { %v3069_v54 = vld [vmem:[#allocation5 + $0xf0] sm:$0xff]  ;;  %v3076_v63 = vld [vmem:[#allocation5 + $0xe8] sm:$0xff] }
 0x2ae   :  { %v3051_v1 = vadd.f32 %v530_v33, %v3020_v3  ;;  %v3054_v2 = vadd.f32 %v531_v37, %v3023_v4  ;;  %v3057_v34 = vadd.f32 %v534_v40, %v3026_v5  ;;  %v3060_v35 = vadd.f32 %v535_v41, %v3029_v6  ;;  %v3107_v33 = vld [vmem:[#allocation5 + $0xc0] sm:$0xff]  ;;  %v3110_v37 = vld [vmem:[#allocation2 + $0xb8] sm:$0xff]  ;;  %v3116_v41 = vld [vmem:[#allocation2 + $0xb0] sm:$0xff] }
 0x2af   :  { %v3113_v40 = vld [vmem:[#allocation5 + $0xb8] sm:$0xff]  ;;  %v3119_v6 = vld [vmem:[#allocation5 + $0xb0] sm:$0xff]  ;;  %v3122_v5 = vld [vmem:[#allocation2 + $0xa8] sm:$0xff] }
 0x2b0   :  { %5592 = vst [vmem:[#allocation89_spill] sm:$0xff] %v3054_v2  ;;  %5593 = vst [vmem:[#allocation90_spill] sm:$0xff] %v3060_v35  ;;  %606 = vmatprep.mubr.f32.mxu0 %v3054_v2  ;;  %677 = vmatprep.mubr.f32.mxu1 %v3060_v35  ;;  %v3125_v4 = vld [vmem:[#allocation5 + $0xa8] sm:$0xff]  ;;  %v3128_v3 = vld [vmem:[#allocation2 + $0xa0] sm:$0xff] }
 0x2b1   :  { %607 = vmatmul.mubr.f32.vlgmr.msra.gmra.mxu0 %v3051_v1  ;;  %678 = vmatmul.mubr.f32.vlgmr.msra.gmra.mxu1 %v3057_v34 }
 0x2b2   :  { %687 = vmatpush1.msra.mxu0 %v3066_v53  ;;  %758 = vmatpush1.msra.mxu1 %v3069_v54 }
 0x2b3   :  { %688 = vmatprep.subr.mxu0 %v3072_v61  ;;  %750 = vmatprep.mubr.f32.mxu0 %v3060_v35  ;;  %v3146_v35 = vld [vmem:[#allocation2 + $0x88] sm:$0xff] }
 0x2b4   :  { %759 = vmatprep.subr.mxu1 %v3076_v63  ;;  %821 = vmatprep.mubr.f32.mxu1 %v3054_v2  ;;  %5598 = vst [vmem:[#allocation16_spill] sm:$0xff] %v3146_v35  ;;  %v3149_v2 = vld [vmem:[#allocation5 + $0x88] sm:$0xff] }
 0x2b5   :  { %689 = vmatpush1.msra.mxu0 %v3080_v36  ;;  %760 = vmatpush1.msra.mxu1 %v3083_v0  ;;  %5599 = vst [vmem:[#allocation17_spill] sm:$0xff] %v3149_v2 }
 0x2b6   :  { %690 = vmatprep.subr.mxu0 %v3086_v7  ;;  %761 = vmatprep.subr.mxu1 %v3089_v8 }
 0x2b7   :  { %691 = vmatpush1.msra.mxu0 %v3092_v9  ;;  %762 = vmatpush1.msra.mxu1 %v3095_v10 }
 0x2b8   :  { %692 = vmatprep.subr.mxu0 %v3098_v11  ;;  %763 = vmatprep.subr.mxu1 %v3101_v29 }
 0x2b9   :  { %693 = vmatpush1.msra.mxu0 %v3104_v31  ;;  %764 = vmatpush1.msra.mxu1 %v3107_v33 }
 0x2ba   :  { %694 = vmatprep.subr.mxu0 %v3110_v37  ;;  %765 = vmatprep.subr.mxu1 %v3113_v40 }
 0x2bb   :  { %695 = vmatpush1.msra.mxu0 %v3116_v41  ;;  %766 = vmatpush1.msra.mxu1 %v3119_v6 }
 0x2bc   :  { %696 = vmatprep.subr.mxu0 %v3122_v5  ;;  %767 = vmatprep.subr.mxu1 %v3125_v4 }
 0x2bd   :  { %697 = vmatpush1.msra.mxu0 %v3128_v3  ;;  %768 = vmatpush1.msra.mxu1 %v3131_v39 }
 0x2be   :  { %698 = vmatprep.subr.mxu0 %v3134_v32  ;;  %769 = vmatprep.subr.mxu1 %v3137_v30  ;;  %v3152_v32 = vld [vmem:[#allocation2 + $0x80] sm:$0xff] }
 0x2bf   :  { %699 = vmatpush1.msra.mxu0 %v3140_v38  ;;  %770 = vmatpush1.msra.mxu1 %v3143_v28  ;;  %5600 = vst [vmem:[#allocation18_spill] sm:$0xff] %v3152_v32  ;;  %v3155_v30 = vld [vmem:[#allocation5 + $0x80] sm:$0xff]  ;;  %v3158_v38 = vld [vmem:[#allocation2 + $0x78] sm:$0xff] }
 0x2c0   :  { %700 = vmatprep.subr.mxu0 %v3146_v35  ;;  %771 = vmatprep.subr.mxu1 %v3149_v2  ;;  %5601 = vst [vmem:[#allocation19_spill] sm:$0xff] %v3155_v30  ;;  %5602 = vst [vmem:[#allocation20_spill] sm:$0xff] %v3158_v38  ;;  %v3161_v28 = vld [vmem:[#allocation5 + $0x78] sm:$0xff]  ;;  %v3164_v35 = vld [vmem:[#allocation2 + $0x70] sm:$0xff] }
 0x2c1   :  { %701 = vmatpush1.msra.mxu0 %v3152_v32  ;;  %772 = vmatpush1.msra.mxu1 %v3155_v30  ;;  %5603 = vst [vmem:[#allocation21_spill] sm:$0xff] %v3161_v28  ;;  %5604 = vst [vmem:[#allocation22_spill] sm:$0xff] %v3164_v35  ;;  %v3167_v2 = vld [vmem:[#allocation5 + $0x70] sm:$0xff]  ;;  %v3170_v32 = vld [vmem:[#allocation2 + $0x68] sm:$0xff] }
 0x2c2   :  { %702 = vmatprep.subr.mxu0 %v3158_v38  ;;  %773 = vmatprep.subr.mxu1 %v3161_v28  ;;  %5605 = vst [vmem:[#allocation23_spill] sm:$0xff] %v3167_v2  ;;  %5606 = vst [vmem:[#allocation24_spill] sm:$0xff] %v3170_v32  ;;  %v3173_v30 = vld [vmem:[#allocation5 + $0x68] sm:$0xff]  ;;  %v3176_v38 = vld [vmem:[#allocation2 + $0x60] sm:$0xff] }
 0x2c3   :  { %703 = vmatpush1.msra.mxu0 %v3164_v35  ;;  %774 = vmatpush1.msra.mxu1 %v3167_v2  ;;  %5607 = vst [vmem:[#allocation25_spill] sm:$0xff] %v3173_v30  ;;  %5608 = vst [vmem:[#allocation26_spill] sm:$0xff] %v3176_v38  ;;  %v3179_v28 = vld [vmem:[#allocation5 + $0x60] sm:$0xff]  ;;  %v3182_v35 = vld [vmem:[#allocation2 + $0x58] sm:$0xff] }
 0x2c4   :  { %704 = vmatprep.subr.mxu0 %v3170_v32  ;;  %775 = vmatprep.subr.mxu1 %v3173_v30  ;;  %5609 = vst [vmem:[#allocation27_spill] sm:$0xff] %v3179_v28  ;;  %5610 = vst [vmem:[#allocation28_spill] sm:$0xff] %v3182_v35  ;;  %v3185_v2 = vld [vmem:[#allocation5 + $0x58] sm:$0xff]  ;;  %v3188_v32 = vld [vmem:[#allocation2 + $0x50] sm:$0xff] }
 0x2c5   :  { %705 = vmatpush1.msra.mxu0 %v3176_v38  ;;  %776 = vmatpush1.msra.mxu1 %v3179_v28  ;;  %5611 = vst [vmem:[#allocation29_spill] sm:$0xff] %v3185_v2  ;;  %5612 = vst [vmem:[#allocation30_spill] sm:$0xff] %v3188_v32  ;;  %v3191_v30 = vld [vmem:[#allocation5 + $0x50] sm:$0xff]  ;;  %v3194_v38 = vld [vmem:[#allocation2 + $0x48] sm:$0xff] }
 0x2c6   :  { %706 = vmatprep.subr.mxu0 %v3182_v35  ;;  %777 = vmatprep.subr.mxu1 %v3185_v2  ;;  %5613 = vst [vmem:[#allocation31_spill] sm:$0xff] %v3191_v30  ;;  %5614 = vst [vmem:[#allocation32_spill] sm:$0xff] %v3194_v38  ;;  %v3197_v28 = vld [vmem:[#allocation5 + $0x48] sm:$0xff]  ;;  %v3200_v35 = vld [vmem:[#allocation2 + $0x40] sm:$0xff] }
 0x2c7   :  { %707 = vmatpush1.msra.mxu0 %v3188_v32  ;;  %778 = vmatpush1.msra.mxu1 %v3191_v30  ;;  %5615 = vst [vmem:[#allocation33_spill] sm:$0xff] %v3197_v28  ;;  %5616 = vst [vmem:[#allocation34_spill] sm:$0xff] %v3200_v35  ;;  %v3203_v2 = vld [vmem:[#allocation5 + $0x40] sm:$0xff]  ;;  %v3206_v32 = vld [vmem:[#allocation2 + $0x38] sm:$0xff] }
 0x2c8   :  { %708 = vmatprep.subr.mxu0 %v3194_v38  ;;  %779 = vmatprep.subr.mxu1 %v3197_v28  ;;  %5617 = vst [vmem:[#allocation35_spill] sm:$0xff] %v3203_v2  ;;  %5618 = vst [vmem:[#allocation36_spill] sm:$0xff] %v3206_v32  ;;  %v3209_v30 = vld [vmem:[#allocation5 + $0x38] sm:$0xff]  ;;  %v3212_v38 = vld [vmem:[#allocation2 + $0x30] sm:$0xff] }
 0x2c9   :  { %709 = vmatpush1.msra.mxu0 %v3200_v35  ;;  %780 = vmatpush1.msra.mxu1 %v3203_v2  ;;  %5619 = vst [vmem:[#allocation37_spill] sm:$0xff] %v3209_v30  ;;  %5620 = vst [vmem:[#allocation38_spill] sm:$0xff] %v3212_v38  ;;  %v3215_v28 = vld [vmem:[#allocation5 + $0x30] sm:$0xff]  ;;  %v3218_v35 = vld [vmem:[#allocation2 + $0x28] sm:$0xff] }
 0x2ca   :  { %710 = vmatprep.subr.mxu0 %v3206_v32  ;;  %781 = vmatprep.subr.mxu1 %v3209_v30  ;;  %5621 = vst [vmem:[#allocation39_spill] sm:$0xff] %v3215_v28  ;;  %5622 = vst [vmem:[#allocation40_spill] sm:$0xff] %v3218_v35  ;;  %v3221_v2 = vld [vmem:[#allocation5 + $0x28] sm:$0xff]  ;;  %v3224_v32 = vld [vmem:[#allocation2 + $0x20] sm:$0xff] }
 0x2cb   :  { %711 = vmatpush1.msra.mxu0 %v3212_v38  ;;  %782 = vmatpush1.msra.mxu1 %v3215_v28  ;;  %5623 = vst [vmem:[#allocation41_spill] sm:$0xff] %v3221_v2  ;;  %5624 = vst [vmem:[#allocation42_spill] sm:$0xff] %v3224_v32  ;;  %v3227_v30 = vld [vmem:[#allocation5 + $0x20] sm:$0xff]  ;;  %v3230_v38 = vld [vmem:[#allocation2 + $0x18] sm:$0xff] }
 0x2cc   :  { %712 = vmatprep.subr.mxu0 %v3218_v35  ;;  %783 = vmatprep.subr.mxu1 %v3221_v2  ;;  %5625 = vst [vmem:[#allocation43_spill] sm:$0xff] %v3227_v30  ;;  %5626 = vst [vmem:[#allocation44_spill] sm:$0xff] %v3230_v38  ;;  %v3233_v28 = vld [vmem:[#allocation5 + $0x18] sm:$0xff]  ;;  %v3236_v35 = vld [vmem:[#allocation2 + $0x10] sm:$0xff] }
 0x2cd   :  { %713 = vmatpush1.msra.mxu0 %v3224_v32  ;;  %784 = vmatpush1.msra.mxu1 %v3227_v30  ;;  %5627 = vst [vmem:[#allocation45_spill] sm:$0xff] %v3233_v28  ;;  %5628 = vst [vmem:[#allocation46_spill] sm:$0xff] %v3236_v35  ;;  %v3239_v2 = vld [vmem:[#allocation5 + $0x10] sm:$0xff]  ;;  %v3242_v32 = vld [vmem:[#allocation2 + $0x8] sm:$0xff] }
 0x2ce   :  { %714 = vmatprep.subr.mxu0 %v3230_v38  ;;  %785 = vmatprep.subr.mxu1 %v3233_v28  ;;  %5629 = vst [vmem:[#allocation47_spill] sm:$0xff] %v3239_v2  ;;  %5630 = vst [vmem:[#allocation48_spill] sm:$0xff] %v3242_v32  ;;  %v3245_v30 = vld [vmem:[#allocation5 + $0x8] sm:$0xff]  ;;  %v3248_v38 = vld [vmem:[#allocation2] sm:$0xff] }
 0x2cf   :  { %715 = vmatpush1.msra.mxu0 %v3236_v35  ;;  %786 = vmatpush1.msra.mxu1 %v3239_v2  ;;  %5631 = vst [vmem:[#allocation49_spill] sm:$0xff] %v3245_v30  ;;  %5632 = vst [vmem:[#allocation50_spill] sm:$0xff] %v3248_v38  ;;  %v3251_v28 = vld [vmem:[#allocation5] sm:$0xff]  ;;  %v3254_v35 = vld [vmem:[#allocation2 + $0x1f8] sm:$0xff] }
 0x2d0   :  { %716 = vmatprep.subr.mxu0 %v3242_v32  ;;  %787 = vmatprep.subr.mxu1 %v3245_v30  ;;  %5633 = vst [vmem:[#allocation51_spill] sm:$0xff] %v3251_v28  ;;  %5634 = vst [vmem:[#allocation52_spill] sm:$0xff] %v3254_v35  ;;  %v3257_v2 = vld [vmem:[#allocation5 + $0x1f8] sm:$0xff]  ;;  %v3260_v32 = vld [vmem:[#allocation2 + $0x1f0] sm:$0xff] }
 0x2d1   :  { %717 = vmatpush1.msra.mxu0 %v3248_v38  ;;  %788 = vmatpush1.msra.mxu1 %v3251_v28  ;;  %5635 = vst [vmem:[#allocation53_spill] sm:$0xff] %v3257_v2  ;;  %5636 = vst [vmem:[#allocation54_spill] sm:$0xff] %v3260_v32  ;;  %v3263_v30 = vld [vmem:[#allocation5 + $0x1f0] sm:$0xff]  ;;  %v3266_v38 = vld [vmem:[#allocation2 + $0x1e8] sm:$0xff] }
 0x2d2   :  { %718 = vmatprep.subr.mxu0 %v3254_v35  ;;  %789 = vmatprep.subr.mxu1 %v3257_v2  ;;  %5637 = vst [vmem:[#allocation55_spill] sm:$0xff] %v3263_v30  ;;  %5638 = vst [vmem:[#allocation56_spill] sm:$0xff] %v3266_v38  ;;  %v3269_v28 = vld [vmem:[#allocation5 + $0x1e8] sm:$0xff]  ;;  %v3272_v35 = vld [vmem:[#allocation2 + $0x1e0] sm:$0xff] }
 0x2d3   :  { %719 = vmatpush2.msra.mxu0 %v3260_v32  ;;  %790 = vmatpush2.msra.mxu1 %v3263_v30  ;;  %5639 = vst [vmem:[#allocation57_spill] sm:$0xff] %v3269_v28  ;;  %5640 = vst [vmem:[#allocation58_spill] sm:$0xff] %v3272_v35  ;;  %v3275_v2 = vld [vmem:[#allocation5 + $0x1e0] sm:$0xff]  ;;  %v3278_v32 = vld [vmem:[#allocation2 + $0x1d8] sm:$0xff] }
 0x2d4   :  { %720 = vmatprep.subr.mxu0 %v3266_v38  ;;  %791 = vmatprep.subr.mxu1 %v3269_v28  ;;  %5641 = vst [vmem:[#allocation59_spill] sm:$0xff] %v3275_v2  ;;  %5642 = vst [vmem:[#allocation60_spill] sm:$0xff] %v3278_v32  ;;  %v3281_v30 = vld [vmem:[#allocation5 + $0x1d8] sm:$0xff]  ;;  %v3284_v38 = vld [vmem:[#allocation2 + $0x1d0] sm:$0xff] }
 0x2d5   :  { %721 = vmatpush2.msra.mxu0 %v3272_v35  ;;  %792 = vmatpush2.msra.mxu1 %v3275_v2  ;;  %5643 = vst [vmem:[#allocation61_spill] sm:$0xff] %v3281_v30  ;;  %5644 = vst [vmem:[#allocation62_spill] sm:$0xff] %v3284_v38  ;;  %v3287_v28 = vld [vmem:[#allocation5 + $0x1d0] sm:$0xff]  ;;  %v3290_v35 = vld [vmem:[#allocation2 + $0x1c8] sm:$0xff] }
 0x2d6   :  { %722 = vmatprep.subr.mxu0 %v3278_v32  ;;  %793 = vmatprep.subr.mxu1 %v3281_v30  ;;  %5645 = vst [vmem:[#allocation63_spill] sm:$0xff] %v3287_v28  ;;  %5646 = vst [vmem:[#allocation64_spill] sm:$0xff] %v3290_v35  ;;  %v3293_v2 = vld [vmem:[#allocation5 + $0x1c8] sm:$0xff]  ;;  %v3296_v32 = vld [vmem:[#allocation2 + $0x1c0] sm:$0xff] }
 0x2d7   :  { %723 = vmatpush2.msra.mxu0 %v3284_v38  ;;  %794 = vmatpush2.msra.mxu1 %v3287_v28  ;;  %5647 = vst [vmem:[#allocation65_spill] sm:$0xff] %v3293_v2  ;;  %5648 = vst [vmem:[#allocation66_spill] sm:$0xff] %v3296_v32  ;;  %v3299_v30 = vld [vmem:[#allocation5 + $0x1c0] sm:$0xff]  ;;  %v3302_v38 = vld [vmem:[#allocation2 + $0x1b8] sm:$0xff] }
 0x2d8   :  { %724 = vmatprep.subr.mxu0 %v3290_v35  ;;  %795 = vmatprep.subr.mxu1 %v3293_v2  ;;  %5649 = vst [vmem:[#allocation67_spill] sm:$0xff] %v3299_v30  ;;  %5650 = vst [vmem:[#allocation68_spill] sm:$0xff] %v3302_v38  ;;  %v3305_v28 = vld [vmem:[#allocation5 + $0x1b8] sm:$0xff]  ;;  %v3308_v35 = vld [vmem:[#allocation2 + $0x1b0] sm:$0xff] }
 0x2d9   :  { %725 = vmatpush2.msra.mxu0 %v3296_v32  ;;  %796 = vmatpush2.msra.mxu1 %v3299_v30  ;;  %5651 = vst [vmem:[#allocation69_spill] sm:$0xff] %v3305_v28  ;;  %5652 = vst [vmem:[#allocation70_spill] sm:$0xff] %v3308_v35  ;;  %v3311_v2 = vld [vmem:[#allocation5 + $0x1b0] sm:$0xff]  ;;  %v3314_v32 = vld [vmem:[#allocation2 + $0x1a8] sm:$0xff] }
 0x2da   :  { %726 = vmatprep.subr.mxu0 %v3302_v38  ;;  %797 = vmatprep.subr.mxu1 %v3305_v28  ;;  %5653 = vst [vmem:[#allocation71_spill] sm:$0xff] %v3311_v2  ;;  %5654 = vst [vmem:[#allocation72_spill] sm:$0xff] %v3314_v32  ;;  %v3317_v30 = vld [vmem:[#allocation5 + $0x1a8] sm:$0xff]  ;;  %v3320_v38 = vld [vmem:[#allocation2 + $0x1a0] sm:$0xff] }
 0x2db   :  { %727 = vmatpush2.msra.mxu0 %v3308_v35  ;;  %798 = vmatpush2.msra.mxu1 %v3311_v2  ;;  %5655 = vst [vmem:[#allocation73_spill] sm:$0xff] %v3317_v30  ;;  %5656 = vst [vmem:[#allocation74_spill] sm:$0xff] %v3320_v38  ;;  %v3323_v28 = vld [vmem:[#allocation5 + $0x1a0] sm:$0xff]  ;;  %v3326_v35 = vld [vmem:[#allocation2 + $0x198] sm:$0xff] }
 0x2dc   :  { %728 = vmatprep.subr.mxu0 %v3314_v32  ;;  %799 = vmatprep.subr.mxu1 %v3317_v30  ;;  %5657 = vst [vmem:[#allocation75_spill] sm:$0xff] %v3323_v28  ;;  %5658 = vst [vmem:[#allocation76_spill] sm:$0xff] %v3326_v35  ;;  %v3329_v2 = vld [vmem:[#allocation5 + $0x198] sm:$0xff]  ;;  %v3332_v32 = vld [vmem:[#allocation2 + $0x190] sm:$0xff] }
 0x2dd   :  { %729 = vmatpush2.msra.mxu0 %v3320_v38  ;;  %800 = vmatpush2.msra.mxu1 %v3323_v28  ;;  %5659 = vst [vmem:[#allocation77_spill] sm:$0xff] %v3329_v2  ;;  %5660 = vst [vmem:[#allocation78_spill] sm:$0xff] %v3332_v32  ;;  %v3335_v30 = vld [vmem:[#allocation5 + $0x190] sm:$0xff]  ;;  %v3338_v38 = vld [vmem:[#allocation2 + $0x188] sm:$0xff] }
 0x2de   :  { %730 = vmatprep.subr.mxu0 %v3326_v35  ;;  %801 = vmatprep.subr.mxu1 %v3329_v2  ;;  %5661 = vst [vmem:[#allocation79_spill] sm:$0xff] %v3335_v30  ;;  %5662 = vst [vmem:[#allocation91_spill] sm:$0xff] %v3338_v38  ;;  %v3341_v28 = vld [vmem:[#allocation5 + $0x188] sm:$0xff]  ;;  %v3344_v35 = vld [vmem:[#allocation2 + $0x180] sm:$0xff] }
 0x2df   :  { %731 = vmatpush2.msra.mxu0 %v3332_v32  ;;  %802 = vmatpush2.msra.mxu1 %v3335_v30  ;;  %5663 = vst [vmem:[#allocation92_spill] sm:$0xff] %v3341_v28  ;;  %5664 = vst [vmem:[#allocation93_spill] sm:$0xff] %v3344_v35  ;;  %v3347_v2 = vld [vmem:[#allocation5 + $0x180] sm:$0xff] }
 0x2e0   :  { %732 = vmatprep.subr.mxu0 %v3338_v38  ;;  %803 = vmatprep.subr.mxu1 %v3341_v28  ;;  %5665 = vst [vmem:[#allocation94_spill] sm:$0xff] %v3347_v2 }
 0x2e1   :  { %733 = vmatpush2.msra.mxu0 %v3344_v35  ;;  %804 = vmatpush2.msra.mxu1 %v3347_v2 }
 0x2e2   :  { %734 = vmatprep.subr.mxu0 %v5565_v12  ;;  %805 = vmatprep.subr.mxu1 %v5566_v13  ;;  %v5684_v12 = vld [vmem:[#allocation30_spill] sm:$0xff]  ;;  %v5685_v13 = vld [vmem:[#allocation31_spill] sm:$0xff] }
 0x2e3   :  { %735 = vmatpush2.msra.mxu0 %v5567_v14  ;;  %806 = vmatpush2.msra.mxu1 %v5568_v15  ;;  %v5686_v14 = vld [vmem:[#allocation32_spill] sm:$0xff]  ;;  %v5687_v15 = vld [vmem:[#allocation33_spill] sm:$0xff] }
 0x2e4   :  { %736 = vmatprep.subr.mxu0 %v5569_v16  ;;  %807 = vmatprep.subr.mxu1 %v5570_v17  ;;  %v5688_v16 = vld [vmem:[#allocation34_spill] sm:$0xff]  ;;  %v5689_v17 = vld [vmem:[#allocation35_spill] sm:$0xff] }
 0x2e5   :  { %737 = vmatpush2.msra.mxu0 %v5571_v18  ;;  %808 = vmatpush2.msra.mxu1 %v5572_v19  ;;  %v5690_v18 = vld [vmem:[#allocation36_spill] sm:$0xff]  ;;  %v5691_v19 = vld [vmem:[#allocation37_spill] sm:$0xff] }
 0x2e6   :  { %738 = vmatprep.subr.mxu0 %v5573_v20  ;;  %809 = vmatprep.subr.mxu1 %v5574_v21  ;;  %v5692_v20 = vld [vmem:[#allocation38_spill] sm:$0xff]  ;;  %v5693_v21 = vld [vmem:[#allocation39_spill] sm:$0xff] }
 0x2e7   :  { %739 = vmatpush2.msra.mxu0 %v5575_v22  ;;  %810 = vmatpush2.msra.mxu1 %v5576_v23  ;;  %v5694_v22 = vld [vmem:[#allocation40_spill] sm:$0xff]  ;;  %v5695_v23 = vld [vmem:[#allocation41_spill] sm:$0xff] }
 0x2e8   :  { %740 = vmatprep.subr.mxu0 %v5577_v24  ;;  %811 = vmatprep.subr.mxu1 %v5578_v25  ;;  %v5696_v24 = vld [vmem:[#allocation42_spill] sm:$0xff]  ;;  %v5697_v25 = vld [vmem:[#allocation43_spill] sm:$0xff] }
 0x2e9   :  { %741 = vmatpush2.msra.mxu0 %v5500_v44  ;;  %812 = vmatpush2.msra.mxu1 %v5501_v45  ;;  %v5668_v44 = vld [vmem:[#allocation14_spill] sm:$0xff]  ;;  %v5669_v45 = vld [vmem:[#allocation15_spill] sm:$0xff] }
 0x2ea   :  { %742 = vmatprep.subr.mxu0 %v5502_v46  ;;  %813 = vmatprep.subr.mxu1 %v5503_v47  ;;  %v5670_v46 = vld [vmem:[#allocation16_spill] sm:$0xff]  ;;  %v5671_v47 = vld [vmem:[#allocation17_spill] sm:$0xff] }
 0x2eb   :  { %743 = vmatpush2.msra.mxu0 %v5504_v48  ;;  %814 = vmatpush2.msra.mxu1 %v5505_v49  ;;  %v5672_v48 = vld [vmem:[#allocation18_spill] sm:$0xff]  ;;  %v5673_v49 = vld [vmem:[#allocation19_spill] sm:$0xff] }
 0x2ec   :  { %744 = vmatprep.subr.mxu0 %v5506_v50  ;;  %815 = vmatprep.subr.mxu1 %v5507_v51  ;;  %v5674_v50 = vld [vmem:[#allocation20_spill] sm:$0xff]  ;;  %v5675_v51 = vld [vmem:[#allocation21_spill] sm:$0xff] }
 0x2ed   :  { %745 = vmatpush2.msra.mxu0 %v5508_v52  ;;  %816 = vmatpush2.msra.mxu1 %v5509_v42  ;;  %v5666_v42 = vld [vmem:[#allocation12_spill] sm:$0xff]  ;;  %v5676_v52 = vld [vmem:[#allocation22_spill] sm:$0xff] }
 0x2ee   :  { %746 = vmatprep.subr.mxu0 %v5510_v43  ;;  %817 = vmatprep.subr.mxu1 %v2676_v55  ;;  %v5667_v43 = vld [vmem:[#allocation13_spill] sm:$0xff]  ;;  %v5677_v55 = vld [vmem:[#allocation23_spill] sm:$0xff] }
 0x2ef   :  { %747 = vmatpush2.msra.mxu0 %v2680_v56  ;;  %818 = vmatpush2.msra.mxu1 %v2682_v57  ;;  %v5678_v56 = vld [vmem:[#allocation24_spill] sm:$0xff]  ;;  %v5679_v57 = vld [vmem:[#allocation25_spill] sm:$0xff] }
 0x2f0   :  { %748 = vmatprep.subr.mxu0 %v2686_v58  ;;  %819 = vmatprep.subr.mxu1 %v2688_v59  ;;  %v5680_v58 = vld [vmem:[#allocation26_spill] sm:$0xff]  ;;  %v5681_v59 = vld [vmem:[#allocation27_spill] sm:$0xff] }
 0x2f1   :  { %749 = vmatpush2.msra.mxu0 %v2692_v60  ;;  %820 = vmatpush2.msra.mxu1 %v2698_v62  ;;  %v5682_v60 = vld [vmem:[#allocation28_spill] sm:$0xff]  ;;  %v5683_v62 = vld [vmem:[#allocation29_spill] sm:$0xff] }
 0x2f2   :  { %751 = vmatmul.mubr.f32.vlgmr.msra.gmra.mxu0 %v3057_v34  ;;  %822 = vmatmul.mubr.f32.vlgmr.msra.gmra.mxu1 %v3051_v1 }
 0x2f3   :  { %888 = vmatprep.subr.mxu0 %v2974_v26  ;;  %959 = vmatprep.subr.mxu1 %v2977_v27 }
 0x2f4   :  { %889 = vmatpush1.msra.mxu0 %v3066_v53  ;;  %960 = vmatpush1.msra.mxu1 %v3069_v54 }
 0x2f5   :  { %890 = vmatprep.subr.mxu0 %v3072_v61  ;;  %961 = vmatprep.subr.mxu1 %v3076_v63 }
 0x2f6   :  { %891 = vmatpush1.msra.mxu0 %v3080_v36  ;;  %962 = vmatpush1.msra.mxu1 %v3083_v0 }
 0x2f7   :  { %892 = vmatprep.subr.mxu0 %v3086_v7  ;;  %963 = vmatprep.subr.mxu1 %v3089_v8 }
 0x2f8   :  { %893 = vmatpush1.msra.mxu0 %v3092_v9  ;;  %964 = vmatpush1.msra.mxu1 %v3095_v10 }
 0x2f9   :  { %894 = vmatprep.subr.mxu0 %v3098_v11  ;;  %965 = vmatprep.subr.mxu1 %v3101_v29 }
 0x2fa   :  { %895 = vmatpush1.msra.mxu0 %v3104_v31  ;;  %966 = vmatpush1.msra.mxu1 %v3107_v33 }
 0x2fb   :  { %896 = vmatprep.subr.mxu0 %v3110_v37  ;;  %967 = vmatprep.subr.mxu1 %v3113_v40 }
 0x2fc   :  { %897 = vmatpush1.msra.mxu0 %v3116_v41  ;;  %968 = vmatpush1.msra.mxu1 %v3119_v6 }
 0x2fd   :  { %898 = vmatprep.subr.mxu0 %v3122_v5  ;;  %969 = vmatprep.subr.mxu1 %v3125_v4 }
 0x2fe   :  { %899 = vmatpush1.msra.mxu0 %v3128_v3  ;;  %970 = vmatpush1.msra.mxu1 %v3131_v39 }
 0x2ff   :  { %900 = vmatprep.subr.mxu0 %v5666_v42  ;;  %971 = vmatprep.subr.mxu1 %v5667_v43 }
 0x300   :  { %901 = vmatpush1.msra.mxu0 %v5668_v44  ;;  %972 = vmatpush1.msra.mxu1 %v5669_v45 }
 0x301   :  { %902 = vmatprep.subr.mxu0 %v5670_v46  ;;  %973 = vmatprep.subr.mxu1 %v5671_v47 }
 0x302   :  { %903 = vmatpush1.msra.mxu0 %v5672_v48  ;;  %974 = vmatpush1.msra.mxu1 %v5673_v49 }
 0x303   :  { %904 = vmatprep.subr.mxu0 %v5674_v50  ;;  %975 = vmatprep.subr.mxu1 %v5675_v51 }
 0x304   :  { %905 = vmatpush1.msra.mxu0 %v5676_v52  ;;  %976 = vmatpush1.msra.mxu1 %v5677_v55 }
 0x305   :  { %906 = vmatprep.subr.mxu0 %v5678_v56  ;;  %977 = vmatprep.subr.mxu1 %v5679_v57  ;;  %v5783_v57 = vld [vmem:[#allocation85_spill] sm:$0xff]  ;;  %v5785_v56 = vld [vmem:[#allocation86_spill] sm:$0xff] }
 0x306   :  { %907 = vmatpush1.msra.mxu0 %v5680_v58  ;;  %978 = vmatpush1.msra.mxu1 %v5681_v59  ;;  %v5781_v58 = vld [vmem:[#allocation84_spill] sm:$0xff] }
 0x307   :  { %908 = vmatprep.subr.mxu0 %v5682_v60  ;;  %979 = vmatprep.subr.mxu1 %v5683_v62 }
 0x308   :  { %909 = vmatpush1.msra.mxu0 %v5684_v12  ;;  %980 = vmatpush1.msra.mxu1 %v5685_v13 }
 0x309   :  { %910 = vmatprep.subr.mxu0 %v5686_v14  ;;  %981 = vmatprep.subr.mxu1 %v5687_v15  ;;  %v5698_v15 = vld [vmem:[#allocation44_spill] sm:$0xff] }
 0x30a   :  { %911 = vmatpush1.msra.mxu0 %v5688_v16  ;;  %982 = vmatpush1.msra.mxu1 %v5689_v17  ;;  %v5699_v16 = vld [vmem:[#allocation45_spill] sm:$0xff]  ;;  %v5700_v17 = vld [vmem:[#allocation46_spill] sm:$0xff] }
 0x30b   :  { %912 = vmatprep.subr.mxu0 %v5690_v18  ;;  %983 = vmatprep.subr.mxu1 %v5691_v19  ;;  %v5701_v18 = vld [vmem:[#allocation47_spill] sm:$0xff]  ;;  %v5702_v19 = vld [vmem:[#allocation48_spill] sm:$0xff] }
 0x30c   :  { %913 = vmatpush1.msra.mxu0 %v5692_v20  ;;  %984 = vmatpush1.msra.mxu1 %v5693_v21  ;;  %v5703_v20 = vld [vmem:[#allocation49_spill] sm:$0xff]  ;;  %v5704_v21 = vld [vmem:[#allocation50_spill] sm:$0xff] }
 0x30d   :  { %914 = vmatprep.subr.mxu0 %v5694_v22  ;;  %985 = vmatprep.subr.mxu1 %v5695_v23  ;;  %v5705_v22 = vld [vmem:[#allocation51_spill] sm:$0xff]  ;;  %v5706_v23 = vld [vmem:[#allocation52_spill] sm:$0xff] }
 0x30e   :  { %915 = vmatpush1.msra.mxu0 %v5696_v24  ;;  %986 = vmatpush1.msra.mxu1 %v5697_v25  ;;  %v5707_v24 = vld [vmem:[#allocation53_spill] sm:$0xff]  ;;  %v5708_v25 = vld [vmem:[#allocation54_spill] sm:$0xff] }
 0x30f   :  { %916 = vmatprep.subr.mxu0 %v5698_v15  ;;  %987 = vmatprep.subr.mxu1 %v5699_v16  ;;  %v5709_v15 = vld [vmem:[#allocation55_spill] sm:$0xff]  ;;  %v5710_v16 = vld [vmem:[#allocation56_spill] sm:$0xff] }
 0x310   :  { %917 = vmatpush1.msra.mxu0 %v5700_v17  ;;  %988 = vmatpush1.msra.mxu1 %v5701_v18  ;;  %v5711_v17 = vld [vmem:[#allocation57_spill] sm:$0xff]  ;;  %v5712_v18 = vld [vmem:[#allocation58_spill] sm:$0xff] }
 0x311   :  { %918 = vmatprep.subr.mxu0 %v5702_v19  ;;  %989 = vmatprep.subr.mxu1 %v5703_v20  ;;  %v5713_v19 = vld [vmem:[#allocation59_spill] sm:$0xff]  ;;  %v5714_v20 = vld [vmem:[#allocation60_spill] sm:$0xff] }
 0x312   :  { %919 = vmatpush1.msra.mxu0 %v5704_v21  ;;  %990 = vmatpush1.msra.mxu1 %v5705_v22  ;;  %v5715_v21 = vld [vmem:[#allocation61_spill] sm:$0xff]  ;;  %v5716_v22 = vld [vmem:[#allocation62_spill] sm:$0xff] }
 0x313   :  { %920 = vmatprep.subr.mxu0 %v5706_v23  ;;  %991 = vmatprep.subr.mxu1 %v5707_v24  ;;  %v5717_v23 = vld [vmem:[#allocation63_spill] sm:$0xff]  ;;  %v5718_v24 = vld [vmem:[#allocation64_spill] sm:$0xff] }
 0x314   :  { %921 = vmatpush2.msra.mxu0 %v5708_v25  ;;  %992 = vmatpush2.msra.mxu1 %v5709_v15  ;;  %v5719_v25 = vld [vmem:[#allocation65_spill] sm:$0xff]  ;;  %v5720_v15 = vld [vmem:[#allocation66_spill] sm:$0xff] }
 0x315   :  { %922 = vmatprep.subr.mxu0 %v5710_v16  ;;  %993 = vmatprep.subr.mxu1 %v5711_v17  ;;  %v5721_v16 = vld [vmem:[#allocation67_spill] sm:$0xff]  ;;  %v5722_v17 = vld [vmem:[#allocation68_spill] sm:$0xff] }
 0x316   :  { %923 = vmatpush2.msra.mxu0 %v5712_v18  ;;  %994 = vmatpush2.msra.mxu1 %v5713_v19  ;;  %v5723_v18 = vld [vmem:[#allocation69_spill] sm:$0xff]  ;;  %v5724_v19 = vld [vmem:[#allocation70_spill] sm:$0xff] }
 0x317   :  { %924 = vmatprep.subr.mxu0 %v5714_v20  ;;  %995 = vmatprep.subr.mxu1 %v5715_v21  ;;  %v5725_v20 = vld [vmem:[#allocation71_spill] sm:$0xff]  ;;  %v5726_v21 = vld [vmem:[#allocation72_spill] sm:$0xff] }
 0x318   :  { %925 = vmatpush2.msra.mxu0 %v5716_v22  ;;  %996 = vmatpush2.msra.mxu1 %v5717_v23  ;;  %v5727_v22 = vld [vmem:[#allocation73_spill] sm:$0xff]  ;;  %v5728_v23 = vld [vmem:[#allocation74_spill] sm:$0xff] }
 0x319   :  { %926 = vmatprep.subr.mxu0 %v5718_v24  ;;  %997 = vmatprep.subr.mxu1 %v5719_v25  ;;  %v5729_v24 = vld [vmem:[#allocation75_spill] sm:$0xff]  ;;  %v5730_v25 = vld [vmem:[#allocation76_spill] sm:$0xff] }
 0x31a   :  { %927 = vmatpush2.msra.mxu0 %v5720_v15  ;;  %998 = vmatpush2.msra.mxu1 %v5721_v16  ;;  %v5731_v15 = vld [vmem:[#allocation77_spill] sm:$0xff] }
 0x31b   :  { %928 = vmatprep.subr.mxu0 %v5722_v17  ;;  %999 = vmatprep.subr.mxu1 %v5723_v18  ;;  %v5764_v18 = vld [vmem:[#allocation89_spill] sm:$0xff]  ;;  %v5765_v17 = vld [vmem:[#allocation90_spill] sm:$0xff] }
 0x31c   :  { %929 = vmatpush2.msra.mxu0 %v5724_v19  ;;  %1000 = vmatpush2.msra.mxu1 %v5725_v20 }
 0x31d   :  { %930 = vmatprep.subr.mxu0 %v5726_v21  ;;  %1001 = vmatprep.subr.mxu1 %v5727_v22  ;;  %v3480_v22 = vld [vmem:[#allocation2 + $0x178] sm:$0xff] }
 0x31e   :  { %931 = vmatpush2.msra.mxu0 %v5728_v23  ;;  %1002 = vmatpush2.msra.mxu1 %v5729_v24  ;;  %5732 = vst [vmem:[#allocation12_spill] sm:$0xff] %v3480_v22  ;;  %v3483_v24 = vld [vmem:[#allocation5 + $0x178] sm:$0xff] }
 0x31f   :  { %932 = vmatprep.subr.mxu0 %v5730_v25  ;;  %1003 = vmatprep.subr.mxu1 %v5731_v15  ;;  %5733 = vst [vmem:[#allocation13_spill] sm:$0xff] %v3483_v24  ;;  %v3486_v15 = vld [vmem:[#allocation2 + $0x170] sm:$0xff] }
 0x320   :  { %933 = vmatpush2.msra.mxu0 %v3332_v32  ;;  %1004 = vmatpush2.msra.mxu1 %v3335_v30  ;;  %5734 = vst [vmem:[#allocation14_spill] sm:$0xff] %v3486_v15  ;;  %v3489_v30 = vld [vmem:[#allocation5 + $0x170] sm:$0xff] }
 0x321   :  { %934 = vmatprep.subr.mxu0 %v3338_v38  ;;  %1005 = vmatprep.subr.mxu1 %v3341_v28  ;;  %5735 = vst [vmem:[#allocation15_spill] sm:$0xff] %v3489_v30  ;;  %v3492_v28 = vld [vmem:[#allocation2 + $0x168] sm:$0xff] }
 0x322   :  { %935 = vmatpush2.msra.mxu0 %v3344_v35  ;;  %1006 = vmatpush2.msra.mxu1 %v3347_v2  ;;  %5736 = vst [vmem:[#allocation16_spill] sm:$0xff] %v3492_v28  ;;  %v3495_v2 = vld [vmem:[#allocation5 + $0x168] sm:$0xff] }
 0x323   :  { %936 = vmatprep.subr.mxu0 %v3480_v22  ;;  %1007 = vmatprep.subr.mxu1 %v3483_v24  ;;  %5737 = vst [vmem:[#allocation17_spill] sm:$0xff] %v3495_v2  ;;  %v3498_v22 = vld [vmem:[#allocation2 + $0x160] sm:$0xff] }
 0x324   :  { %937 = vmatpush2.msra.mxu0 %v3486_v15  ;;  %1008 = vmatpush2.msra.mxu1 %v3489_v30  ;;  %5738 = vst [vmem:[#allocation18_spill] sm:$0xff] %v3498_v22  ;;  %v3501_v24 = vld [vmem:[#allocation5 + $0x160] sm:$0xff]  ;;  %v3504_v15 = vld [vmem:[#allocation2 + $0x158] sm:$0xff] }
 0x325   :  { %938 = vmatprep.subr.mxu0 %v3492_v28  ;;  %1009 = vmatprep.subr.mxu1 %v3495_v2  ;;  %5739 = vst [vmem:[#allocation19_spill] sm:$0xff] %v3501_v24  ;;  %5740 = vst [vmem:[#allocation20_spill] sm:$0xff] %v3504_v15  ;;  %v3507_v30 = vld [vmem:[#allocation5 + $0x158] sm:$0xff]  ;;  %v3510_v28 = vld [vmem:[#allocation2 + $0x150] sm:$0xff] }
 0x326   :  { %939 = vmatpush2.msra.mxu0 %v3498_v22  ;;  %1010 = vmatpush2.msra.mxu1 %v3501_v24  ;;  %5741 = vst [vmem:[#allocation21_spill] sm:$0xff] %v3507_v30  ;;  %5742 = vst [vmem:[#allocation22_spill] sm:$0xff] %v3510_v28  ;;  %v3513_v2 = vld [vmem:[#allocation5 + $0x150] sm:$0xff]  ;;  %v3516_v22 = vld [vmem:[#allocation2 + $0x148] sm:$0xff] }
 0x327   :  { %940 = vmatprep.subr.mxu0 %v3504_v15  ;;  %1011 = vmatprep.subr.mxu1 %v3507_v30  ;;  %5743 = vst [vmem:[#allocation95_spill] sm:$0xff] %v3513_v2  ;;  %5744 = vst [vmem:[#allocation96_spill] sm:$0xff] %v3516_v22  ;;  %v3519_v24 = vld [vmem:[#allocation5 + $0x148] sm:$0xff]  ;;  %v3522_v15 = vld [vmem:[#allocation2 + $0x140] sm:$0xff] }
 0x328   :  { %941 = vmatpush2.msra.mxu0 %v3510_v28  ;;  %1012 = vmatpush2.msra.mxu1 %v3513_v2  ;;  %5745 = vst [vmem:[#allocation97_spill] sm:$0xff] %v3519_v24  ;;  %5746 = vst [vmem:[#allocation98_spill] sm:$0xff] %v3522_v15  ;;  %v3525_v30 = vld [vmem:[#allocation5 + $0x140] sm:$0xff]  ;;  %v3528_v28 = vld [vmem:[#allocation2 + $0x138] sm:$0xff] }
 0x329   :  { %942 = vmatprep.subr.mxu0 %v3516_v22  ;;  %1013 = vmatprep.subr.mxu1 %v3519_v24  ;;  %5747 = vst [vmem:[#allocation99_spill] sm:$0xff] %v3525_v30  ;;  %5748 = vst [vmem:[#allocation100_spill] sm:$0xff] %v3528_v28  ;;  %v3531_v2 = vld [vmem:[#allocation5 + $0x138] sm:$0xff]  ;;  %v3534_v22 = vld [vmem:[#allocation2 + $0x130] sm:$0xff] }
 0x32a   :  { %943 = vmatpush2.msra.mxu0 %v3522_v15  ;;  %1014 = vmatpush2.msra.mxu1 %v3525_v30  ;;  %5749 = vst [vmem:[#allocation101_spill] sm:$0xff] %v3531_v2  ;;  %5750 = vst [vmem:[#allocation102_spill] sm:$0xff] %v3534_v22  ;;  %v3537_v24 = vld [vmem:[#allocation5 + $0x130] sm:$0xff]  ;;  %v3540_v15 = vld [vmem:[#allocation2 + $0x128] sm:$0xff] }
 0x32b   :  { %944 = vmatprep.subr.mxu0 %v3528_v28  ;;  %1015 = vmatprep.subr.mxu1 %v3531_v2  ;;  %5751 = vst [vmem:[#allocation103_spill] sm:$0xff] %v3537_v24  ;;  %5752 = vst [vmem:[#allocation104_spill] sm:$0xff] %v3540_v15  ;;  %v3543_v30 = vld [vmem:[#allocation5 + $0x128] sm:$0xff]  ;;  %v3546_v28 = vld [vmem:[#allocation2 + $0x120] sm:$0xff] }
 0x32c   :  { %945 = vmatpush2.msra.mxu0 %v3534_v22  ;;  %1016 = vmatpush2.msra.mxu1 %v3537_v24  ;;  %5753 = vst [vmem:[#allocation105_spill] sm:$0xff] %v3543_v30  ;;  %5754 = vst [vmem:[#allocation106_spill] sm:$0xff] %v3546_v28  ;;  %v3549_v2 = vld [vmem:[#allocation5 + $0x120] sm:$0xff]  ;;  %v3552_v22 = vld [vmem:[#allocation2 + $0x118] sm:$0xff] }
 0x32d   :  { %946 = vmatprep.subr.mxu0 %v3540_v15  ;;  %1017 = vmatprep.subr.mxu1 %v3543_v30  ;;  %5755 = vst [vmem:[#allocation107_spill] sm:$0xff] %v3549_v2  ;;  %5756 = vst [vmem:[#allocation108_spill] sm:$0xff] %v3552_v22  ;;  %v3555_v24 = vld [vmem:[#allocation5 + $0x118] sm:$0xff]  ;;  %v3558_v15 = vld [vmem:[#allocation2 + $0x110] sm:$0xff] }
 0x32e   :  { %947 = vmatpush2.msra.mxu0 %v3546_v28  ;;  %1018 = vmatpush2.msra.mxu1 %v3549_v2  ;;  %5757 = vst [vmem:[#allocation109_spill] sm:$0xff] %v3555_v24  ;;  %5758 = vst [vmem:[#allocation110_spill] sm:$0xff] %v3558_v15  ;;  %v3561_v30 = vld [vmem:[#allocation5 + $0x110] sm:$0xff]  ;;  %v3564_v28 = vld [vmem:[#allocation2 + $0x108] sm:$0xff] }
 0x32f   :  { %948 = vmatprep.subr.mxu0 %v3552_v22  ;;  %1019 = vmatprep.subr.mxu1 %v3555_v24  ;;  %5759 = vst [vmem:[#allocation111_spill] sm:$0xff] %v3561_v30  ;;  %5760 = vst [vmem:[#allocation112_spill] sm:$0xff] %v3564_v28  ;;  %v3567_v2 = vld [vmem:[#allocation5 + $0x108] sm:$0xff]  ;;  %v3570_v22 = vld [vmem:[#allocation2 + $0x100] sm:$0xff] }
 0x330   :  { %949 = vmatpush2.msra.mxu0 %v3558_v15  ;;  %1020 = vmatpush2.msra.mxu1 %v3561_v30  ;;  %5761 = vst [vmem:[#allocation113_spill] sm:$0xff] %v3567_v2  ;;  %5762 = vst [vmem:[#allocation114_spill] sm:$0xff] %v3570_v22  ;;  %v3573_v24 = vld [vmem:[#allocation5 + $0x100] sm:$0xff] }
 0x331   :  { %950 = vmatprep.subr.mxu0 %v3564_v28  ;;  %1021 = vmatprep.subr.mxu1 %v3567_v2  ;;  %5763 = vst [vmem:[#allocation115_spill] sm:$0xff] %v3573_v24 }
 0x332   :  { %951 = vmatpush2.msra.mxu0 %v3570_v22  ;;  %1022 = vmatpush2.msra.mxu1 %v3573_v24 }
 0x333   :  { %1032 = vmatprep.subr.mxu0 %v2974_v26  ;;  %1103 = vmatprep.subr.mxu1 %v2977_v27 }
 0x371   :  { %v608_v30 = vpop.f32.mrf.mxu0  ;;  %v679_v15 = vpop.f32.mrf.mxu1 }
 0x372   :  { %v684_v25 = vsub.f32 %v608_v30, %v679_v15  ;;  %v5766_v30 = vmov 0 }
 0x373   :  { %v610_v35 = vpop.f32.mrf.mxu0  ;;  %v681_v28 = vpop.f32.mrf.mxu1 }
 0x374   :  { %v685_v2 = vsub.f32 %v610_v35, %v681_v28  ;;  %v828_v24 = vmul.f32 %v684_v25, %v3051_v1  ;;  %v2067_v28 = vld [vmem:[#allocation7 + $0x18] sm:$0xff] }
 0x376   :  { %v829_v26 = vmul.f32 %v685_v2, %v5764_v18 }
 0x3b2   :  { %v752_v38 = vpop.f32.mrf.mxu0  ;;  %v823_v32 = vpop.f32.mrf.mxu1 }
 0x3b3   :  { %v824_v23 = vadd.f32 %v823_v32, %v752_v38  ;;  %v5769_v38 = vld [vmem:[#allocation88_spill] sm:$0xff] }
 0x3b4   :  { %v754_v21 = vpop.f32.mrf.mxu0  ;;  %v825_v20 = vpop.f32.mrf.mxu1  ;;  %vm524_vm7 = vcmp.lt.f32.partialorder %v5769_v38, 1e-10 }
 0x3b5   :  { %v830_v22 = vmul.f32 %v824_v23, %v3057_v34  ;;  %v826_v19 = vadd.f32 %v825_v20, %v754_v21  ;;  %vm539_vm8 = vmand %vm3007_vm4, %vm524_vm7  ;;  %v2064_v20 = vld [vmem:[#allocation7] sm:$0xff]  ;;  %v5780_v21 = vld [vmem:[#allocation83_spill] sm:$0xff] }
 0x3b6   :  { %vm540_vm9 = vmor %vm2992_vm0, %vm539_vm8  ;;  %v504_v35 = vmul.f32 %v2067_v28, %v5780_v21 }
 0x3b7   :  { %v831_v27 = vmul.f32 %v826_v19, %v5765_v17  ;;  %v832_v16 = vadd.f32 %v830_v22, %v828_v24  ;;  %vm3595_vm10 = vmor %vm67_vm1, %vm540_vm9  ;;  %v499_v22 = vmul.f32 %v2064_v20, %v5780_v21 }
 0x3b9   :  { %v833_v14 = vadd.f32 %v831_v27, %v829_v26  ;;  %v2065_v26 = vld [vmem:[#allocation7 + $0x8] sm:$0xff] }
 0x3ba   :  { %v500_v27 = vmul.f32 %v2065_v26, %v5780_v21 }
 0x3bb   :  { %v834_v13 = vadd.f32 %v833_v14, %v832_v16  ;;  %v5772_v14 = vld [vmem:[#allocation81_spill] sm:$0xff]  ;;  %v5777_v16 = vmov 0 }
 0x3bd   :  { %835 = vadd.xlane.f32.xlu1 %v834_v13  ;;  %v5773_v13 = vmov 0 }
 0x3be   :  { %v5774_v13 = vsel %vm3595_vm10, 4294967295, %v5773_v13 }
 0x3bf   :  { %5775 = vst [vmem:[#allocation90_spill] sm:$0xff] %v5774_v13 }
 0x446   :  { %v836_v12 = vpop.xlane.xlu1 %835 }
 0x447   :  { %v837_v62 = vand.u32 2147483647, %v836_v12 }
 0x449   :  { %vm3582_vm6 = vcmp.lt.f32.partialorder %v837_v62, 1e-12 }
 0x44a   :  { %v5767_v30 = vsel %vm3582_vm6, 4294967295, %v5766_v30  ;;  %v841_v32 = vsel %vm3582_vm6, 1.0, %v836_v12  ;;  %vm839_vm11 = vmor %vm3595_vm10, %vm3582_vm6  ;;  %v3607_v12 = vsel %vm3007_vm4, %v5769_v38, %v5772_v14 }
 0x44b   :  { %5768 = vst [vmem:[#allocation89_spill] sm:$0xff] %v5767_v30  ;;  %1922 = vrcp.f32 %v841_v32  ;;  %5776 = vst [vmem:[#allocation88_spill] sm:$0xff] %v3607_v12  ;;  %v2066_v32 = vld [vmem:[#allocation7 + $0x10] sm:$0xff]  ;;  %vm871_vm13 = vcmp.gt.f32.partialorder %v3607_v12, 0.0 }
 0x44c   :  { %vm3611_vm12 = vmxor %vm839_vm11, %vm2287_vm3  ;;  %v503_v38 = vmul.f32 %v2066_v32, %v5780_v21 }
 0x44d   :  { %v5778_v16 = vsel %vm3611_vm12, 4294967295, %v5777_v16 }
 0x44e   :  { %5779 = vst [vmem:[#allocation82_spill] sm:$0xff] %v5778_v16  ;;  %v5821_v16 = vld [vmem:[#allocation48_spill] sm:$0xff] }
 0x458   :  { %v1923_v62 = vpop.eup %1922 }
 0x459   :  { %v843_v15 = vmul.f32 %v1923_v62, %v3607_v12 }
 0x45b   :  { %v844_v24 = vsel %vm3611_vm12, %v843_v15, 0.0 }
 0x45c   :  { %v853_v14 = vmul.f32 %v844_v24, %v684_v25  ;;  %v854_v62 = vmul.f32 %v844_v24, %v685_v2  ;;  %v857_v13 = vmul.f32 %v844_v24, %v824_v23  ;;  %v858_v30 = vmul.f32 %v844_v24, %v826_v19  ;;  %v5787_v2 = vld [vmem:[#allocation87_spill] sm:$0xff] }
 0x45d   :  { %v845_v60 = vmul.f32 %v844_v24, %v3051_v1  ;;  %v846_v20 = vmul.f32 %v844_v24, %v5764_v18  ;;  %v849_v59 = vmul.f32 %v844_v24, %v3057_v34  ;;  %v850_v15 = vmul.f32 %v844_v24, %v5765_v17 }
 0x45e   :  { %v3626_v26 = vsub.f32 %v5781_v58, %v853_v14  ;;  %v3629_v32 = vsub.f32 %v5783_v57, %v854_v62  ;;  %v3632_v21 = vsub.f32 %v5785_v56, %v857_v13  ;;  %v3635_v23 = vsub.f32 %v5787_v2, %v858_v30 }
 0x45f   :  { %v3637_v19 = vadd.f32 %v845_v60, %v499_v22  ;;  %v3639_v25 = vadd.f32 %v846_v20, %v500_v27  ;;  %v3641_v28 = vadd.f32 %v849_v59, %v503_v38  ;;  %v3643_v55 = vadd.f32 %v850_v15, %v504_v35 }
 0x460   :  { %5782 = vst [vmem:[#allocation80_spill] sm:$0xff] %v3626_v26  ;;  %5784 = vst [vmem:[#allocation81_spill] sm:$0xff] %v3629_v32  ;;  %v861_v58 = vmul.f32 %v3626_v26, %v3626_v26  ;;  %v862_v57 = vmul.f32 %v3629_v32, %v3629_v32  ;;  %v863_v56 = vmul.f32 %v3632_v21, %v3632_v21  ;;  %v872_v59 = vsel %vm871_vm13, %v3607_v12, 1.0  ;;  %v5820_v12 = vld [vmem:[#allocation47_spill] sm:$0xff] }
 0x461   :  { %5786 = vst [vmem:[#allocation83_spill] sm:$0xff] %v3632_v21  ;;  %5788 = vst [vmem:[#allocation84_spill] sm:$0xff] %v3635_v23  ;;  %v864_v30 = vmul.f32 %v3635_v23, %v3635_v23  ;;  %1924 = vrcp.f32 %v872_v59  ;;  %v5804_v59 = vld [vmem:[#allocation31_spill] sm:$0xff] }
 0x462   :  { %5789 = vst [vmem:[#allocation85_spill] sm:$0xff] %v3637_v19  ;;  %5790 = vst [vmem:[#allocation86_spill] sm:$0xff] %v3639_v25  ;;  %v865_v60 = vadd.f32 %v863_v56, %v861_v58  ;;  %v5814_v25 = vld [vmem:[#allocation41_spill] sm:$0xff]  ;;  %v5815_v19 = vld [vmem:[#allocation42_spill] sm:$0xff] }
 0x463   :  { %5791 = vst [vmem:[#allocation87_spill] sm:$0xff] %v3641_v28  ;;  %5792 = vst [vmem:[#allocation116_spill] sm:$0xff] %v3643_v55  ;;  %v866_v13 = vadd.f32 %v864_v30, %v862_v57  ;;  %v5800_v30 = vld [vmem:[#allocation27_spill] sm:$0xff]  ;;  %v5813_v28 = vld [vmem:[#allocation40_spill] sm:$0xff] }
 0x464   :  { %v5812_v55 = vld [vmem:[#allocation39_spill] sm:$0xff] }
 0x465   :  { %v867_v22 = vadd.f32 %v866_v13, %v865_v60  ;;  %v5801_v60 = vld [vmem:[#allocation28_spill] sm:$0xff]  ;;  %v5802_v13 = vld [vmem:[#allocation29_spill] sm:$0xff] }
 0x467   :  { %868 = vadd.xlane.f32.xlu0 %v867_v22  ;;  %v5803_v22 = vld [vmem:[#allocation30_spill] sm:$0xff] }
 0x46e   :  { %v1925_v24 = vpop.eup %1924 }
 0x4f0   :  { %v3655_v27 = vpop.xlane.xlu0 %868 }
 0x4f1   :  { %5793 = vst [vmem:[#allocation117_spill] sm:$0xff] %v3655_v27  ;;  %v874_v38 = vmul.f32 %v1925_v24, %v3655_v27  ;;  %v5805_v24 = vld [vmem:[#allocation32_spill] sm:$0xff]  ;;  %v5822_v27 = vld [vmem:[#allocation49_spill] sm:$0xff] }
 0x4f3   :  { %v875_v35 = vsel %vm3611_vm12, %v874_v38, 0.0  ;;  %v5806_v38 = vld [vmem:[#allocation33_spill] sm:$0xff] }
 0x4f4   :  { %v876_v14 = vmul.f32 %v875_v35, %v3051_v1  ;;  %v877_v62 = vmul.f32 %v875_v35, %v5764_v18  ;;  %v880_v20 = vmul.f32 %v875_v35, %v3057_v34  ;;  %v881_v15 = vmul.f32 %v875_v35, %v5765_v17  ;;  %v5796_v1 = vld [vmem:[#allocation23_spill] sm:$0xff]  ;;  %v5797_v34 = vld [vmem:[#allocation24_spill] sm:$0xff]  ;;  %v5798_v17 = vld [vmem:[#allocation25_spill] sm:$0xff] }
 0x4f5   :  { %v5799_v18 = vld [vmem:[#allocation26_spill] sm:$0xff] }
 0x4f6   :  { %v3665_v2 = vadd.f32 %v876_v14, %v3626_v26  ;;  %v3668_v58 = vadd.f32 %v877_v62, %v3629_v32  ;;  %v3671_v57 = vadd.f32 %v880_v20, %v3632_v21  ;;  %v3674_v56 = vadd.f32 %v881_v15, %v3635_v23  ;;  %v5807_v35 = vld [vmem:[#allocation34_spill] sm:$0xff]  ;;  %v5808_v14 = vld [vmem:[#allocation35_spill] sm:$0xff]  ;;  %v5809_v62 = vld [vmem:[#allocation36_spill] sm:$0xff] }
 0x4f7   :  { %v5810_v20 = vld [vmem:[#allocation37_spill] sm:$0xff]  ;;  %v5811_v15 = vld [vmem:[#allocation38_spill] sm:$0xff]  ;;  %v5816_v23 = vld [vmem:[#allocation43_spill] sm:$0xff] }
 0x4f8   :  { %5794 = vst [vmem:[#allocation118_spill] sm:$0xff] %v3668_v58  ;;  %5795 = vst [vmem:[#allocation119_spill] sm:$0xff] %v3674_v56  ;;  %952 = vmatprep.mubr.f32.mxu0 %v3668_v58  ;;  %1023 = vmatprep.mubr.f32.mxu1 %v3674_v56  ;;  %v5817_v21 = vld [vmem:[#allocation44_spill] sm:$0xff]  ;;  %v5818_v32 = vld [vmem:[#allocation45_spill] sm:$0xff] }
 0x4f9   :  { %953 = vmatmul.mubr.f32.vlgmr.msra.gmra.mxu0 %v3665_v2  ;;  %1024 = vmatmul.mubr.f32.vlgmr.msra.gmra.mxu1 %v3671_v57  ;;  %v5819_v26 = vld [vmem:[#allocation46_spill] sm:$0xff] }
 0x4fa   :  { %1033 = vmatpush1.msra.mxu0 %v3066_v53  ;;  %1104 = vmatpush1.msra.mxu1 %v3069_v54 }
 0x4fb   :  { %1034 = vmatprep.subr.mxu0 %v3072_v61  ;;  %1096 = vmatprep.mubr.f32.mxu0 %v3674_v56  ;;  %v5823_v56 = vld [vmem:[#allocation50_spill] sm:$0xff] }
 0x4fc   :  { %1105 = vmatprep.subr.mxu1 %v3076_v63  ;;  %1167 = vmatprep.mubr.f32.mxu1 %v3668_v58  ;;  %v5824_v58 = vld [vmem:[#allocation51_spill] sm:$0xff] }
 0x4fd   :  { %1035 = vmatpush1.msra.mxu0 %v3080_v36  ;;  %1106 = vmatpush1.msra.mxu1 %v3083_v0 }
 0x4fe   :  { %1036 = vmatprep.subr.mxu0 %v3086_v7  ;;  %1107 = vmatprep.subr.mxu1 %v3089_v8 }
 0x4ff   :  { %1037 = vmatpush1.msra.mxu0 %v3092_v9  ;;  %1108 = vmatpush1.msra.mxu1 %v3095_v10 }
 0x500   :  { %1038 = vmatprep.subr.mxu0 %v3098_v11  ;;  %1109 = vmatprep.subr.mxu1 %v3101_v29 }
 0x501   :  { %1039 = vmatpush1.msra.mxu0 %v3104_v31  ;;  %1110 = vmatpush1.msra.mxu1 %v3107_v33 }
 0x502   :  { %1040 = vmatprep.subr.mxu0 %v3110_v37  ;;  %1111 = vmatprep.subr.mxu1 %v3113_v40 }
 0x503   :  { %1041 = vmatpush1.msra.mxu0 %v3116_v41  ;;  %1112 = vmatpush1.msra.mxu1 %v3119_v6 }
 0x504   :  { %1042 = vmatprep.subr.mxu0 %v3122_v5  ;;  %1113 = vmatprep.subr.mxu1 %v3125_v4 }
 0x505   :  { %1043 = vmatpush1.msra.mxu0 %v3128_v3  ;;  %1114 = vmatpush1.msra.mxu1 %v3131_v39 }
 0x506   :  { %1044 = vmatprep.subr.mxu0 %v5666_v42  ;;  %1115 = vmatprep.subr.mxu1 %v5667_v43 }
 0x507   :  { %1045 = vmatpush1.msra.mxu0 %v5668_v44  ;;  %1116 = vmatpush1.msra.mxu1 %v5669_v45 }
 0x508   :  { %1046 = vmatprep.subr.mxu0 %v5670_v46  ;;  %1117 = vmatprep.subr.mxu1 %v5671_v47 }
 0x509   :  { %1047 = vmatpush1.msra.mxu0 %v5672_v48  ;;  %1118 = vmatpush1.msra.mxu1 %v5673_v49 }
 0x50a   :  { %1048 = vmatprep.subr.mxu0 %v5674_v50  ;;  %1119 = vmatprep.subr.mxu1 %v5675_v51 }
 0x50b   :  { %1049 = vmatpush1.msra.mxu0 %v5676_v52  ;;  %1120 = vmatpush1.msra.mxu1 %v5796_v1 }
 0x50c   :  { %1050 = vmatprep.subr.mxu0 %v5797_v34  ;;  %1121 = vmatprep.subr.mxu1 %v5798_v17 }
 0x50d   :  { %1051 = vmatpush1.msra.mxu0 %v5799_v18  ;;  %1122 = vmatpush1.msra.mxu1 %v5800_v30 }
 0x50e   :  { %1052 = vmatprep.subr.mxu0 %v5801_v60  ;;  %1123 = vmatprep.subr.mxu1 %v5802_v13 }
 0x50f   :  { %1053 = vmatpush1.msra.mxu0 %v5803_v22  ;;  %1124 = vmatpush1.msra.mxu1 %v5804_v59 }
 0x510   :  { %1054 = vmatprep.subr.mxu0 %v5805_v24  ;;  %1125 = vmatprep.subr.mxu1 %v5806_v38 }
 0x511   :  { %1055 = vmatpush1.msra.mxu0 %v5807_v35  ;;  %1126 = vmatpush1.msra.mxu1 %v5808_v14 }
 0x512   :  { %1056 = vmatprep.subr.mxu0 %v5809_v62  ;;  %1127 = vmatprep.subr.mxu1 %v5810_v20 }
 0x513   :  { %1057 = vmatpush1.msra.mxu0 %v5811_v15  ;;  %1128 = vmatpush1.msra.mxu1 %v5812_v55 }
 0x514   :  { %1058 = vmatprep.subr.mxu0 %v5813_v28  ;;  %1129 = vmatprep.subr.mxu1 %v5814_v25  ;;  %v5825_v25 = vld [vmem:[#allocation52_spill] sm:$0xff] }
 0x515   :  { %1059 = vmatpush1.msra.mxu0 %v5815_v19  ;;  %1130 = vmatpush1.msra.mxu1 %v5816_v23  ;;  %v5826_v19 = vld [vmem:[#allocation53_spill] sm:$0xff]  ;;  %v5827_v23 = vld [vmem:[#allocation54_spill] sm:$0xff] }
 0x516   :  { %1060 = vmatprep.subr.mxu0 %v5817_v21  ;;  %1131 = vmatprep.subr.mxu1 %v5818_v32  ;;  %v5828_v21 = vld [vmem:[#allocation55_spill] sm:$0xff]  ;;  %v5829_v32 = vld [vmem:[#allocation56_spill] sm:$0xff] }
 0x517   :  { %1061 = vmatpush1.msra.mxu0 %v5819_v26  ;;  %1132 = vmatpush1.msra.mxu1 %v5820_v12  ;;  %v5830_v26 = vld [vmem:[#allocation57_spill] sm:$0xff]  ;;  %v5831_v12 = vld [vmem:[#allocation58_spill] sm:$0xff] }
 0x518   :  { %1062 = vmatprep.subr.mxu0 %v5821_v16  ;;  %1133 = vmatprep.subr.mxu1 %v5822_v27  ;;  %v5832_v16 = vld [vmem:[#allocation59_spill] sm:$0xff]  ;;  %v5833_v27 = vld [vmem:[#allocation60_spill] sm:$0xff] }
 0x519   :  { %1063 = vmatpush1.msra.mxu0 %v5823_v56  ;;  %1134 = vmatpush1.msra.mxu1 %v5824_v58  ;;  %v5834_v56 = vld [vmem:[#allocation61_spill] sm:$0xff]  ;;  %v5835_v58 = vld [vmem:[#allocation62_spill] sm:$0xff] }
 0x51a   :  { %1064 = vmatprep.subr.mxu0 %v5825_v25  ;;  %1135 = vmatprep.subr.mxu1 %v5826_v19  ;;  %v5836_v25 = vld [vmem:[#allocation63_spill] sm:$0xff]  ;;  %v5837_v19 = vld [vmem:[#allocation64_spill] sm:$0xff] }
 0x51b   :  { %1065 = vmatpush2.msra.mxu0 %v5827_v23  ;;  %1136 = vmatpush2.msra.mxu1 %v5828_v21  ;;  %v5838_v23 = vld [vmem:[#allocation65_spill] sm:$0xff]  ;;  %v5839_v21 = vld [vmem:[#allocation66_spill] sm:$0xff] }
 0x51c   :  { %1066 = vmatprep.subr.mxu0 %v5829_v32  ;;  %1137 = vmatprep.subr.mxu1 %v5830_v26  ;;  %v5840_v32 = vld [vmem:[#allocation67_spill] sm:$0xff]  ;;  %v5841_v26 = vld [vmem:[#allocation68_spill] sm:$0xff] }
 0x51d   :  { %1067 = vmatpush2.msra.mxu0 %v5831_v12  ;;  %1138 = vmatpush2.msra.mxu1 %v5832_v16  ;;  %v5842_v12 = vld [vmem:[#allocation69_spill] sm:$0xff]  ;;  %v5843_v16 = vld [vmem:[#allocation70_spill] sm:$0xff] }
 0x51e   :  { %1068 = vmatprep.subr.mxu0 %v5833_v27  ;;  %1139 = vmatprep.subr.mxu1 %v5834_v56  ;;  %v5844_v27 = vld [vmem:[#allocation71_spill] sm:$0xff]  ;;  %v5845_v56 = vld [vmem:[#allocation72_spill] sm:$0xff] }
 0x51f   :  { %1069 = vmatpush2.msra.mxu0 %v5835_v58  ;;  %1140 = vmatpush2.msra.mxu1 %v5836_v25  ;;  %v5846_v58 = vld [vmem:[#allocation73_spill] sm:$0xff]  ;;  %v5847_v25 = vld [vmem:[#allocation74_spill] sm:$0xff] }
 0x520   :  { %1070 = vmatprep.subr.mxu0 %v5837_v19  ;;  %1141 = vmatprep.subr.mxu1 %v5838_v23  ;;  %v5848_v19 = vld [vmem:[#allocation75_spill] sm:$0xff]  ;;  %v5849_v23 = vld [vmem:[#allocation76_spill] sm:$0xff] }
 0x521   :  { %1071 = vmatpush2.msra.mxu0 %v5839_v21  ;;  %1142 = vmatpush2.msra.mxu1 %v5840_v32  ;;  %v5850_v21 = vld [vmem:[#allocation77_spill] sm:$0xff]  ;;  %v5851_v32 = vld [vmem:[#allocation78_spill] sm:$0xff] }
 0x522   :  { %1072 = vmatprep.subr.mxu0 %v5841_v26  ;;  %1143 = vmatprep.subr.mxu1 %v5842_v12  ;;  %v5852_v26 = vld [vmem:[#allocation79_spill] sm:$0xff] }
 0x523   :  { %1073 = vmatpush2.msra.mxu0 %v5843_v16  ;;  %1144 = vmatpush2.msra.mxu1 %v5844_v27  ;;  %v5853_v12 = vld [vmem:[#allocation91_spill] sm:$0xff]  ;;  %v5854_v16 = vld [vmem:[#allocation92_spill] sm:$0xff]  ;;  %v5855_v27 = vld [vmem:[#allocation93_spill] sm:$0xff] }
 0x524   :  { %1074 = vmatprep.subr.mxu0 %v5845_v56  ;;  %1145 = vmatprep.subr.mxu1 %v5846_v58  ;;  %v5856_v56 = vld [vmem:[#allocation94_spill] sm:$0xff]  ;;  %v5857_v58 = vld [vmem:[#allocation12_spill] sm:$0xff] }
 0x525   :  { %1075 = vmatpush2.msra.mxu0 %v5847_v25  ;;  %1146 = vmatpush2.msra.mxu1 %v5848_v19  ;;  %v5858_v25 = vld [vmem:[#allocation13_spill] sm:$0xff]  ;;  %v5859_v19 = vld [vmem:[#allocation14_spill] sm:$0xff] }
 0x526   :  { %1076 = vmatprep.subr.mxu0 %v5849_v23  ;;  %1147 = vmatprep.subr.mxu1 %v5850_v21  ;;  %v5860_v23 = vld [vmem:[#allocation15_spill] sm:$0xff]  ;;  %v5861_v21 = vld [vmem:[#allocation16_spill] sm:$0xff] }
 0x527   :  { %1077 = vmatpush2.msra.mxu0 %v5851_v32  ;;  %1148 = vmatpush2.msra.mxu1 %v5852_v26  ;;  %v5862_v32 = vld [vmem:[#allocation17_spill] sm:$0xff]  ;;  %v5863_v26 = vld [vmem:[#allocation18_spill] sm:$0xff] }
 0x528   :  { %1078 = vmatprep.subr.mxu0 %v5853_v12  ;;  %1149 = vmatprep.subr.mxu1 %v5854_v16  ;;  %v5864_v12 = vld [vmem:[#allocation19_spill] sm:$0xff]  ;;  %v5865_v16 = vld [vmem:[#allocation20_spill] sm:$0xff] }
 0x529   :  { %1079 = vmatpush2.msra.mxu0 %v5855_v27  ;;  %1150 = vmatpush2.msra.mxu1 %v5856_v56  ;;  %v5866_v27 = vld [vmem:[#allocation21_spill] sm:$0xff]  ;;  %v5867_v56 = vld [vmem:[#allocation22_spill] sm:$0xff] }
 0x52a   :  { %1080 = vmatprep.subr.mxu0 %v5857_v58  ;;  %1151 = vmatprep.subr.mxu1 %v5858_v25  ;;  %v5868_v58 = vld [vmem:[#allocation95_spill] sm:$0xff]  ;;  %v5869_v25 = vld [vmem:[#allocation96_spill] sm:$0xff] }
 0x52b   :  { %1081 = vmatpush2.msra.mxu0 %v5859_v19  ;;  %1152 = vmatpush2.msra.mxu1 %v5860_v23  ;;  %v5870_v19 = vld [vmem:[#allocation97_spill] sm:$0xff]  ;;  %v5871_v23 = vld [vmem:[#allocation98_spill] sm:$0xff] }
 0x52c   :  { %1082 = vmatprep.subr.mxu0 %v5861_v21  ;;  %1153 = vmatprep.subr.mxu1 %v5862_v32  ;;  %v5872_v21 = vld [vmem:[#allocation99_spill] sm:$0xff]  ;;  %v5873_v32 = vld [vmem:[#allocation100_spill] sm:$0xff] }
 0x52d   :  { %1083 = vmatpush2.msra.mxu0 %v5863_v26  ;;  %1154 = vmatpush2.msra.mxu1 %v5864_v12  ;;  %v5874_v26 = vld [vmem:[#allocation101_spill] sm:$0xff]  ;;  %v5875_v12 = vld [vmem:[#allocation102_spill] sm:$0xff] }
 0x52e   :  { %1084 = vmatprep.subr.mxu0 %v5865_v16  ;;  %1155 = vmatprep.subr.mxu1 %v5866_v27  ;;  %v5876_v16 = vld [vmem:[#allocation103_spill] sm:$0xff]  ;;  %v5877_v27 = vld [vmem:[#allocation104_spill] sm:$0xff] }
 0x52f   :  { %1085 = vmatpush2.msra.mxu0 %v5867_v56  ;;  %1156 = vmatpush2.msra.mxu1 %v5868_v58  ;;  %v5878_v56 = vld [vmem:[#allocation105_spill] sm:$0xff]  ;;  %v5879_v58 = vld [vmem:[#allocation106_spill] sm:$0xff] }
 0x530   :  { %1086 = vmatprep.subr.mxu0 %v5869_v25  ;;  %1157 = vmatprep.subr.mxu1 %v5870_v19  ;;  %v5880_v25 = vld [vmem:[#allocation107_spill] sm:$0xff]  ;;  %v5881_v19 = vld [vmem:[#allocation108_spill] sm:$0xff] }
 0x531   :  { %1087 = vmatpush2.msra.mxu0 %v5871_v23  ;;  %1158 = vmatpush2.msra.mxu1 %v5872_v21  ;;  %v5882_v23 = vld [vmem:[#allocation109_spill] sm:$0xff]  ;;  %v5883_v21 = vld [vmem:[#allocation110_spill] sm:$0xff] }
 0x532   :  { %1088 = vmatprep.subr.mxu0 %v5873_v32  ;;  %1159 = vmatprep.subr.mxu1 %v5874_v26  ;;  %v5884_v32 = vld [vmem:[#allocation111_spill] sm:$0xff]  ;;  %v5885_v26 = vld [vmem:[#allocation112_spill] sm:$0xff] }
 0x533   :  { %1089 = vmatpush2.msra.mxu0 %v5875_v12  ;;  %1160 = vmatpush2.msra.mxu1 %v5876_v16  ;;  %v5886_v12 = vld [vmem:[#allocation113_spill] sm:$0xff]  ;;  %v5887_v16 = vld [vmem:[#allocation114_spill] sm:$0xff] }
 0x534   :  { %1090 = vmatprep.subr.mxu0 %v5877_v27  ;;  %1161 = vmatprep.subr.mxu1 %v5878_v56  ;;  %v5888_v27 = vld [vmem:[#allocation115_spill] sm:$0xff] }
 0x535   :  { %1091 = vmatpush2.msra.mxu0 %v5879_v58  ;;  %1162 = vmatpush2.msra.mxu1 %v5880_v25  ;;  %v3810_v25 = vld [vmem:[#allocation2 + $0xf8] sm:$0xff] }
 0x536   :  { %1092 = vmatprep.subr.mxu0 %v5881_v19  ;;  %1163 = vmatprep.subr.mxu1 %v5882_v23  ;;  %v3813_v23 = vld [vmem:[#allocation5 + $0xf8] sm:$0xff] }
 0x537   :  { %1093 = vmatpush2.msra.mxu0 %v5883_v21  ;;  %1164 = vmatpush2.msra.mxu1 %v5884_v32 }
 0x538   :  { %1094 = vmatprep.subr.mxu0 %v5885_v26  ;;  %1165 = vmatprep.subr.mxu1 %v5886_v12 }
 0x539   :  { %1095 = vmatpush2.msra.mxu0 %v5887_v16  ;;  %1166 = vmatpush2.msra.mxu1 %v5888_v27 }
 0x53a   :  { %1097 = vmatmul.mubr.f32.vlgmr.msra.gmra.mxu0 %v3671_v57  ;;  %1168 = vmatmul.mubr.f32.vlgmr.msra.gmra.mxu1 %v3665_v2 }
 0x53b   :  { %1234 = vmatprep.subr.mxu0 %v3810_v25  ;;  %1305 = vmatprep.subr.mxu1 %v3813_v23 }
 0x53c   :  { %1235 = vmatpush1.msra.mxu0 %v3066_v53  ;;  %1306 = vmatpush1.msra.mxu1 %v3069_v54  ;;  %v5894_v53 = vld [vmem:[#allocation46_spill] sm:$0xff]  ;;  %v5895_v54 = vld [vmem:[#allocation47_spill] sm:$0xff] }
 0x53d   :  { %1236 = vmatprep.subr.mxu0 %v3072_v61  ;;  %1307 = vmatprep.subr.mxu1 %v3076_v63  ;;  %v5896_v61 = vld [vmem:[#allocation48_spill] sm:$0xff]  ;;  %v5897_v63 = vld [vmem:[#allocation49_spill] sm:$0xff] }
 0x53e   :  { %1237 = vmatpush1.msra.mxu0 %v3080_v36  ;;  %1308 = vmatpush1.msra.mxu1 %v3083_v0  ;;  %v5898_v36 = vld [vmem:[#allocation50_spill] sm:$0xff]  ;;  %v5899_v0 = vld [vmem:[#allocation51_spill] sm:$0xff] }
 0x53f   :  { %1238 = vmatprep.subr.mxu0 %v3086_v7  ;;  %1309 = vmatprep.subr.mxu1 %v3089_v8  ;;  %v5900_v7 = vld [vmem:[#allocation52_spill] sm:$0xff]  ;;  %v5901_v8 = vld [vmem:[#allocation53_spill] sm:$0xff] }
 0x540   :  { %1239 = vmatpush1.msra.mxu0 %v3092_v9  ;;  %1310 = vmatpush1.msra.mxu1 %v3095_v10  ;;  %v5902_v9 = vld [vmem:[#allocation54_spill] sm:$0xff]  ;;  %v5903_v10 = vld [vmem:[#allocation55_spill] sm:$0xff] }
 0x541   :  { %1240 = vmatprep.subr.mxu0 %v3098_v11  ;;  %1311 = vmatprep.subr.mxu1 %v3101_v29  ;;  %v5904_v11 = vld [vmem:[#allocation56_spill] sm:$0xff]  ;;  %v5905_v29 = vld [vmem:[#allocation57_spill] sm:$0xff] }
 0x542   :  { %1241 = vmatpush1.msra.mxu0 %v3104_v31  ;;  %1312 = vmatpush1.msra.mxu1 %v3107_v33  ;;  %v5906_v31 = vld [vmem:[#allocation58_spill] sm:$0xff]  ;;  %v5907_v33 = vld [vmem:[#allocation59_spill] sm:$0xff] }
 0x543   :  { %1242 = vmatprep.subr.mxu0 %v3110_v37  ;;  %1313 = vmatprep.subr.mxu1 %v3113_v40  ;;  %v5908_v37 = vld [vmem:[#allocation60_spill] sm:$0xff]  ;;  %v5909_v40 = vld [vmem:[#allocation61_spill] sm:$0xff] }
 0x544   :  { %1243 = vmatpush1.msra.mxu0 %v3116_v41  ;;  %1314 = vmatpush1.msra.mxu1 %v3119_v6  ;;  %v5893_v6 = vld [vmem:[#allocation45_spill] sm:$0xff]  ;;  %v5910_v41 = vld [vmem:[#allocation62_spill] sm:$0xff] }
 0x545   :  { %1244 = vmatprep.subr.mxu0 %v3122_v5  ;;  %1315 = vmatprep.subr.mxu1 %v3125_v4  ;;  %v5891_v4 = vld [vmem:[#allocation43_spill] sm:$0xff]  ;;  %v5892_v5 = vld [vmem:[#allocation44_spill] sm:$0xff] }
 0x546   :  { %1245 = vmatpush1.msra.mxu0 %v3128_v3  ;;  %1316 = vmatpush1.msra.mxu1 %v3131_v39  ;;  %v5889_v39 = vld [vmem:[#allocation41_spill] sm:$0xff]  ;;  %v5890_v3 = vld [vmem:[#allocation42_spill] sm:$0xff] }
 0x547   :  { %1246 = vmatprep.subr.mxu0 %v5666_v42  ;;  %1317 = vmatprep.subr.mxu1 %v5667_v43  ;;  %v5911_v42 = vld [vmem:[#allocation63_spill] sm:$0xff]  ;;  %v5912_v43 = vld [vmem:[#allocation64_spill] sm:$0xff] }
 0x548   :  { %1247 = vmatpush1.msra.mxu0 %v5668_v44  ;;  %1318 = vmatpush1.msra.mxu1 %v5669_v45  ;;  %v5913_v44 = vld [vmem:[#allocation65_spill] sm:$0xff]  ;;  %v5914_v45 = vld [vmem:[#allocation66_spill] sm:$0xff] }
 0x549   :  { %1248 = vmatprep.subr.mxu0 %v5670_v46  ;;  %1319 = vmatprep.subr.mxu1 %v5671_v47  ;;  %v5915_v46 = vld [vmem:[#allocation67_spill] sm:$0xff]  ;;  %v5916_v47 = vld [vmem:[#allocation68_spill] sm:$0xff] }
 0x54a   :  { %1249 = vmatpush1.msra.mxu0 %v5672_v48  ;;  %1320 = vmatpush1.msra.mxu1 %v5673_v49  ;;  %v5917_v48 = vld [vmem:[#allocation69_spill] sm:$0xff]  ;;  %v5918_v49 = vld [vmem:[#allocation70_spill] sm:$0xff] }
 0x54b   :  { %1250 = vmatprep.subr.mxu0 %v5674_v50  ;;  %1321 = vmatprep.subr.mxu1 %v5675_v51  ;;  %v5919_v50 = vld [vmem:[#allocation71_spill] sm:$0xff]  ;;  %v5920_v51 = vld [vmem:[#allocation72_spill] sm:$0xff] }
 0x54c   :  { %1251 = vmatpush1.msra.mxu0 %v5676_v52  ;;  %1322 = vmatpush1.msra.mxu1 %v5796_v1  ;;  %v5921_v52 = vld [vmem:[#allocation73_spill] sm:$0xff]  ;;  %v5924_v1 = vld [vmem:[#allocation76_spill] sm:$0xff] }
 0x54d   :  { %1252 = vmatprep.subr.mxu0 %v5797_v34  ;;  %1323 = vmatprep.subr.mxu1 %v5798_v17  ;;  %v5925_v34 = vld [vmem:[#allocation77_spill] sm:$0xff]  ;;  %v5926_v17 = vld [vmem:[#allocation78_spill] sm:$0xff] }
 0x54e   :  { %1253 = vmatpush1.msra.mxu0 %v5799_v18  ;;  %1324 = vmatpush1.msra.mxu1 %v5800_v30  ;;  %v5927_v18 = vld [vmem:[#allocation79_spill] sm:$0xff] }
 0x54f   :  { %1254 = vmatprep.subr.mxu0 %v5801_v60  ;;  %1325 = vmatprep.subr.mxu1 %v5802_v13  ;;  %v5928_v30 = vld [vmem:[#allocation91_spill] sm:$0xff]  ;;  %v5929_v60 = vld [vmem:[#allocation92_spill] sm:$0xff]  ;;  %v5930_v13 = vld [vmem:[#allocation93_spill] sm:$0xff] }
 0x550   :  { %1255 = vmatpush1.msra.mxu0 %v5803_v22  ;;  %1326 = vmatpush1.msra.mxu1 %v5804_v59  ;;  %v5931_v22 = vld [vmem:[#allocation94_spill] sm:$0xff]  ;;  %v5932_v59 = vld [vmem:[#allocation12_spill] sm:$0xff] }
 0x551   :  { %1256 = vmatprep.subr.mxu0 %v5805_v24  ;;  %1327 = vmatprep.subr.mxu1 %v5806_v38  ;;  %v5933_v24 = vld [vmem:[#allocation13_spill] sm:$0xff]  ;;  %v5934_v38 = vld [vmem:[#allocation14_spill] sm:$0xff] }
 0x552   :  { %1257 = vmatpush1.msra.mxu0 %v5807_v35  ;;  %1328 = vmatpush1.msra.mxu1 %v5808_v14  ;;  %v5935_v35 = vld [vmem:[#allocation15_spill] sm:$0xff]  ;;  %v5936_v14 = vld [vmem:[#allocation16_spill] sm:$0xff] }
 0x553   :  { %1258 = vmatprep.subr.mxu0 %v5809_v62  ;;  %1329 = vmatprep.subr.mxu1 %v5810_v20  ;;  %v5937_v62 = vld [vmem:[#allocation17_spill] sm:$0xff]  ;;  %v5938_v20 = vld [vmem:[#allocation18_spill] sm:$0xff] }
 0x554   :  { %1259 = vmatpush1.msra.mxu0 %v5811_v15  ;;  %1330 = vmatpush1.msra.mxu1 %v5812_v55  ;;  %v5922_v55 = vld [vmem:[#allocation74_spill] sm:$0xff]  ;;  %v5939_v15 = vld [vmem:[#allocation19_spill] sm:$0xff] }
 0x555   :  { %1260 = vmatprep.subr.mxu0 %v5813_v28  ;;  %1331 = vmatprep.subr.mxu1 %v5889_v39  ;;  %v5923_v28 = vld [vmem:[#allocation75_spill] sm:$0xff]  ;;  %v5940_v39 = vld [vmem:[#allocation20_spill] sm:$0xff] }
 0x556   :  { %1261 = vmatpush1.msra.mxu0 %v5890_v3  ;;  %1332 = vmatpush1.msra.mxu1 %v5891_v4  ;;  %v5941_v3 = vld [vmem:[#allocation21_spill] sm:$0xff]  ;;  %v5942_v4 = vld [vmem:[#allocation22_spill] sm:$0xff] }
 0x557   :  { %1262 = vmatprep.subr.mxu0 %v5892_v5  ;;  %1333 = vmatprep.subr.mxu1 %v5893_v6  ;;  %v5943_v5 = vld [vmem:[#allocation95_spill] sm:$0xff]  ;;  %v5944_v6 = vld [vmem:[#allocation96_spill] sm:$0xff] }
 0x558   :  { %1263 = vmatpush1.msra.mxu0 %v5894_v53  ;;  %1334 = vmatpush1.msra.mxu1 %v5895_v54  ;;  %v5945_v53 = vld [vmem:[#allocation97_spill] sm:$0xff]  ;;  %v5946_v54 = vld [vmem:[#allocation98_spill] sm:$0xff] }
 0x559   :  { %1264 = vmatprep.subr.mxu0 %v5896_v61  ;;  %1335 = vmatprep.subr.mxu1 %v5897_v63  ;;  %v5947_v61 = vld [vmem:[#allocation99_spill] sm:$0xff]  ;;  %v5948_v63 = vld [vmem:[#allocation100_spill] sm:$0xff] }
 0x55a   :  { %1265 = vmatpush1.msra.mxu0 %v5898_v36  ;;  %1336 = vmatpush1.msra.mxu1 %v5899_v0  ;;  %v5949_v36 = vld [vmem:[#allocation101_spill] sm:$0xff]  ;;  %v5950_v0 = vld [vmem:[#allocation102_spill] sm:$0xff] }
 0x55b   :  { %1266 = vmatprep.subr.mxu0 %v5900_v7  ;;  %1337 = vmatprep.subr.mxu1 %v5901_v8  ;;  %v5951_v7 = vld [vmem:[#allocation103_spill] sm:$0xff]  ;;  %v5952_v8 = vld [vmem:[#allocation104_spill] sm:$0xff] }
 0x55c   :  { %1267 = vmatpush2.msra.mxu0 %v5902_v9  ;;  %1338 = vmatpush2.msra.mxu1 %v5903_v10  ;;  %v5953_v9 = vld [vmem:[#allocation107_spill] sm:$0xff]  ;;  %v5954_v10 = vld [vmem:[#allocation109_spill] sm:$0xff] }
 0x55d   :  { %1268 = vmatprep.subr.mxu0 %v5904_v11  ;;  %1339 = vmatprep.subr.mxu1 %v5905_v29 }
 0x55e   :  { %1269 = vmatpush2.msra.mxu0 %v5906_v31  ;;  %1340 = vmatpush2.msra.mxu1 %v5907_v33 }
 0x55f   :  { %1270 = vmatprep.subr.mxu0 %v5908_v37  ;;  %1341 = vmatprep.subr.mxu1 %v5909_v40  ;;  %v5955_v40 = vld [vmem:[#allocation118_spill] sm:$0xff] }
 0x560   :  { %1271 = vmatpush2.msra.mxu0 %v5910_v41  ;;  %1342 = vmatpush2.msra.mxu1 %v5911_v42  ;;  %v5956_v42 = vld [vmem:[#allocation119_spill] sm:$0xff] }
 0x561   :  { %1272 = vmatprep.subr.mxu0 %v5912_v43  ;;  %1343 = vmatprep.subr.mxu1 %v5913_v44 }
 0x562   :  { %1273 = vmatpush2.msra.mxu0 %v5914_v45  ;;  %1344 = vmatpush2.msra.mxu1 %v5915_v46 }
 0x563   :  { %1274 = vmatprep.subr.mxu0 %v5916_v47  ;;  %1345 = vmatprep.subr.mxu1 %v5917_v48 }
 0x564   :  { %1275 = vmatpush2.msra.mxu0 %v5918_v49  ;;  %1346 = vmatpush2.msra.mxu1 %v5919_v50  ;;  %v5957_v49 = vmov 0 }
 0x565   :  { %1276 = vmatprep.subr.mxu0 %v5920_v51  ;;  %1347 = vmatprep.subr.mxu1 %v5921_v52  ;;  %v5960_v51 = vld [vmem:[#allocation117_spill] sm:$0xff]  ;;  %v4069_v52 = vld [vmem:[#allocation5 + $0xd8] sm:$0xff] }
 0x566   :  { %1277 = vmatpush2.msra.mxu0 %v5922_v55  ;;  %1348 = vmatpush2.msra.mxu1 %v5923_v28  ;;  %vm870_vm15 = vcmp.lt.f32.partialorder %v5960_v51, 1e-10  ;;  %v4072_v55 = vld [vmem:[#allocation2 + $0xd0] sm:$0xff] }
 0x567   :  { %1278 = vmatprep.subr.mxu0 %v5924_v1  ;;  %1349 = vmatprep.subr.mxu1 %v5925_v34  ;;  %vm885_vm0 = vmand %vm3611_vm12, %vm870_vm15  ;;  %v5964_v1 = vmov 0  ;;  %v4075_v28 = vld [vmem:[#allocation5 + $0xd0] sm:$0xff] }
 0x568   :  { %1279 = vmatpush2.msra.mxu0 %v5926_v17  ;;  %1350 = vmatpush2.msra.mxu1 %v5927_v18  ;;  %vm886_vm1 = vmor %vm3582_vm6, %vm885_vm0  ;;  %v5967_v17 = vld [vmem:[#allocation88_spill] sm:$0xff] }
 0x569   :  { %1280 = vmatprep.subr.mxu0 %v5928_v30  ;;  %1351 = vmatprep.subr.mxu1 %v5929_v60  ;;  %vm3961_vm2 = vmor %vm3595_vm10, %vm886_vm1  ;;  %v3973_v18 = vsel %vm3611_vm12, %v5960_v51, %v5967_v17  ;;  %v5969_v60 = vmov 0  ;;  %v4066_v51 = vld [vmem:[#allocation2 + $0xd8] sm:$0xff]  ;;  %v4081_v17 = vld [vmem:[#allocation5 + $0xc8] sm:$0xff] }
 0x56a   :  { %1281 = vmatpush2.msra.mxu0 %v5930_v13  ;;  %1352 = vmatpush2.msra.mxu1 %v5931_v22  ;;  %v5965_v1 = vsel %vm3961_vm2, 4294967295, %v5964_v1  ;;  %5968 = vst [vmem:[#allocation25_spill] sm:$0xff] %v3973_v18  ;;  %vm1217_vm6 = vcmp.gt.f32.partialorder %v3973_v18, 0.0 }
 0x56b   :  { %1282 = vmatprep.subr.mxu0 %v5932_v59  ;;  %1353 = vmatprep.subr.mxu1 %v5933_v24  ;;  %5966 = vst [vmem:[#allocation24_spill] sm:$0xff] %v5965_v1  ;;  %v4210_v1 = vld [vmem:[#allocation2 + $0x18] sm:$0xff] }
 0x56c   :  { %1283 = vmatpush2.msra.mxu0 %v5934_v38  ;;  %1354 = vmatpush2.msra.mxu1 %v5935_v35  ;;  %6012 = vst [vmem:[#allocation50_spill] sm:$0xff] %v4210_v1 }
 0x56d   :  { %1284 = vmatprep.subr.mxu0 %v5936_v14  ;;  %1355 = vmatprep.subr.mxu1 %v5937_v62 }
 0x56e   :  { %1285 = vmatpush2.msra.mxu0 %v5938_v20  ;;  %1356 = vmatpush2.msra.mxu1 %v5939_v15  ;;  %v5972_v15 = vld [vmem:[#allocation80_spill] sm:$0xff] }
 0x56f   :  { %1286 = vmatprep.subr.mxu0 %v5940_v39  ;;  %1357 = vmatprep.subr.mxu1 %v5941_v3  ;;  %v5974_v3 = vld [vmem:[#allocation81_spill] sm:$0xff] }
 0x570   :  { %1287 = vmatpush2.msra.mxu0 %v5942_v4  ;;  %1358 = vmatpush2.msra.mxu1 %v5943_v5  ;;  %v5976_v5 = vld [vmem:[#allocation83_spill] sm:$0xff] }
 0x571   :  { %1288 = vmatprep.subr.mxu0 %v5944_v6  ;;  %1359 = vmatprep.subr.mxu1 %v5945_v53  ;;  %v5978_v53 = vld [vmem:[#allocation84_spill] sm:$0xff] }
 0x572   :  { %1289 = vmatpush2.msra.mxu0 %v5946_v54  ;;  %1360 = vmatpush2.msra.mxu1 %v5947_v61  ;;  %v5980_v61 = vld [vmem:[#allocation85_spill] sm:$0xff] }
 0x573   :  { %1290 = vmatprep.subr.mxu0 %v5948_v63  ;;  %1361 = vmatprep.subr.mxu1 %v5949_v36  ;;  %v5982_v36 = vld [vmem:[#allocation86_spill] sm:$0xff] }
 0x574   :  { %1291 = vmatpush2.msra.mxu0 %v5950_v0  ;;  %1362 = vmatpush2.msra.mxu1 %v5951_v7  ;;  %v5984_v7 = vld [vmem:[#allocation87_spill] sm:$0xff] }
 0x575   :  { %1292 = vmatprep.subr.mxu0 %v5952_v8  ;;  %1363 = vmatprep.subr.mxu1 %v5878_v56 }
 0x576   :  { %1293 = vmatpush2.msra.mxu0 %v5879_v58  ;;  %1364 = vmatpush2.msra.mxu1 %v5953_v9  ;;  %v5986_v9 = vld [vmem:[#allocation116_spill] sm:$0xff] }
 0x577   :  { %1294 = vmatprep.subr.mxu0 %v5881_v19  ;;  %1365 = vmatprep.subr.mxu1 %v5954_v10 }
 0x578   :  { %1295 = vmatpush2.msra.mxu0 %v5883_v21  ;;  %1366 = vmatpush2.msra.mxu1 %v5884_v32 }
 0x579   :  { %1296 = vmatprep.subr.mxu0 %v5885_v26  ;;  %1367 = vmatprep.subr.mxu1 %v5886_v12 }
 0x57a   :  { %1297 = vmatpush2.msra.mxu0 %v5887_v16  ;;  %1368 = vmatpush2.msra.mxu1 %v5888_v27 }
 0x57b   :  { %1378 = vmatprep.subr.mxu0 %v3810_v25  ;;  %1449 = vmatprep.subr.mxu1 %v3813_v23 }
 0x5b9   :  { %v954_v58 = vpop.f32.mrf.mxu0  ;;  %v1025_v19 = vpop.f32.mrf.mxu1 }
 0x5ba   :  { %v1030_v31 = vsub.f32 %v954_v58, %v1025_v19 }
 0x5bb   :  { %v956_v56 = vpop.f32.mrf.mxu0  ;;  %v1027_v11 = vpop.f32.mrf.mxu1 }
 0x5bc   :  { %v1031_v32 = vsub.f32 %v956_v56, %v1027_v11  ;;  %v1174_v27 = vmul.f32 %v1030_v31, %v3665_v2 }
 0x5be   :  { %v1175_v41 = vmul.f32 %v1031_v32, %v5955_v40 }
 0x5fa   :  { %v1098_v29 = vpop.f32.mrf.mxu0  ;;  %v1169_v21 = vpop.f32.mrf.mxu1 }
 0x5fb   :  { %v1170_v33 = vadd.f32 %v1169_v21, %v1098_v29 }
 0x5fc   :  { %v1100_v26 = vpop.f32.mrf.mxu0  ;;  %v1171_v37 = vpop.f32.mrf.mxu1 }
 0x5fd   :  { %v1176_v12 = vmul.f32 %v1170_v33, %v3671_v57  ;;  %v1172_v16 = vadd.f32 %v1171_v37, %v1100_v26 }
 0x5ff   :  { %v1177_v43 = vmul.f32 %v1172_v16, %v5956_v42  ;;  %v1178_v44 = vadd.f32 %v1176_v12, %v1174_v27 }
 0x601   :  { %v1179_v45 = vadd.f32 %v1177_v43, %v1175_v41 }
 0x603   :  { %v1180_v46 = vadd.f32 %v1179_v45, %v1178_v44 }
 0x605   :  { %1181 = vadd.xlane.f32.xlu1 %v1180_v46 }
 0x68e   :  { %v1182_v47 = vpop.xlane.xlu1 %1181 }
 0x68f   :  { %v1183_v48 = vand.u32 2147483647, %v1182_v47 }
 0x691   :  { %vm3948_vm14 = vcmp.lt.f32.partialorder %v1183_v48, 1e-12  ;;  %v4060_v48 = vld [vmem:[#allocation2 + $0xe0] sm:$0xff] }
 0x692   :  { %v5958_v49 = vsel %vm3948_vm14, 4294967295, %v5957_v49  ;;  %v1187_v50 = vsel %vm3948_vm14, 1.0, %v1182_v47  ;;  %vm1185_vm4 = vmor %vm3961_vm2, %vm3948_vm14 }
 0x693   :  { %5959 = vst [vmem:[#allocation23_spill] sm:$0xff] %v5958_v49  ;;  %1926 = vrcp.f32 %v1187_v50  ;;  %vm3977_vm5 = vmxor %vm1185_vm4, %vm2287_vm3  ;;  %v4063_v50 = vld [vmem:[#allocation5 + $0xe0] sm:$0xff]  ;;  %v4213_v49 = vld [vmem:[#allocation5 + $0x18] sm:$0xff] }
 0x694   :  { %v5970_v60 = vsel %vm3977_vm5, 4294967295, %v5969_v60  ;;  %6013 = vst [vmem:[#allocation51_spill] sm:$0xff] %v4213_v49 }
 0x695   :  { %5971 = vst [vmem:[#allocation26_spill] sm:$0xff] %v5970_v60  ;;  %v4216_v60 = vld [vmem:[#allocation2 + $0x10] sm:$0xff] }
 0x696   :  { %6014 = vst [vmem:[#allocation52_spill] sm:$0xff] %v4216_v60 }
 0x6a0   :  { %v1927_v34 = vpop.eup %1926 }
 0x6a1   :  { %v1189_v30 = vmul.f32 %v1927_v34, %v3973_v18  ;;  %v4078_v34 = vld [vmem:[#allocation2 + $0xc8] sm:$0xff] }
 0x6a3   :  { %v1190_v13 = vsel %vm3977_vm5, %v1189_v30, 0.0  ;;  %v4084_v30 = vld [vmem:[#allocation2 + $0xc0] sm:$0xff] }
 0x6a4   :  { %v1199_v22 = vmul.f32 %v1190_v13, %v1030_v31  ;;  %v1200_v59 = vmul.f32 %v1190_v13, %v1031_v32  ;;  %v1203_v24 = vmul.f32 %v1190_v13, %v1170_v33  ;;  %v1204_v38 = vmul.f32 %v1190_v13, %v1172_v16 }
 0x6a5   :  { %v1191_v35 = vmul.f32 %v1190_v13, %v3665_v2  ;;  %v1192_v14 = vmul.f32 %v1190_v13, %v5955_v40  ;;  %v1195_v62 = vmul.f32 %v1190_v13, %v3671_v57  ;;  %v1196_v20 = vmul.f32 %v1190_v13, %v5956_v42  ;;  %v4087_v13 = vld [vmem:[#allocation5 + $0xc0] sm:$0xff] }
 0x6a6   :  { %v3988_v39 = vsub.f32 %v5972_v15, %v1199_v22  ;;  %v3991_v4 = vsub.f32 %v5974_v3, %v1200_v59  ;;  %v3994_v6 = vsub.f32 %v5976_v5, %v1203_v24  ;;  %v3997_v54 = vsub.f32 %v5978_v53, %v1204_v38  ;;  %v4090_v22 = vld [vmem:[#allocation2 + $0xb8] sm:$0xff]  ;;  %v4096_v24 = vld [vmem:[#allocation2 + $0xb0] sm:$0xff] }
 0x6a7   :  { %v4000_v63 = vadd.f32 %v1191_v35, %v5980_v61  ;;  %v4003_v0 = vadd.f32 %v1192_v14, %v5982_v36  ;;  %v4006_v8 = vadd.f32 %v1195_v62, %v5984_v7  ;;  %v4009_v10 = vadd.f32 %v1196_v20, %v5986_v9  ;;  %v4093_v59 = vld [vmem:[#allocation5 + $0xb8] sm:$0xff]  ;;  %v4099_v38 = vld [vmem:[#allocation5 + $0xb0] sm:$0xff]  ;;  %v4102_v35 = vld [vmem:[#allocation2 + $0xa8] sm:$0xff] }
 0x6a8   :  { %5973 = vst [vmem:[#allocation27_spill] sm:$0xff] %v3988_v39  ;;  %5975 = vst [vmem:[#allocation28_spill] sm:$0xff] %v3991_v4  ;;  %v1207_v58 = vmul.f32 %v3988_v39, %v3988_v39  ;;  %v1208_v19 = vmul.f32 %v3991_v4, %v3991_v4  ;;  %v1209_v56 = vmul.f32 %v3994_v6, %v3994_v6  ;;  %v1218_v32 = vsel %vm1217_vm6, %v3973_v18, 1.0  ;;  %v4105_v14 = vld [vmem:[#allocation5 + $0xa8] sm:$0xff]  ;;  %v4108_v62 = vld [vmem:[#allocation2 + $0xa0] sm:$0xff] }
 0x6a9   :  { %5977 = vst [vmem:[#allocation29_spill] sm:$0xff] %v3994_v6  ;;  %5979 = vst [vmem:[#allocation30_spill] sm:$0xff] %v3997_v54  ;;  %v1210_v11 = vmul.f32 %v3997_v54, %v3997_v54  ;;  %1928 = vrcp.f32 %v1218_v32  ;;  %v4111_v20 = vld [vmem:[#allocation5 + $0xa0] sm:$0xff]  ;;  %v4114_v15 = vld [vmem:[#allocation2 + $0x98] sm:$0xff] }
 0x6aa   :  { %5981 = vst [vmem:[#allocation31_spill] sm:$0xff] %v4000_v63  ;;  %5983 = vst [vmem:[#allocation32_spill] sm:$0xff] %v4003_v0  ;;  %v1211_v29 = vadd.f32 %v1209_v56, %v1207_v58  ;;  %v4117_v3 = vld [vmem:[#allocation5 + $0x98] sm:$0xff]  ;;  %v4120_v5 = vld [vmem:[#allocation2 + $0x90] sm:$0xff] }
 0x6ab   :  { %5985 = vst [vmem:[#allocation33_spill] sm:$0xff] %v4006_v8  ;;  %5987 = vst [vmem:[#allocation34_spill] sm:$0xff] %v4009_v10  ;;  %v1212_v21 = vadd.f32 %v1210_v11, %v1208_v19  ;;  %v4123_v53 = vld [vmem:[#allocation5 + $0x90] sm:$0xff]  ;;  %v4126_v61 = vld [vmem:[#allocation2 + $0x88] sm:$0xff] }
 0x6ac   :  { %v4129_v36 = vld [vmem:[#allocation5 + $0x88] sm:$0xff]  ;;  %v4132_v7 = vld [vmem:[#allocation2 + $0x80] sm:$0xff]  ;;  %v4138_v58 = vld [vmem:[#allocation2 + $0x78] sm:$0xff] }
 0x6ad   :  { %v1213_v31 = vadd.f32 %v1212_v21, %v1211_v29  ;;  %v4135_v9 = vld [vmem:[#allocation5 + $0x80] sm:$0xff]  ;;  %v4141_v19 = vld [vmem:[#allocation5 + $0x78] sm:$0xff]  ;;  %v4144_v56 = vld [vmem:[#allocation2 + $0x70] sm:$0xff] }
 0x6ae   :  { %v4147_v11 = vld [vmem:[#allocation5 + $0x70] sm:$0xff]  ;;  %v4150_v29 = vld [vmem:[#allocation2 + $0x68] sm:$0xff]  ;;  %v4159_v32 = vld [vmem:[#allocation5 + $0x60] sm:$0xff] }
 0x6af   :  { %1214 = vadd.xlane.f32.xlu0 %v1213_v31  ;;  %5991 = vst [vmem:[#allocation38_spill] sm:$0xff] %v4147_v11  ;;  %5992 = vst [vmem:[#allocation39_spill] sm:$0xff] %v4150_v29  ;;  %v4153_v21 = vld [vmem:[#allocation5 + $0x68] sm:$0xff]  ;;  %v4156_v31 = vld [vmem:[#allocation2 + $0x60] sm:$0xff] }
 0x6b0   :  { %5993 = vst [vmem:[#allocation40_spill] sm:$0xff] %v4153_v21  ;;  %5994 = vst [vmem:[#allocation105_spill] sm:$0xff] %v4156_v31  ;;  %v4183_v10 = vld [vmem:[#allocation5 + $0x40] sm:$0xff]  ;;  %v4186_v8 = vld [vmem:[#allocation2 + $0x38] sm:$0xff] }
 0x6b1   :  { %5995 = vst [vmem:[#allocation106_spill] sm:$0xff] %v4159_v32  ;;  %6003 = vst [vmem:[#allocation41_spill] sm:$0xff] %v4183_v10  ;;  %v4189_v0 = vld [vmem:[#allocation5 + $0x38] sm:$0xff]  ;;  %v4192_v63 = vld [vmem:[#allocation2 + $0x30] sm:$0xff] }
 0x6b2   :  { %6004 = vst [vmem:[#allocation42_spill] sm:$0xff] %v4186_v8  ;;  %6005 = vst [vmem:[#allocation43_spill] sm:$0xff] %v4189_v0  ;;  %v4207_v18 = vld [vmem:[#allocation5 + $0x20] sm:$0xff] }
 0x6b3   :  { %6006 = vst [vmem:[#allocation44_spill] sm:$0xff] %v4192_v63  ;;  %6011 = vst [vmem:[#allocation49_spill] sm:$0xff] %v4207_v18 }
 0x6b6   :  { %v1929_v33 = vpop.eup %1928 }
 0x738   :  { %v4021_v26 = vpop.xlane.xlu0 %1214 }
 0x739   :  { %5988 = vst [vmem:[#allocation35_spill] sm:$0xff] %v4021_v26  ;;  %v1220_v37 = vmul.f32 %v1929_v33, %v4021_v26  ;;  %v4162_v33 = vld [vmem:[#allocation2 + $0x58] sm:$0xff]  ;;  %v4219_v26 = vld [vmem:[#allocation5 + $0x10] sm:$0xff] }
 0x73a   :  { %5996 = vst [vmem:[#allocation108_spill] sm:$0xff] %v4162_v33  ;;  %6015 = vst [vmem:[#allocation53_spill] sm:$0xff] %v4219_v26 }
 0x73b   :  { %v1221_v12 = vsel %vm3977_vm5, %v1220_v37, 0.0  ;;  %v4165_v37 = vld [vmem:[#allocation5 + $0x58] sm:$0xff] }
 0x73c   :  { %v1222_v16 = vmul.f32 %v1221_v12, %v3665_v2  ;;  %v1223_v27 = vmul.f32 %v1221_v12, %v5955_v40  ;;  %v1226_v41 = vmul.f32 %v1221_v12, %v3671_v57  ;;  %v1227_v43 = vmul.f32 %v1221_v12, %v5956_v42  ;;  %v4046_v2 = vld [vmem:[#allocation2 + $0xf0] sm:$0xff]  ;;  %v4052_v40 = vld [vmem:[#allocation2 + $0xe8] sm:$0xff]  ;;  %5997 = vst [vmem:[#allocation110_spill] sm:$0xff] %v4165_v37 }
 0x73d   :  { %v4049_v57 = vld [vmem:[#allocation5 + $0xf0] sm:$0xff]  ;;  %v4056_v42 = vld [vmem:[#allocation5 + $0xe8] sm:$0xff] }
 0x73e   :  { %v4031_v44 = vadd.f32 %v1222_v16, %v3988_v39  ;;  %v4034_v45 = vadd.f32 %v1223_v27, %v3991_v4  ;;  %v4037_v46 = vadd.f32 %v1226_v41, %v3994_v6  ;;  %v4040_v47 = vadd.f32 %v1227_v43, %v3997_v54  ;;  %v4168_v12 = vld [vmem:[#allocation2 + $0x50] sm:$0xff]  ;;  %v4174_v27 = vld [vmem:[#allocation2 + $0x48] sm:$0xff]  ;;  %v4180_v43 = vld [vmem:[#allocation2 + $0x40] sm:$0xff] }
 0x73f   :  { %5998 = vst [vmem:[#allocation111_spill] sm:$0xff] %v4168_v12  ;;  %v4171_v16 = vld [vmem:[#allocation5 + $0x50] sm:$0xff]  ;;  %6000 = vst [vmem:[#allocation113_spill] sm:$0xff] %v4174_v27  ;;  %v4177_v41 = vld [vmem:[#allocation5 + $0x48] sm:$0xff] }
 0x740   :  { %5989 = vst [vmem:[#allocation36_spill] sm:$0xff] %v4034_v45  ;;  %5990 = vst [vmem:[#allocation37_spill] sm:$0xff] %v4040_v47  ;;  %1298 = vmatprep.mubr.f32.mxu0 %v4034_v45  ;;  %1369 = vmatprep.mubr.f32.mxu1 %v4040_v47  ;;  %v4195_v54 = vld [vmem:[#allocation5 + $0x30] sm:$0xff]  ;;  %v4198_v6 = vld [vmem:[#allocation2 + $0x28] sm:$0xff] }
 0x741   :  { %1299 = vmatmul.mubr.f32.vlgmr.msra.gmra.mxu0 %v4031_v44  ;;  %1370 = vmatmul.mubr.f32.vlgmr.msra.gmra.mxu1 %v4037_v46  ;;  %5999 = vst [vmem:[#allocation112_spill] sm:$0xff] %v4171_v16  ;;  %6001 = vst [vmem:[#allocation114_spill] sm:$0xff] %v4177_v41  ;;  %v4201_v4 = vld [vmem:[#allocation5 + $0x28] sm:$0xff]  ;;  %v4204_v39 = vld [vmem:[#allocation2 + $0x20] sm:$0xff] }
 0x742   :  { %1379 = vmatpush1.msra.mxu0 %v4046_v2  ;;  %1450 = vmatpush1.msra.mxu1 %v4049_v57  ;;  %6002 = vst [vmem:[#allocation115_spill] sm:$0xff] %v4180_v43  ;;  %6007 = vst [vmem:[#allocation45_spill] sm:$0xff] %v4195_v54 }
 0x743   :  { %1380 = vmatprep.subr.mxu0 %v4052_v40  ;;  %1442 = vmatprep.mubr.f32.mxu0 %v4040_v47  ;;  %6008 = vst [vmem:[#allocation46_spill] sm:$0xff] %v4198_v6  ;;  %6009 = vst [vmem:[#allocation47_spill] sm:$0xff] %v4201_v4  ;;  %v4222_v47 = vld [vmem:[#allocation2 + $0x8] sm:$0xff] }
 0x744   :  { %1451 = vmatprep.subr.mxu1 %v4056_v42  ;;  %1513 = vmatprep.mubr.f32.mxu1 %v4034_v45  ;;  %6010 = vst [vmem:[#allocation48_spill] sm:$0xff] %v4204_v39  ;;  %6016 = vst [vmem:[#allocation54_spill] sm:$0xff] %v4222_v47  ;;  %v4225_v45 = vld [vmem:[#allocation5 + $0x8] sm:$0xff] }
 0x745   :  { %1381 = vmatpush1.msra.mxu0 %v4060_v48  ;;  %1452 = vmatpush1.msra.mxu1 %v4063_v50  ;;  %6017 = vst [vmem:[#allocation55_spill] sm:$0xff] %v4225_v45 }
 0x746   :  { %1382 = vmatprep.subr.mxu0 %v4066_v51  ;;  %1453 = vmatprep.subr.mxu1 %v4069_v52 }
 0x747   :  { %1383 = vmatpush1.msra.mxu0 %v4072_v55  ;;  %1454 = vmatpush1.msra.mxu1 %v4075_v28 }
 0x748   :  { %1384 = vmatprep.subr.mxu0 %v4078_v34  ;;  %1455 = vmatprep.subr.mxu1 %v4081_v17 }
 0x749   :  { %1385 = vmatpush1.msra.mxu0 %v4084_v30  ;;  %1456 = vmatpush1.msra.mxu1 %v4087_v13 }
 0x74a   :  { %1386 = vmatprep.subr.mxu0 %v4090_v22  ;;  %1457 = vmatprep.subr.mxu1 %v4093_v59 }
 0x74b   :  { %1387 = vmatpush1.msra.mxu0 %v4096_v24  ;;  %1458 = vmatpush1.msra.mxu1 %v4099_v38 }
 0x74c   :  { %1388 = vmatprep.subr.mxu0 %v4102_v35  ;;  %1459 = vmatprep.subr.mxu1 %v4105_v14 }
 0x74d   :  { %1389 = vmatpush1.msra.mxu0 %v4108_v62  ;;  %1460 = vmatpush1.msra.mxu1 %v4111_v20 }
 0x74e   :  { %1390 = vmatprep.subr.mxu0 %v4114_v15  ;;  %1461 = vmatprep.subr.mxu1 %v4117_v3 }
 0x74f   :  { %1391 = vmatpush1.msra.mxu0 %v4120_v5  ;;  %1462 = vmatpush1.msra.mxu1 %v4123_v53 }
 0x750   :  { %1392 = vmatprep.subr.mxu0 %v4126_v61  ;;  %1463 = vmatprep.subr.mxu1 %v4129_v36 }
 0x751   :  { %1393 = vmatpush1.msra.mxu0 %v4132_v7  ;;  %1464 = vmatpush1.msra.mxu1 %v4135_v9 }
 0x752   :  { %1394 = vmatprep.subr.mxu0 %v4138_v58  ;;  %1465 = vmatprep.subr.mxu1 %v4141_v19 }
 0x753   :  { %1395 = vmatpush1.msra.mxu0 %v4144_v56  ;;  %1466 = vmatpush1.msra.mxu1 %v4147_v11 }
 0x754   :  { %1396 = vmatprep.subr.mxu0 %v4150_v29  ;;  %1467 = vmatprep.subr.mxu1 %v4153_v21 }
 0x755   :  { %1397 = vmatpush1.msra.mxu0 %v4156_v31  ;;  %1468 = vmatpush1.msra.mxu1 %v4159_v32 }
 0x756   :  { %1398 = vmatprep.subr.mxu0 %v4162_v33  ;;  %1469 = vmatprep.subr.mxu1 %v4165_v37 }
 0x757   :  { %1399 = vmatpush1.msra.mxu0 %v4168_v12  ;;  %1470 = vmatpush1.msra.mxu1 %v4171_v16 }
 0x758   :  { %1400 = vmatprep.subr.mxu0 %v4174_v27  ;;  %1471 = vmatprep.subr.mxu1 %v4177_v41 }
 0x759   :  { %1401 = vmatpush1.msra.mxu0 %v4180_v43  ;;  %1472 = vmatpush1.msra.mxu1 %v4183_v10 }
 0x75a   :  { %1402 = vmatprep.subr.mxu0 %v4186_v8  ;;  %1473 = vmatprep.subr.mxu1 %v4189_v0 }
 0x75b   :  { %1403 = vmatpush1.msra.mxu0 %v4192_v63  ;;  %1474 = vmatpush1.msra.mxu1 %v4195_v54 }
 0x75c   :  { %1404 = vmatprep.subr.mxu0 %v4198_v6  ;;  %1475 = vmatprep.subr.mxu1 %v4201_v4 }
 0x75d   :  { %1405 = vmatpush1.msra.mxu0 %v4204_v39  ;;  %1476 = vmatpush1.msra.mxu1 %v4207_v18 }
 0x75e   :  { %1406 = vmatprep.subr.mxu0 %v4210_v1  ;;  %1477 = vmatprep.subr.mxu1 %v4213_v49  ;;  %v4228_v1 = vld [vmem:[#allocation2] sm:$0xff] }
 0x75f   :  { %1407 = vmatpush1.msra.mxu0 %v4216_v60  ;;  %1478 = vmatpush1.msra.mxu1 %v4219_v26  ;;  %6018 = vst [vmem:[#allocation56_spill] sm:$0xff] %v4228_v1  ;;  %v4231_v49 = vld [vmem:[#allocation5] sm:$0xff]  ;;  %v4234_v60 = vld [vmem:[#allocation2 + $0x1f8] sm:$0xff] }
 0x760   :  { %1408 = vmatprep.subr.mxu0 %v4222_v47  ;;  %1479 = vmatprep.subr.mxu1 %v4225_v45  ;;  %6019 = vst [vmem:[#allocation57_spill] sm:$0xff] %v4231_v49  ;;  %6020 = vst [vmem:[#allocation58_spill] sm:$0xff] %v4234_v60  ;;  %v4237_v26 = vld [vmem:[#allocation5 + $0x1f8] sm:$0xff]  ;;  %v4240_v47 = vld [vmem:[#allocation2 + $0x1f0] sm:$0xff] }
 0x761   :  { %1409 = vmatpush1.msra.mxu0 %v4228_v1  ;;  %1480 = vmatpush1.msra.mxu1 %v4231_v49  ;;  %6021 = vst [vmem:[#allocation59_spill] sm:$0xff] %v4237_v26  ;;  %6022 = vst [vmem:[#allocation60_spill] sm:$0xff] %v4240_v47  ;;  %v4243_v45 = vld [vmem:[#allocation5 + $0x1f0] sm:$0xff]  ;;  %v4246_v1 = vld [vmem:[#allocation2 + $0x1e8] sm:$0xff] }
 0x762   :  { %1410 = vmatprep.subr.mxu0 %v4234_v60  ;;  %1481 = vmatprep.subr.mxu1 %v4237_v26  ;;  %6023 = vst [vmem:[#allocation61_spill] sm:$0xff] %v4243_v45  ;;  %6024 = vst [vmem:[#allocation62_spill] sm:$0xff] %v4246_v1  ;;  %v4249_v49 = vld [vmem:[#allocation5 + $0x1e8] sm:$0xff]  ;;  %v4252_v60 = vld [vmem:[#allocation2 + $0x1e0] sm:$0xff] }
 0x763   :  { %1411 = vmatpush2.msra.mxu0 %v4240_v47  ;;  %1482 = vmatpush2.msra.mxu1 %v4243_v45  ;;  %6025 = vst [vmem:[#allocation63_spill] sm:$0xff] %v4249_v49  ;;  %6026 = vst [vmem:[#allocation64_spill] sm:$0xff] %v4252_v60  ;;  %v4255_v26 = vld [vmem:[#allocation5 + $0x1e0] sm:$0xff]  ;;  %v4258_v47 = vld [vmem:[#allocation2 + $0x1d8] sm:$0xff] }
 0x764   :  { %1412 = vmatprep.subr.mxu0 %v4246_v1  ;;  %1483 = vmatprep.subr.mxu1 %v4249_v49  ;;  %6027 = vst [vmem:[#allocation65_spill] sm:$0xff] %v4255_v26  ;;  %6028 = vst [vmem:[#allocation66_spill] sm:$0xff] %v4258_v47  ;;  %v4261_v45 = vld [vmem:[#allocation5 + $0x1d8] sm:$0xff]  ;;  %v4264_v1 = vld [vmem:[#allocation2 + $0x1d0] sm:$0xff] }
 0x765   :  { %1413 = vmatpush2.msra.mxu0 %v4252_v60  ;;  %1484 = vmatpush2.msra.mxu1 %v4255_v26  ;;  %6029 = vst [vmem:[#allocation67_spill] sm:$0xff] %v4261_v45  ;;  %6030 = vst [vmem:[#allocation68_spill] sm:$0xff] %v4264_v1  ;;  %v4267_v49 = vld [vmem:[#allocation5 + $0x1d0] sm:$0xff]  ;;  %v4270_v60 = vld [vmem:[#allocation2 + $0x1c8] sm:$0xff] }
 0x766   :  { %1414 = vmatprep.subr.mxu0 %v4258_v47  ;;  %1485 = vmatprep.subr.mxu1 %v4261_v45  ;;  %6031 = vst [vmem:[#allocation69_spill] sm:$0xff] %v4267_v49  ;;  %6032 = vst [vmem:[#allocation70_spill] sm:$0xff] %v4270_v60  ;;  %v4273_v26 = vld [vmem:[#allocation5 + $0x1c8] sm:$0xff]  ;;  %v4276_v47 = vld [vmem:[#allocation2 + $0x1c0] sm:$0xff] }
 0x767   :  { %1415 = vmatpush2.msra.mxu0 %v4264_v1  ;;  %1486 = vmatpush2.msra.mxu1 %v4267_v49  ;;  %6033 = vst [vmem:[#allocation71_spill] sm:$0xff] %v4273_v26  ;;  %6034 = vst [vmem:[#allocation72_spill] sm:$0xff] %v4276_v47  ;;  %v4279_v45 = vld [vmem:[#allocation5 + $0x1c0] sm:$0xff]  ;;  %v4282_v1 = vld [vmem:[#allocation2 + $0x1b8] sm:$0xff] }
 0x768   :  { %1416 = vmatprep.subr.mxu0 %v4270_v60  ;;  %1487 = vmatprep.subr.mxu1 %v4273_v26  ;;  %6035 = vst [vmem:[#allocation73_spill] sm:$0xff] %v4279_v45  ;;  %6036 = vst [vmem:[#allocation74_spill] sm:$0xff] %v4282_v1  ;;  %v4285_v49 = vld [vmem:[#allocation5 + $0x1b8] sm:$0xff]  ;;  %v4288_v60 = vld [vmem:[#allocation2 + $0x1b0] sm:$0xff] }
 0x769   :  { %1417 = vmatpush2.msra.mxu0 %v4276_v47  ;;  %1488 = vmatpush2.msra.mxu1 %v4279_v45  ;;  %6037 = vst [vmem:[#allocation75_spill] sm:$0xff] %v4285_v49  ;;  %6038 = vst [vmem:[#allocation76_spill] sm:$0xff] %v4288_v60  ;;  %v4291_v26 = vld [vmem:[#allocation5 + $0x1b0] sm:$0xff]  ;;  %v4294_v47 = vld [vmem:[#allocation2 + $0x1a8] sm:$0xff] }
 0x76a   :  { %1418 = vmatprep.subr.mxu0 %v4282_v1  ;;  %1489 = vmatprep.subr.mxu1 %v4285_v49  ;;  %6039 = vst [vmem:[#allocation77_spill] sm:$0xff] %v4291_v26  ;;  %6040 = vst [vmem:[#allocation78_spill] sm:$0xff] %v4294_v47  ;;  %v4297_v45 = vld [vmem:[#allocation5 + $0x1a8] sm:$0xff]  ;;  %v4300_v1 = vld [vmem:[#allocation2 + $0x1a0] sm:$0xff] }
 0x76b   :  { %1419 = vmatpush2.msra.mxu0 %v4288_v60  ;;  %1490 = vmatpush2.msra.mxu1 %v4291_v26  ;;  %6041 = vst [vmem:[#allocation79_spill] sm:$0xff] %v4297_v45  ;;  %6042 = vst [vmem:[#allocation91_spill] sm:$0xff] %v4300_v1  ;;  %v4303_v49 = vld [vmem:[#allocation5 + $0x1a0] sm:$0xff]  ;;  %v4306_v60 = vld [vmem:[#allocation2 + $0x198] sm:$0xff] }
 0x76c   :  { %1420 = vmatprep.subr.mxu0 %v4294_v47  ;;  %1491 = vmatprep.subr.mxu1 %v4297_v45  ;;  %6043 = vst [vmem:[#allocation92_spill] sm:$0xff] %v4303_v49  ;;  %6044 = vst [vmem:[#allocation93_spill] sm:$0xff] %v4306_v60  ;;  %v4309_v26 = vld [vmem:[#allocation5 + $0x198] sm:$0xff]  ;;  %v4312_v47 = vld [vmem:[#allocation2 + $0x190] sm:$0xff] }
 0x76d   :  { %1421 = vmatpush2.msra.mxu0 %v4300_v1  ;;  %1492 = vmatpush2.msra.mxu1 %v4303_v49  ;;  %6045 = vst [vmem:[#allocation94_spill] sm:$0xff] %v4309_v26  ;;  %6046 = vst [vmem:[#allocation12_spill] sm:$0xff] %v4312_v47  ;;  %v4315_v45 = vld [vmem:[#allocation5 + $0x190] sm:$0xff]  ;;  %v4318_v1 = vld [vmem:[#allocation2 + $0x188] sm:$0xff] }
 0x76e   :  { %1422 = vmatprep.subr.mxu0 %v4306_v60  ;;  %1493 = vmatprep.subr.mxu1 %v4309_v26  ;;  %6047 = vst [vmem:[#allocation13_spill] sm:$0xff] %v4315_v45  ;;  %6048 = vst [vmem:[#allocation14_spill] sm:$0xff] %v4318_v1  ;;  %v4321_v49 = vld [vmem:[#allocation5 + $0x188] sm:$0xff]  ;;  %v4324_v60 = vld [vmem:[#allocation2 + $0x180] sm:$0xff] }
 0x76f   :  { %1423 = vmatpush2.msra.mxu0 %v4312_v47  ;;  %1494 = vmatpush2.msra.mxu1 %v4315_v45  ;;  %6049 = vst [vmem:[#allocation15_spill] sm:$0xff] %v4321_v49  ;;  %6050 = vst [vmem:[#allocation16_spill] sm:$0xff] %v4324_v60  ;;  %v4327_v26 = vld [vmem:[#allocation5 + $0x180] sm:$0xff]  ;;  %v4330_v47 = vld [vmem:[#allocation2 + $0x178] sm:$0xff] }
 0x770   :  { %1424 = vmatprep.subr.mxu0 %v4318_v1  ;;  %1495 = vmatprep.subr.mxu1 %v4321_v49  ;;  %6051 = vst [vmem:[#allocation17_spill] sm:$0xff] %v4327_v26  ;;  %6052 = vst [vmem:[#allocation18_spill] sm:$0xff] %v4330_v47  ;;  %v4333_v45 = vld [vmem:[#allocation5 + $0x178] sm:$0xff]  ;;  %v4336_v1 = vld [vmem:[#allocation2 + $0x170] sm:$0xff] }
 0x771   :  { %1425 = vmatpush2.msra.mxu0 %v4324_v60  ;;  %1496 = vmatpush2.msra.mxu1 %v4327_v26  ;;  %6053 = vst [vmem:[#allocation19_spill] sm:$0xff] %v4333_v45  ;;  %6054 = vst [vmem:[#allocation20_spill] sm:$0xff] %v4336_v1  ;;  %v4339_v49 = vld [vmem:[#allocation5 + $0x170] sm:$0xff]  ;;  %v4342_v60 = vld [vmem:[#allocation2 + $0x168] sm:$0xff] }
 0x772   :  { %1426 = vmatprep.subr.mxu0 %v4330_v47  ;;  %1497 = vmatprep.subr.mxu1 %v4333_v45  ;;  %6055 = vst [vmem:[#allocation21_spill] sm:$0xff] %v4339_v49  ;;  %6056 = vst [vmem:[#allocation22_spill] sm:$0xff] %v4342_v60  ;;  %v4345_v26 = vld [vmem:[#allocation5 + $0x168] sm:$0xff]  ;;  %v4348_v47 = vld [vmem:[#allocation2 + $0x160] sm:$0xff] }
 0x773   :  { %1427 = vmatpush2.msra.mxu0 %v4336_v1  ;;  %1498 = vmatpush2.msra.mxu1 %v4339_v49  ;;  %6057 = vst [vmem:[#allocation95_spill] sm:$0xff] %v4345_v26  ;;  %6058 = vst [vmem:[#allocation96_spill] sm:$0xff] %v4348_v47  ;;  %v4351_v45 = vld [vmem:[#allocation5 + $0x160] sm:$0xff]  ;;  %v4354_v1 = vld [vmem:[#allocation2 + $0x158] sm:$0xff] }
 0x774   :  { %1428 = vmatprep.subr.mxu0 %v4342_v60  ;;  %1499 = vmatprep.subr.mxu1 %v4345_v26  ;;  %6059 = vst [vmem:[#allocation97_spill] sm:$0xff] %v4351_v45  ;;  %6060 = vst [vmem:[#allocation98_spill] sm:$0xff] %v4354_v1  ;;  %v4357_v49 = vld [vmem:[#allocation5 + $0x158] sm:$0xff]  ;;  %v4360_v60 = vld [vmem:[#allocation2 + $0x150] sm:$0xff] }
 0x775   :  { %1429 = vmatpush2.msra.mxu0 %v4348_v47  ;;  %1500 = vmatpush2.msra.mxu1 %v4351_v45  ;;  %6061 = vst [vmem:[#allocation99_spill] sm:$0xff] %v4357_v49  ;;  %6062 = vst [vmem:[#allocation100_spill] sm:$0xff] %v4360_v60  ;;  %v4363_v26 = vld [vmem:[#allocation5 + $0x150] sm:$0xff]  ;;  %v4366_v47 = vld [vmem:[#allocation2 + $0x148] sm:$0xff] }
 0x776   :  { %1430 = vmatprep.subr.mxu0 %v4354_v1  ;;  %1501 = vmatprep.subr.mxu1 %v4357_v49  ;;  %6063 = vst [vmem:[#allocation101_spill] sm:$0xff] %v4363_v26  ;;  %6064 = vst [vmem:[#allocation102_spill] sm:$0xff] %v4366_v47  ;;  %v4369_v45 = vld [vmem:[#allocation5 + $0x148] sm:$0xff]  ;;  %v4372_v1 = vld [vmem:[#allocation2 + $0x140] sm:$0xff] }
 0x777   :  { %1431 = vmatpush2.msra.mxu0 %v4360_v60  ;;  %1502 = vmatpush2.msra.mxu1 %v4363_v26  ;;  %6065 = vst [vmem:[#allocation103_spill] sm:$0xff] %v4369_v45  ;;  %6066 = vst [vmem:[#allocation104_spill] sm:$0xff] %v4372_v1  ;;  %v4375_v49 = vld [vmem:[#allocation5 + $0x140] sm:$0xff]  ;;  %v4378_v60 = vld [vmem:[#allocation2 + $0x138] sm:$0xff] }
 0x778   :  { %1432 = vmatprep.subr.mxu0 %v4366_v47  ;;  %1503 = vmatprep.subr.mxu1 %v4369_v45  ;;  %6067 = vst [vmem:[#allocation107_spill] sm:$0xff] %v4375_v49  ;;  %6068 = vst [vmem:[#allocation109_spill] sm:$0xff] %v4378_v60  ;;  %v4381_v26 = vld [vmem:[#allocation5 + $0x138] sm:$0xff]  ;;  %v4384_v47 = vld [vmem:[#allocation2 + $0x130] sm:$0xff] }
 0x779   :  { %1433 = vmatpush2.msra.mxu0 %v4372_v1  ;;  %1504 = vmatpush2.msra.mxu1 %v4375_v49  ;;  %6069 = vst [vmem:[#allocation118_spill] sm:$0xff] %v4381_v26  ;;  %6070 = vst [vmem:[#allocation119_spill] sm:$0xff] %v4384_v47  ;;  %v4387_v45 = vld [vmem:[#allocation5 + $0x130] sm:$0xff]  ;;  %v4390_v1 = vld [vmem:[#allocation2 + $0x128] sm:$0xff] }
 0x77a   :  { %1434 = vmatprep.subr.mxu0 %v4378_v60  ;;  %1505 = vmatprep.subr.mxu1 %v4381_v26  ;;  %6071 = vst [vmem:[#allocation117_spill] sm:$0xff] %v4387_v45  ;;  %6072 = vst [vmem:[#allocation82_spill] sm:$0xff] %v4390_v1  ;;  %v4393_v49 = vld [vmem:[#allocation5 + $0x128] sm:$0xff]  ;;  %v4396_v60 = vld [vmem:[#allocation2 + $0x120] sm:$0xff] }
 0x77b   :  { %1435 = vmatpush2.msra.mxu0 %v4384_v47  ;;  %1506 = vmatpush2.msra.mxu1 %v4387_v45  ;;  %6073 = vst [vmem:[#allocation89_spill] sm:$0xff] %v4393_v49  ;;  %6074 = vst [vmem:[#allocation90_spill] sm:$0xff] %v4396_v60  ;;  %v4399_v26 = vld [vmem:[#allocation5 + $0x120] sm:$0xff]  ;;  %v4402_v47 = vld [vmem:[#allocation2 + $0x118] sm:$0xff] }
 0x77c   :  { %1436 = vmatprep.subr.mxu0 %v4390_v1  ;;  %1507 = vmatprep.subr.mxu1 %v4393_v49  ;;  %6075 = vst [vmem:[#allocation88_spill] sm:$0xff] %v4399_v26  ;;  %6076 = vst [vmem:[#allocation80_spill] sm:$0xff] %v4402_v47  ;;  %v4405_v45 = vld [vmem:[#allocation5 + $0x118] sm:$0xff]  ;;  %v4408_v1 = vld [vmem:[#allocation2 + $0x110] sm:$0xff] }
 0x77d   :  { %1437 = vmatpush2.msra.mxu0 %v4396_v60  ;;  %1508 = vmatpush2.msra.mxu1 %v4399_v26  ;;  %6077 = vst [vmem:[#allocation81_spill] sm:$0xff] %v4405_v45  ;;  %6078 = vst [vmem:[#allocation83_spill] sm:$0xff] %v4408_v1  ;;  %v4411_v49 = vld [vmem:[#allocation5 + $0x110] sm:$0xff]  ;;  %v4414_v60 = vld [vmem:[#allocation2 + $0x108] sm:$0xff] }
 0x77e   :  { %1438 = vmatprep.subr.mxu0 %v4402_v47  ;;  %1509 = vmatprep.subr.mxu1 %v4405_v45  ;;  %6079 = vst [vmem:[#allocation84_spill] sm:$0xff] %v4411_v49  ;;  %6080 = vst [vmem:[#allocation85_spill] sm:$0xff] %v4414_v60  ;;  %v4417_v26 = vld [vmem:[#allocation5 + $0x108] sm:$0xff]  ;;  %v4420_v47 = vld [vmem:[#allocation2 + $0x100] sm:$0xff] }
 0x77f   :  { %1439 = vmatpush2.msra.mxu0 %v4408_v1  ;;  %1510 = vmatpush2.msra.mxu1 %v4411_v49  ;;  %6081 = vst [vmem:[#allocation86_spill] sm:$0xff] %v4417_v26  ;;  %6082 = vst [vmem:[#allocation87_spill] sm:$0xff] %v4420_v47  ;;  %v4423_v45 = vld [vmem:[#allocation5 + $0x100] sm:$0xff] }
 0x780   :  { %1440 = vmatprep.subr.mxu0 %v4414_v60  ;;  %1511 = vmatprep.subr.mxu1 %v4417_v26  ;;  %6083 = vst [vmem:[#allocation116_spill] sm:$0xff] %v4423_v45 }
 0x781   :  { %1441 = vmatpush2.msra.mxu0 %v4420_v47  ;;  %1512 = vmatpush2.msra.mxu1 %v4423_v45 }
 0x782   :  { %1443 = vmatmul.mubr.f32.vlgmr.msra.gmra.mxu0 %v4037_v46  ;;  %1514 = vmatmul.mubr.f32.vlgmr.msra.gmra.mxu1 %v4031_v44 }
 0x783   :  { %1580 = vmatprep.subr.mxu0 %v3810_v25  ;;  %1651 = vmatprep.subr.mxu1 %v3813_v23 }
 0x784   :  { %1581 = vmatpush1.msra.mxu0 %v4046_v2  ;;  %1652 = vmatpush1.msra.mxu1 %v4049_v57 }
 0x785   :  { %1582 = vmatprep.subr.mxu0 %v4052_v40  ;;  %1653 = vmatprep.subr.mxu1 %v4056_v42 }
 0x786   :  { %1583 = vmatpush1.msra.mxu0 %v4060_v48  ;;  %1654 = vmatpush1.msra.mxu1 %v4063_v50 }
 0x787   :  { %1584 = vmatprep.subr.mxu0 %v4066_v51  ;;  %1655 = vmatprep.subr.mxu1 %v4069_v52 }
 0x788   :  { %1585 = vmatpush1.msra.mxu0 %v4072_v55  ;;  %1656 = vmatpush1.msra.mxu1 %v4075_v28 }
 0x789   :  { %1586 = vmatprep.subr.mxu0 %v4078_v34  ;;  %1657 = vmatprep.subr.mxu1 %v4081_v17 }
 0x78a   :  { %1587 = vmatpush1.msra.mxu0 %v4084_v30  ;;  %1658 = vmatpush1.msra.mxu1 %v4087_v13 }
 0x78b   :  { %1588 = vmatprep.subr.mxu0 %v4090_v22  ;;  %1659 = vmatprep.subr.mxu1 %v4093_v59 }
 0x78c   :  { %1589 = vmatpush1.msra.mxu0 %v4096_v24  ;;  %1660 = vmatpush1.msra.mxu1 %v4099_v38 }
 0x78d   :  { %1590 = vmatprep.subr.mxu0 %v4102_v35  ;;  %1661 = vmatprep.subr.mxu1 %v4105_v14 }
 0x78e   :  { %1591 = vmatpush1.msra.mxu0 %v4108_v62  ;;  %1662 = vmatpush1.msra.mxu1 %v4111_v20 }
 0x78f   :  { %1592 = vmatprep.subr.mxu0 %v4114_v15  ;;  %1663 = vmatprep.subr.mxu1 %v4117_v3 }
 0x790   :  { %1593 = vmatpush1.msra.mxu0 %v4120_v5  ;;  %1664 = vmatpush1.msra.mxu1 %v4123_v53 }
 0x791   :  { %1594 = vmatprep.subr.mxu0 %v4126_v61  ;;  %1665 = vmatprep.subr.mxu1 %v4129_v36 }
 0x792   :  { %1595 = vmatpush1.msra.mxu0 %v4132_v7  ;;  %1666 = vmatpush1.msra.mxu1 %v4135_v9 }
 0x793   :  { %1596 = vmatprep.subr.mxu0 %v4138_v58  ;;  %1667 = vmatprep.subr.mxu1 %v4141_v19 }
 0x794   :  { %1597 = vmatpush1.msra.mxu0 %v4144_v56  ;;  %1668 = vmatpush1.msra.mxu1 %v4147_v11 }
 0x795   :  { %1598 = vmatprep.subr.mxu0 %v4150_v29  ;;  %1669 = vmatprep.subr.mxu1 %v4153_v21  ;;  %v6172_v29 = vld [vmem:[#allocation34_spill] sm:$0xff] }
 0x796   :  { %1599 = vmatpush1.msra.mxu0 %v4156_v31  ;;  %1670 = vmatpush1.msra.mxu1 %v4159_v32  ;;  %v6168_v32 = vld [vmem:[#allocation30_spill] sm:$0xff]  ;;  %v6171_v31 = vld [vmem:[#allocation33_spill] sm:$0xff] }
 0x797   :  { %1600 = vmatprep.subr.mxu0 %v4162_v33  ;;  %1671 = vmatprep.subr.mxu1 %v4165_v37 }
 0x798   :  { %1601 = vmatpush1.msra.mxu0 %v4168_v12  ;;  %1672 = vmatpush1.msra.mxu1 %v4171_v16 }
 0x799   :  { %1602 = vmatprep.subr.mxu0 %v4174_v27  ;;  %1673 = vmatprep.subr.mxu1 %v4177_v41  ;;  %v6084_v41 = vld [vmem:[#allocation50_spill] sm:$0xff] }
 0x79a   :  { %1603 = vmatpush1.msra.mxu0 %v4180_v43  ;;  %1674 = vmatpush1.msra.mxu1 %v4183_v10  ;;  %v6085_v43 = vld [vmem:[#allocation51_spill] sm:$0xff]  ;;  %v6086_v10 = vld [vmem:[#allocation52_spill] sm:$0xff] }
 0x79b   :  { %1604 = vmatprep.subr.mxu0 %v4186_v8  ;;  %1675 = vmatprep.subr.mxu1 %v4189_v0  ;;  %v6087_v8 = vld [vmem:[#allocation53_spill] sm:$0xff]  ;;  %v6088_v0 = vld [vmem:[#allocation54_spill] sm:$0xff] }
 0x79c   :  { %1605 = vmatpush1.msra.mxu0 %v4192_v63  ;;  %1676 = vmatpush1.msra.mxu1 %v4195_v54  ;;  %v6089_v63 = vld [vmem:[#allocation55_spill] sm:$0xff]  ;;  %v6090_v54 = vld [vmem:[#allocation56_spill] sm:$0xff] }
 0x79d   :  { %1606 = vmatprep.subr.mxu0 %v4198_v6  ;;  %1677 = vmatprep.subr.mxu1 %v4201_v4  ;;  %v6091_v6 = vld [vmem:[#allocation57_spill] sm:$0xff]  ;;  %v6092_v4 = vld [vmem:[#allocation58_spill] sm:$0xff] }
 0x79e   :  { %1607 = vmatpush1.msra.mxu0 %v4204_v39  ;;  %1678 = vmatpush1.msra.mxu1 %v4207_v18  ;;  %v6093_v39 = vld [vmem:[#allocation59_spill] sm:$0xff]  ;;  %v6094_v18 = vld [vmem:[#allocation60_spill] sm:$0xff] }
 0x79f   :  { %1608 = vmatprep.subr.mxu0 %v6084_v41  ;;  %1679 = vmatprep.subr.mxu1 %v6085_v43  ;;  %v6095_v41 = vld [vmem:[#allocation61_spill] sm:$0xff]  ;;  %v6096_v43 = vld [vmem:[#allocation62_spill] sm:$0xff] }
 0x7a0   :  { %1609 = vmatpush1.msra.mxu0 %v6086_v10  ;;  %1680 = vmatpush1.msra.mxu1 %v6087_v8  ;;  %v6097_v10 = vld [vmem:[#allocation63_spill] sm:$0xff]  ;;  %v6098_v8 = vld [vmem:[#allocation64_spill] sm:$0xff] }
 0x7a1   :  { %1610 = vmatprep.subr.mxu0 %v6088_v0  ;;  %1681 = vmatprep.subr.mxu1 %v6089_v63  ;;  %v6099_v0 = vld [vmem:[#allocation65_spill] sm:$0xff]  ;;  %v6100_v63 = vld [vmem:[#allocation66_spill] sm:$0xff] }
 0x7a2   :  { %1611 = vmatpush1.msra.mxu0 %v6090_v54  ;;  %1682 = vmatpush1.msra.mxu1 %v6091_v6  ;;  %v6101_v54 = vld [vmem:[#allocation67_spill] sm:$0xff]  ;;  %v6102_v6 = vld [vmem:[#allocation68_spill] sm:$0xff] }
 0x7a3   :  { %1612 = vmatprep.subr.mxu0 %v6092_v4  ;;  %1683 = vmatprep.subr.mxu1 %v6093_v39  ;;  %v6103_v4 = vld [vmem:[#allocation69_spill] sm:$0xff]  ;;  %v6104_v39 = vld [vmem:[#allocation70_spill] sm:$0xff] }
 0x7a4   :  { %1613 = vmatpush2.msra.mxu0 %v6094_v18  ;;  %1684 = vmatpush2.msra.mxu1 %v6095_v41  ;;  %v6105_v18 = vld [vmem:[#allocation71_spill] sm:$0xff]  ;;  %v6106_v41 = vld [vmem:[#allocation72_spill] sm:$0xff] }
 0x7a5   :  { %1614 = vmatprep.subr.mxu0 %v6096_v43  ;;  %1685 = vmatprep.subr.mxu1 %v6097_v10  ;;  %v6107_v43 = vld [vmem:[#allocation73_spill] sm:$0xff]  ;;  %v6108_v10 = vld [vmem:[#allocation74_spill] sm:$0xff] }
 0x7a6   :  { %1615 = vmatpush2.msra.mxu0 %v6098_v8  ;;  %1686 = vmatpush2.msra.mxu1 %v6099_v0  ;;  %v6109_v8 = vld [vmem:[#allocation75_spill] sm:$0xff]  ;;  %v6110_v0 = vld [vmem:[#allocation76_spill] sm:$0xff] }
 0x7a7   :  { %1616 = vmatprep.subr.mxu0 %v6100_v63  ;;  %1687 = vmatprep.subr.mxu1 %v6101_v54  ;;  %v6111_v63 = vld [vmem:[#allocation77_spill] sm:$0xff]  ;;  %v6112_v54 = vld [vmem:[#allocation78_spill] sm:$0xff] }
 0x7a8   :  { %1617 = vmatpush2.msra.mxu0 %v6102_v6  ;;  %1688 = vmatpush2.msra.mxu1 %v6103_v4  ;;  %v6113_v6 = vld [vmem:[#allocation79_spill] sm:$0xff] }
 0x7a9   :  { %1618 = vmatprep.subr.mxu0 %v6104_v39  ;;  %1689 = vmatprep.subr.mxu1 %v6105_v18  ;;  %v6114_v4 = vld [vmem:[#allocation91_spill] sm:$0xff]  ;;  %v6115_v39 = vld [vmem:[#allocation92_spill] sm:$0xff]  ;;  %v6116_v18 = vld [vmem:[#allocation93_spill] sm:$0xff] }
 0x7aa   :  { %1619 = vmatpush2.msra.mxu0 %v6106_v41  ;;  %1690 = vmatpush2.msra.mxu1 %v6107_v43  ;;  %v6117_v41 = vld [vmem:[#allocation94_spill] sm:$0xff]  ;;  %v6118_v43 = vld [vmem:[#allocation12_spill] sm:$0xff] }
 0x7ab   :  { %1620 = vmatprep.subr.mxu0 %v6108_v10  ;;  %1691 = vmatprep.subr.mxu1 %v6109_v8  ;;  %v6119_v10 = vld [vmem:[#allocation13_spill] sm:$0xff]  ;;  %v6120_v8 = vld [vmem:[#allocation14_spill] sm:$0xff] }
 0x7ac   :  { %1621 = vmatpush2.msra.mxu0 %v6110_v0  ;;  %1692 = vmatpush2.msra.mxu1 %v6111_v63  ;;  %v6121_v0 = vld [vmem:[#allocation15_spill] sm:$0xff]  ;;  %v6122_v63 = vld [vmem:[#allocation16_spill] sm:$0xff] }
 0x7ad   :  { %1622 = vmatprep.subr.mxu0 %v6112_v54  ;;  %1693 = vmatprep.subr.mxu1 %v6113_v6  ;;  %v6123_v54 = vld [vmem:[#allocation17_spill] sm:$0xff]  ;;  %v6124_v6 = vld [vmem:[#allocation18_spill] sm:$0xff] }
 0x7ae   :  { %1623 = vmatpush2.msra.mxu0 %v6114_v4  ;;  %1694 = vmatpush2.msra.mxu1 %v6115_v39  ;;  %v6125_v4 = vld [vmem:[#allocation19_spill] sm:$0xff]  ;;  %v6126_v39 = vld [vmem:[#allocation20_spill] sm:$0xff] }
 0x7af   :  { %1624 = vmatprep.subr.mxu0 %v6116_v18  ;;  %1695 = vmatprep.subr.mxu1 %v6117_v41  ;;  %v6127_v18 = vld [vmem:[#allocation21_spill] sm:$0xff]  ;;  %v6128_v41 = vld [vmem:[#allocation22_spill] sm:$0xff] }
 0x7b0   :  { %1625 = vmatpush2.msra.mxu0 %v6118_v43  ;;  %1696 = vmatpush2.msra.mxu1 %v6119_v10  ;;  %v6129_v43 = vld [vmem:[#allocation95_spill] sm:$0xff]  ;;  %v6130_v10 = vld [vmem:[#allocation96_spill] sm:$0xff] }
 0x7b1   :  { %1626 = vmatprep.subr.mxu0 %v6120_v8  ;;  %1697 = vmatprep.subr.mxu1 %v6121_v0  ;;  %v6131_v8 = vld [vmem:[#allocation97_spill] sm:$0xff]  ;;  %v6132_v0 = vld [vmem:[#allocation98_spill] sm:$0xff] }
 0x7b2   :  { %1627 = vmatpush2.msra.mxu0 %v6122_v63  ;;  %1698 = vmatpush2.msra.mxu1 %v6123_v54  ;;  %v6133_v63 = vld [vmem:[#allocation99_spill] sm:$0xff]  ;;  %v6134_v54 = vld [vmem:[#allocation100_spill] sm:$0xff] }
 0x7b3   :  { %1628 = vmatprep.subr.mxu0 %v6124_v6  ;;  %1699 = vmatprep.subr.mxu1 %v6125_v4  ;;  %v6135_v6 = vld [vmem:[#allocation101_spill] sm:$0xff]  ;;  %v6136_v4 = vld [vmem:[#allocation102_spill] sm:$0xff] }
 0x7b4   :  { %1629 = vmatpush2.msra.mxu0 %v6126_v39  ;;  %1700 = vmatpush2.msra.mxu1 %v6127_v18  ;;  %v6137_v39 = vld [vmem:[#allocation103_spill] sm:$0xff]  ;;  %v6138_v18 = vld [vmem:[#allocation104_spill] sm:$0xff] }
 0x7b5   :  { %1630 = vmatprep.subr.mxu0 %v6128_v41  ;;  %1701 = vmatprep.subr.mxu1 %v6129_v43  ;;  %v6139_v41 = vld [vmem:[#allocation107_spill] sm:$0xff]  ;;  %v6140_v43 = vld [vmem:[#allocation109_spill] sm:$0xff] }
 0x7b6   :  { %1631 = vmatpush2.msra.mxu0 %v6130_v10  ;;  %1702 = vmatpush2.msra.mxu1 %v6131_v8  ;;  %v6141_v10 = vld [vmem:[#allocation118_spill] sm:$0xff]  ;;  %v6142_v8 = vld [vmem:[#allocation119_spill] sm:$0xff] }
 0x7b7   :  { %1632 = vmatprep.subr.mxu0 %v6132_v0  ;;  %1703 = vmatprep.subr.mxu1 %v6133_v63  ;;  %v6143_v0 = vld [vmem:[#allocation117_spill] sm:$0xff]  ;;  %v6144_v63 = vld [vmem:[#allocation82_spill] sm:$0xff] }
 0x7b8   :  { %1633 = vmatpush2.msra.mxu0 %v6134_v54  ;;  %1704 = vmatpush2.msra.mxu1 %v6135_v6  ;;  %v6145_v54 = vld [vmem:[#allocation89_spill] sm:$0xff]  ;;  %v6146_v6 = vld [vmem:[#allocation90_spill] sm:$0xff] }
 0x7b9   :  { %1634 = vmatprep.subr.mxu0 %v6136_v4  ;;  %1705 = vmatprep.subr.mxu1 %v6137_v39  ;;  %v6147_v4 = vld [vmem:[#allocation88_spill] sm:$0xff] }
 0x7ba   :  { %1635 = vmatpush2.msra.mxu0 %v6138_v18  ;;  %1706 = vmatpush2.msra.mxu1 %v6139_v41  ;;  %v6148_v39 = vld [vmem:[#allocation80_spill] sm:$0xff]  ;;  %v6149_v18 = vld [vmem:[#allocation81_spill] sm:$0xff] }
 0x7bb   :  { %1636 = vmatprep.subr.mxu0 %v6140_v43  ;;  %1707 = vmatprep.subr.mxu1 %v6141_v10  ;;  %v6150_v10 = vld [vmem:[#allocation36_spill] sm:$0xff]  ;;  %v6151_v43 = vld [vmem:[#allocation37_spill] sm:$0xff] }
 0x7bc   :  { %1637 = vmatpush2.msra.mxu0 %v6142_v8  ;;  %1708 = vmatpush2.msra.mxu1 %v6143_v0 }
 0x7bd   :  { %1638 = vmatprep.subr.mxu0 %v6144_v63  ;;  %1709 = vmatprep.subr.mxu1 %v6145_v54 }
 0x7be   :  { %1639 = vmatpush2.msra.mxu0 %v6146_v6  ;;  %1710 = vmatpush2.msra.mxu1 %v6147_v4 }
 0x7bf   :  { %1640 = vmatprep.subr.mxu0 %v6148_v39  ;;  %1711 = vmatprep.subr.mxu1 %v6149_v18 }
 0x7c0   :  { %1641 = vmatpush2.msra.mxu0 %v4408_v1  ;;  %1712 = vmatpush2.msra.mxu1 %v4411_v49 }
 0x7c1   :  { %1642 = vmatprep.subr.mxu0 %v4414_v60  ;;  %1713 = vmatprep.subr.mxu1 %v4417_v26 }
 0x7c2   :  { %1643 = vmatpush2.msra.mxu0 %v4420_v47  ;;  %1714 = vmatpush2.msra.mxu1 %v4423_v45 }
 0x7c3   :  { %1724 = vmatprep.subr.mxu0 %v3810_v25  ;;  %1795 = vmatprep.subr.mxu1 %v3813_v23 }
 0x801   :  { %v1300_v4 = vpop.f32.mrf.mxu0  ;;  %v1371_v39 = vpop.f32.mrf.mxu1 }
 0x802   :  { %v1376_v63 = vsub.f32 %v1300_v4, %v1371_v39 }
 0x803   :  { %v1302_v6 = vpop.f32.mrf.mxu0  ;;  %v1373_v18 = vpop.f32.mrf.mxu1 }
 0x804   :  { %v1377_v49 = vsub.f32 %v1302_v6, %v1373_v18  ;;  %v1520_v45 = vmul.f32 %v1376_v63, %v4031_v44  ;;  %v6152_v18 = vmov 0  ;;  %v6165_v6 = vld [vmem:[#allocation27_spill] sm:$0xff] }
 0x806   :  { %v1521_v25 = vmul.f32 %v1377_v49, %v6150_v10 }
 0x842   :  { %v1444_v54 = vpop.f32.mrf.mxu0  ;;  %v1515_v1 = vpop.f32.mrf.mxu1 }
 0x843   :  { %v1516_v0 = vadd.f32 %v1515_v1, %v1444_v54  ;;  %v6159_v54 = vmov 0 }
 0x844   :  { %v1446_v60 = vpop.f32.mrf.mxu0  ;;  %v1517_v8 = vpop.f32.mrf.mxu1 }
 0x845   :  { %v1522_v26 = vmul.f32 %v1516_v0, %v4037_v46  ;;  %v1518_v47 = vadd.f32 %v1517_v8, %v1446_v60  ;;  %v6155_v60 = vld [vmem:[#allocation35_spill] sm:$0xff] }
 0x846   :  { %vm1216_vm8 = vcmp.lt.f32.partialorder %v6155_v60, 1e-10 }
 0x847   :  { %v1523_v23 = vmul.f32 %v1518_v47, %v6151_v43  ;;  %v1524_v41 = vadd.f32 %v1522_v26, %v1520_v45  ;;  %vm1231_vm9 = vmand %vm3977_vm5, %vm1216_vm8  ;;  %v6162_v26 = vld [vmem:[#allocation25_spill] sm:$0xff] }
 0x848   :  { %vm1232_vm10 = vmor %vm3948_vm14, %vm1231_vm9  ;;  %v4587_v45 = vsel %vm3977_vm5, %v6155_v60, %v6162_v26  ;;  %v6166_v26 = vld [vmem:[#allocation28_spill] sm:$0xff] }
 0x849   :  { %v1525_v27 = vadd.f32 %v1523_v23, %v1521_v25  ;;  %vm4575_vm11 = vmor %vm3961_vm2, %vm1232_vm10  ;;  %vm1563_vm14 = vcmp.gt.f32.partialorder %v4587_v45, 0.0 }
 0x84a   :  { %v6160_v54 = vsel %vm4575_vm11, 4294967295, %v6159_v54 }
 0x84b   :  { %v1526_v16 = vadd.f32 %v1525_v27, %v1524_v41  ;;  %6161 = vst [vmem:[#allocation37_spill] sm:$0xff] %v6160_v54 }
 0x84d   :  { %1527 = vadd.xlane.f32.xlu1 %v1526_v16 }
 0x8d6   :  { %v1528_v12 = vpop.xlane.xlu1 %1527 }
 0x8d7   :  { %v1529_v37 = vand.u32 2147483647, %v1528_v12 }
 0x8d9   :  { %vm4562_vm7 = vcmp.lt.f32.partialorder %v1529_v37, 1e-12 }
 0x8da   :  { %v6153_v18 = vsel %vm4562_vm7, 4294967295, %v6152_v18  ;;  %v1533_v1 = vsel %vm4562_vm7, 1.0, %v1528_v12  ;;  %vm1531_vm12 = vmor %vm4575_vm11, %vm4562_vm7 }
 0x8db   :  { %6154 = vst [vmem:[#allocation36_spill] sm:$0xff] %v6153_v18  ;;  %1930 = vrcp.f32 %v1533_v1  ;;  %vm4591_vm13 = vmxor %vm1531_vm12, %vm2287_vm3  ;;  %v6167_v18 = vld [vmem:[#allocation29_spill] sm:$0xff] }
 0x8e8   :  { %v1931_v8 = vpop.eup %1930 }
 0x8e9   :  { %v1535_v37 = vmul.f32 %v1931_v8, %v4587_v45 }
 0x8eb   :  { %v1536_v16 = vsel %vm4591_vm13, %v1535_v37, 0.0 }
 0x8ec   :  { %v1545_v27 = vmul.f32 %v1536_v16, %v1376_v63  ;;  %v1546_v41 = vmul.f32 %v1536_v16, %v1377_v49  ;;  %v1549_v25 = vmul.f32 %v1536_v16, %v1516_v0  ;;  %v1550_v23 = vmul.f32 %v1536_v16, %v1518_v47  ;;  %v6169_v63 = vld [vmem:[#allocation31_spill] sm:$0xff]  ;;  %v6170_v0 = vld [vmem:[#allocation32_spill] sm:$0xff] }
 0x8ed   :  { %v1537_v1 = vmul.f32 %v1536_v16, %v4031_v44  ;;  %v1538_v39 = vmul.f32 %v1536_v16, %v6150_v10  ;;  %v1541_v60 = vmul.f32 %v1536_v16, %v4037_v46  ;;  %v1542_v4 = vmul.f32 %v1536_v16, %v6151_v43 }
 0x8ee   :  { %v1547_v8 = vsub.f32 %v6165_v6, %v1545_v27  ;;  %v1548_v54 = vsub.f32 %v6166_v26, %v1546_v41  ;;  %v1551_v33 = vsub.f32 %v6167_v18, %v1549_v25  ;;  %v1552_v37 = vsub.f32 %v6168_v32, %v1550_v23 }
 0x8ef   :  { %v4606_v49 = vadd.f32 %v1537_v1, %v6169_v63  ;;  %v4609_v47 = vadd.f32 %v1538_v39, %v6170_v0  ;;  %v4612_v21 = vadd.f32 %v1541_v60, %v6171_v31  ;;  %v4615_v11 = vadd.f32 %v1542_v4, %v6172_v29 }
 0x8f0   :  { %v1553_v16 = vmul.f32 %v1547_v8, %v1547_v8  ;;  %v1554_v27 = vmul.f32 %v1548_v54, %v1548_v54  ;;  %v1555_v6 = vmul.f32 %v1551_v33, %v1551_v33  ;;  %v1556_v41 = vmul.f32 %v1552_v37, %v1552_v37 }
 0x8f1   :  { %v1564_v32 = vsel %vm1563_vm14, %v4587_v45, 1.0 }
 0x8f2   :  { %v1557_v26 = vadd.f32 %v1555_v6, %v1553_v16  ;;  %v1558_v18 = vadd.f32 %v1556_v41, %v1554_v27  ;;  %1932 = vrcp.f32 %v1564_v32  ;;  %v6214_v41 = vld [vmem:[#allocation70_spill] sm:$0xff] }
 0x8f3   :  { %v6218_v32 = vld [vmem:[#allocation74_spill] sm:$0xff] }
 0x8f4   :  { %v1559_v25 = vadd.f32 %v1558_v18, %v1557_v26  ;;  %v6215_v26 = vld [vmem:[#allocation71_spill] sm:$0xff]  ;;  %v6216_v18 = vld [vmem:[#allocation72_spill] sm:$0xff] }
 0x8f6   :  { %1560 = vadd.xlane.f32.xlu0 %v1559_v25  ;;  %v6217_v25 = vld [vmem:[#allocation73_spill] sm:$0xff] }
 0x8ff   :  { %v1933_v23 = vpop.eup %1932 }
 0x97f   :  { %v4619_v1 = vpop.xlane.xlu0 %1560 }
 0x980   :  { %v1566_v31 = vmul.f32 %v1933_v23, %v4619_v1  ;;  %v6219_v23 = vld [vmem:[#allocation75_spill] sm:$0xff]  ;;  %vm1562_vm0 = vcmp.lt.f32.partialorder %v4619_v1, 1e-10 }
 0x981   :  { %vm1577_vm1 = vmand %vm4591_vm13, %vm1562_vm0 }
 0x982   :  { %v1567_v29 = vsel %vm4591_vm13, %v1566_v31, 0.0  ;;  %v6220_v31 = vld [vmem:[#allocation76_spill] sm:$0xff]  ;;  %vm1578_vm2 = vmor %vm4562_vm7, %vm1577_vm1 }
 0x983   :  { %v1568_v39 = vmul.f32 %v1567_v29, %v4031_v44  ;;  %v1569_v60 = vmul.f32 %v1567_v29, %v6150_v10  ;;  %v1572_v4 = vmul.f32 %v1567_v29, %v4037_v46  ;;  %v1573_v63 = vmul.f32 %v1567_v29, %v6151_v43  ;;  %v6173_v10 = vld [vmem:[#allocation38_spill] sm:$0xff]  ;;  %v6174_v44 = vld [vmem:[#allocation39_spill] sm:$0xff]  ;;  %v6175_v46 = vld [vmem:[#allocation40_spill] sm:$0xff] }
 0x984   :  { %v6210_v43 = vld [vmem:[#allocation66_spill] sm:$0xff]  ;;  %v6221_v29 = vld [vmem:[#allocation77_spill] sm:$0xff]  ;;  %vm1579_vm4 = vmor %vm4575_vm11, %vm1578_vm2 }
 0x985   :  { %v4628_v0 = vadd.f32 %v1569_v60, %v1548_v54  ;;  %v4630_v16 = vadd.f32 %v1573_v63, %v1552_v37  ;;  %v4632_v27 = vadd.f32 %v1568_v39, %v1547_v8  ;;  %v4634_v6 = vadd.f32 %v1572_v4, %v1551_v33  ;;  %v6209_v33 = vld [vmem:[#allocation65_spill] sm:$0xff]  ;;  %v6211_v54 = vld [vmem:[#allocation67_spill] sm:$0xff]  ;;  %v6212_v8 = vld [vmem:[#allocation68_spill] sm:$0xff] }
 0x986   :  { %v6213_v37 = vld [vmem:[#allocation69_spill] sm:$0xff]  ;;  %v6222_v39 = vld [vmem:[#allocation78_spill] sm:$0xff]  ;;  %v6223_v60 = vld [vmem:[#allocation79_spill] sm:$0xff] }
 0x987   :  { %1644 = vmatprep.mubr.f32.mxu0 %v4628_v0  ;;  %1715 = vmatprep.mubr.f32.mxu1 %v4630_v16  ;;  %v6224_v4 = vld [vmem:[#allocation91_spill] sm:$0xff]  ;;  %v6225_v63 = vld [vmem:[#allocation92_spill] sm:$0xff] }
 0x988   :  { %1645 = vmatmul.mubr.f32.vlgmr.msra.gmra.mxu0 %v4632_v27  ;;  %1716 = vmatmul.mubr.f32.vlgmr.msra.gmra.mxu1 %v4634_v6 }
 0x989   :  { %1725 = vmatpush1.msra.mxu0 %v4046_v2  ;;  %1796 = vmatpush1.msra.mxu1 %v4049_v57  ;;  %v6176_v2 = vld [vmem:[#allocation105_spill] sm:$0xff]  ;;  %v6177_v57 = vld [vmem:[#allocation106_spill] sm:$0xff] }
 0x98a   :  { %1726 = vmatprep.subr.mxu0 %v4052_v40  ;;  %1788 = vmatprep.mubr.f32.mxu0 %v4630_v16  ;;  %v6178_v40 = vld [vmem:[#allocation108_spill] sm:$0xff] }
 0x98b   :  { %1797 = vmatprep.subr.mxu1 %v4056_v42  ;;  %1859 = vmatprep.mubr.f32.mxu1 %v4628_v0  ;;  %v6179_v42 = vld [vmem:[#allocation110_spill] sm:$0xff] }
 0x98c   :  { %1727 = vmatpush1.msra.mxu0 %v4060_v48  ;;  %1798 = vmatpush1.msra.mxu1 %v4063_v50  ;;  %v6180_v48 = vld [vmem:[#allocation111_spill] sm:$0xff]  ;;  %v6181_v50 = vld [vmem:[#allocation112_spill] sm:$0xff] }
 0x98d   :  { %1728 = vmatprep.subr.mxu0 %v4066_v51  ;;  %1799 = vmatprep.subr.mxu1 %v4069_v52  ;;  %v6182_v51 = vld [vmem:[#allocation113_spill] sm:$0xff]  ;;  %v6183_v52 = vld [vmem:[#allocation114_spill] sm:$0xff] }
 0x98e   :  { %1729 = vmatpush1.msra.mxu0 %v4072_v55  ;;  %1800 = vmatpush1.msra.mxu1 %v4075_v28  ;;  %v6184_v55 = vld [vmem:[#allocation115_spill] sm:$0xff]  ;;  %v6185_v28 = vld [vmem:[#allocation41_spill] sm:$0xff] }
 0x98f   :  { %1730 = vmatprep.subr.mxu0 %v4078_v34  ;;  %1801 = vmatprep.subr.mxu1 %v4081_v17  ;;  %v6186_v34 = vld [vmem:[#allocation42_spill] sm:$0xff]  ;;  %v6187_v17 = vld [vmem:[#allocation43_spill] sm:$0xff] }
 0x990   :  { %1731 = vmatpush1.msra.mxu0 %v4084_v30  ;;  %1802 = vmatpush1.msra.mxu1 %v4087_v13  ;;  %v6188_v30 = vld [vmem:[#allocation44_spill] sm:$0xff]  ;;  %v6189_v13 = vld [vmem:[#allocation45_spill] sm:$0xff] }
 0x991   :  { %1732 = vmatprep.subr.mxu0 %v4090_v22  ;;  %1803 = vmatprep.subr.mxu1 %v4093_v59  ;;  %v6190_v22 = vld [vmem:[#allocation46_spill] sm:$0xff]  ;;  %v6191_v59 = vld [vmem:[#allocation47_spill] sm:$0xff] }
 0x992   :  { %1733 = vmatpush1.msra.mxu0 %v4096_v24  ;;  %1804 = vmatpush1.msra.mxu1 %v4099_v38  ;;  %v6192_v24 = vld [vmem:[#allocation48_spill] sm:$0xff]  ;;  %v6193_v38 = vld [vmem:[#allocation49_spill] sm:$0xff] }
 0x993   :  { %1734 = vmatprep.subr.mxu0 %v4102_v35  ;;  %1805 = vmatprep.subr.mxu1 %v4105_v14  ;;  %v6194_v35 = vld [vmem:[#allocation50_spill] sm:$0xff]  ;;  %v6195_v14 = vld [vmem:[#allocation51_spill] sm:$0xff] }
 0x994   :  { %1735 = vmatpush1.msra.mxu0 %v4108_v62  ;;  %1806 = vmatpush1.msra.mxu1 %v4111_v20  ;;  %v6196_v62 = vld [vmem:[#allocation52_spill] sm:$0xff]  ;;  %v6197_v20 = vld [vmem:[#allocation53_spill] sm:$0xff] }
 0x995   :  { %1736 = vmatprep.subr.mxu0 %v4114_v15  ;;  %1807 = vmatprep.subr.mxu1 %v4117_v3  ;;  %v6198_v15 = vld [vmem:[#allocation54_spill] sm:$0xff]  ;;  %v6199_v3 = vld [vmem:[#allocation55_spill] sm:$0xff] }
 0x996   :  { %1737 = vmatpush1.msra.mxu0 %v4120_v5  ;;  %1808 = vmatpush1.msra.mxu1 %v4123_v53  ;;  %v6200_v5 = vld [vmem:[#allocation56_spill] sm:$0xff]  ;;  %v6201_v53 = vld [vmem:[#allocation57_spill] sm:$0xff] }
 0x997   :  { %1738 = vmatprep.subr.mxu0 %v4126_v61  ;;  %1809 = vmatprep.subr.mxu1 %v4129_v36  ;;  %v6202_v61 = vld [vmem:[#allocation58_spill] sm:$0xff]  ;;  %v6203_v36 = vld [vmem:[#allocation59_spill] sm:$0xff] }
 0x998   :  { %1739 = vmatpush1.msra.mxu0 %v4132_v7  ;;  %1810 = vmatpush1.msra.mxu1 %v4135_v9  ;;  %v6204_v7 = vld [vmem:[#allocation60_spill] sm:$0xff]  ;;  %v6205_v9 = vld [vmem:[#allocation61_spill] sm:$0xff] }
 0x999   :  { %1740 = vmatprep.subr.mxu0 %v4138_v58  ;;  %1811 = vmatprep.subr.mxu1 %v4141_v19  ;;  %v6206_v58 = vld [vmem:[#allocation62_spill] sm:$0xff]  ;;  %v6207_v19 = vld [vmem:[#allocation63_spill] sm:$0xff] }
 0x99a   :  { %1741 = vmatpush1.msra.mxu0 %v4144_v56  ;;  %1812 = vmatpush1.msra.mxu1 %v6173_v10  ;;  %v6208_v56 = vld [vmem:[#allocation64_spill] sm:$0xff]  ;;  %v6226_v10 = vld [vmem:[#allocation93_spill] sm:$0xff] }
 0x99b   :  { %1742 = vmatprep.subr.mxu0 %v6174_v44  ;;  %1813 = vmatprep.subr.mxu1 %v6175_v46  ;;  %v6227_v44 = vld [vmem:[#allocation94_spill] sm:$0xff]  ;;  %v6228_v46 = vld [vmem:[#allocation12_spill] sm:$0xff] }
 0x99c   :  { %1743 = vmatpush1.msra.mxu0 %v6176_v2  ;;  %1814 = vmatpush1.msra.mxu1 %v6177_v57  ;;  %v6229_v2 = vld [vmem:[#allocation13_spill] sm:$0xff]  ;;  %v6230_v57 = vld [vmem:[#allocation14_spill] sm:$0xff] }
 0x99d   :  { %1744 = vmatprep.subr.mxu0 %v6178_v40  ;;  %1815 = vmatprep.subr.mxu1 %v6179_v42  ;;  %v6231_v40 = vld [vmem:[#allocation15_spill] sm:$0xff]  ;;  %v6232_v42 = vld [vmem:[#allocation16_spill] sm:$0xff] }
 0x99e   :  { %1745 = vmatpush1.msra.mxu0 %v6180_v48  ;;  %1816 = vmatpush1.msra.mxu1 %v6181_v50  ;;  %v6233_v48 = vld [vmem:[#allocation17_spill] sm:$0xff]  ;;  %v6234_v50 = vld [vmem:[#allocation18_spill] sm:$0xff] }
 0x99f   :  { %1746 = vmatprep.subr.mxu0 %v6182_v51  ;;  %1817 = vmatprep.subr.mxu1 %v6183_v52  ;;  %v6235_v51 = vld [vmem:[#allocation19_spill] sm:$0xff]  ;;  %v6236_v52 = vld [vmem:[#allocation20_spill] sm:$0xff] }
 0x9a0   :  { %1747 = vmatpush1.msra.mxu0 %v6184_v55  ;;  %1818 = vmatpush1.msra.mxu1 %v6185_v28  ;;  %v6237_v55 = vld [vmem:[#allocation21_spill] sm:$0xff]  ;;  %v6238_v28 = vld [vmem:[#allocation22_spill] sm:$0xff] }
 0x9a1   :  { %1748 = vmatprep.subr.mxu0 %v6186_v34  ;;  %1819 = vmatprep.subr.mxu1 %v6187_v17  ;;  %v6239_v34 = vld [vmem:[#allocation95_spill] sm:$0xff]  ;;  %v6240_v17 = vld [vmem:[#allocation96_spill] sm:$0xff] }
 0x9a2   :  { %1749 = vmatpush1.msra.mxu0 %v6188_v30  ;;  %1820 = vmatpush1.msra.mxu1 %v6189_v13  ;;  %v6241_v30 = vld [vmem:[#allocation97_spill] sm:$0xff]  ;;  %v6242_v13 = vld [vmem:[#allocation98_spill] sm:$0xff] }
 0x9a3   :  { %1750 = vmatprep.subr.mxu0 %v6190_v22  ;;  %1821 = vmatprep.subr.mxu1 %v6191_v59  ;;  %v6243_v22 = vld [vmem:[#allocation99_spill] sm:$0xff]  ;;  %v6244_v59 = vld [vmem:[#allocation100_spill] sm:$0xff] }
 0x9a4   :  { %1751 = vmatpush1.msra.mxu0 %v6192_v24  ;;  %1822 = vmatpush1.msra.mxu1 %v6193_v38  ;;  %v6245_v24 = vld [vmem:[#allocation101_spill] sm:$0xff]  ;;  %v6246_v38 = vld [vmem:[#allocation102_spill] sm:$0xff] }
 0x9a5   :  { %1752 = vmatprep.subr.mxu0 %v6194_v35  ;;  %1823 = vmatprep.subr.mxu1 %v6195_v14  ;;  %v6247_v35 = vld [vmem:[#allocation103_spill] sm:$0xff]  ;;  %v6248_v14 = vld [vmem:[#allocation104_spill] sm:$0xff] }
 0x9a6   :  { %1753 = vmatpush1.msra.mxu0 %v6196_v62  ;;  %1824 = vmatpush1.msra.mxu1 %v6197_v20  ;;  %v6249_v62 = vld [vmem:[#allocation107_spill] sm:$0xff]  ;;  %v6250_v20 = vld [vmem:[#allocation109_spill] sm:$0xff] }
 0x9a7   :  { %1754 = vmatprep.subr.mxu0 %v6198_v15  ;;  %1825 = vmatprep.subr.mxu1 %v6199_v3  ;;  %v6251_v15 = vld [vmem:[#allocation118_spill] sm:$0xff]  ;;  %v6252_v3 = vld [vmem:[#allocation119_spill] sm:$0xff] }
 0x9a8   :  { %1755 = vmatpush1.msra.mxu0 %v6200_v5  ;;  %1826 = vmatpush1.msra.mxu1 %v6201_v53  ;;  %v6253_v5 = vld [vmem:[#allocation117_spill] sm:$0xff]  ;;  %v6254_v53 = vld [vmem:[#allocation82_spill] sm:$0xff] }
 0x9a9   :  { %1756 = vmatprep.subr.mxu0 %v6202_v61  ;;  %1827 = vmatprep.subr.mxu1 %v6203_v36  ;;  %v6255_v61 = vld [vmem:[#allocation89_spill] sm:$0xff]  ;;  %v6256_v36 = vld [vmem:[#allocation90_spill] sm:$0xff] }
 0x9aa   :  { %1757 = vmatpush2.msra.mxu0 %v6204_v7  ;;  %1828 = vmatpush2.msra.mxu1 %v6205_v9  ;;  %v6257_v7 = vld [vmem:[#allocation88_spill] sm:$0xff] }
 0x9ab   :  { %1758 = vmatprep.subr.mxu0 %v6206_v58  ;;  %1829 = vmatprep.subr.mxu1 %v6207_v19  ;;  %v6258_v9 = vld [vmem:[#allocation80_spill] sm:$0xff]  ;;  %v6259_v58 = vld [vmem:[#allocation81_spill] sm:$0xff]  ;;  %v6260_v19 = vld [vmem:[#allocation83_spill] sm:$0xff] }
 0x9ac   :  { %1759 = vmatpush2.msra.mxu0 %v6208_v56  ;;  %1830 = vmatpush2.msra.mxu1 %v6209_v33  ;;  %v6261_v56 = vld [vmem:[#allocation84_spill] sm:$0xff]  ;;  %v6262_v33 = vld [vmem:[#allocation85_spill] sm:$0xff] }
 0x9ad   :  { %1760 = vmatprep.subr.mxu0 %v6210_v43  ;;  %1831 = vmatprep.subr.mxu1 %v6211_v54  ;;  %v6263_v43 = vld [vmem:[#allocation86_spill] sm:$0xff]  ;;  %v6264_v54 = vld [vmem:[#allocation87_spill] sm:$0xff] }
 0x9ae   :  { %1761 = vmatpush2.msra.mxu0 %v6212_v8  ;;  %1832 = vmatpush2.msra.mxu1 %v6213_v37  ;;  %v6265_v8 = vld [vmem:[#allocation116_spill] sm:$0xff] }
 0x9af   :  { %1762 = vmatprep.subr.mxu0 %v6214_v41  ;;  %1833 = vmatprep.subr.mxu1 %v6215_v26 }
 0x9b0   :  { %1763 = vmatpush2.msra.mxu0 %v6216_v18  ;;  %1834 = vmatpush2.msra.mxu1 %v6217_v25 }
 0x9b1   :  { %1764 = vmatprep.subr.mxu0 %v6218_v32  ;;  %1835 = vmatprep.subr.mxu1 %v6219_v23 }
 0x9b2   :  { %1765 = vmatpush2.msra.mxu0 %v6220_v31  ;;  %1836 = vmatpush2.msra.mxu1 %v6221_v29 }
 0x9b3   :  { %1766 = vmatprep.subr.mxu0 %v6222_v39  ;;  %1837 = vmatprep.subr.mxu1 %v6223_v60 }
 0x9b4   :  { %1767 = vmatpush2.msra.mxu0 %v6224_v4  ;;  %1838 = vmatpush2.msra.mxu1 %v6225_v63 }
 0x9b5   :  { %1768 = vmatprep.subr.mxu0 %v6226_v10  ;;  %1839 = vmatprep.subr.mxu1 %v6227_v44 }
 0x9b6   :  { %1769 = vmatpush2.msra.mxu0 %v6228_v46  ;;  %1840 = vmatpush2.msra.mxu1 %v6229_v2 }
 0x9b7   :  { %1770 = vmatprep.subr.mxu0 %v6230_v57  ;;  %1841 = vmatprep.subr.mxu1 %v6231_v40 }
 0x9b8   :  { %1771 = vmatpush2.msra.mxu0 %v6232_v42  ;;  %1842 = vmatpush2.msra.mxu1 %v6233_v48 }
 0x9b9   :  { %1772 = vmatprep.subr.mxu0 %v6234_v50  ;;  %1843 = vmatprep.subr.mxu1 %v6235_v51 }
 0x9ba   :  { %1773 = vmatpush2.msra.mxu0 %v6236_v52  ;;  %1844 = vmatpush2.msra.mxu1 %v6237_v55 }
 0x9bb   :  { %1774 = vmatprep.subr.mxu0 %v6238_v28  ;;  %1845 = vmatprep.subr.mxu1 %v6239_v34  ;;  %v1576_v28 = vsel %vm4591_vm13, %v4619_v1, %v4587_v45 }
 0x9bc   :  { %1775 = vmatpush2.msra.mxu0 %v6240_v17  ;;  %1846 = vmatpush2.msra.mxu1 %v6241_v30 }
 0x9bd   :  { %1776 = vmatprep.subr.mxu0 %v6242_v13  ;;  %1847 = vmatprep.subr.mxu1 %v6243_v22 }
 0x9be   :  { %1777 = vmatpush2.msra.mxu0 %v6244_v59  ;;  %1848 = vmatpush2.msra.mxu1 %v6245_v24 }
 0x9bf   :  { %1778 = vmatprep.subr.mxu0 %v6246_v38  ;;  %1849 = vmatprep.subr.mxu1 %v6247_v35 }
 0x9c0   :  { %1779 = vmatpush2.msra.mxu0 %v6248_v14  ;;  %1850 = vmatpush2.msra.mxu1 %v6249_v62 }
 0x9c1   :  { %1780 = vmatprep.subr.mxu0 %v6250_v20  ;;  %1851 = vmatprep.subr.mxu1 %v6251_v15 }
 0x9c2   :  { %1781 = vmatpush2.msra.mxu0 %v6252_v3  ;;  %1852 = vmatpush2.msra.mxu1 %v6253_v5 }
 0x9c3   :  { %1782 = vmatprep.subr.mxu0 %v6254_v53  ;;  %1853 = vmatprep.subr.mxu1 %v6255_v61 }
 0x9c4   :  { %1783 = vmatpush2.msra.mxu0 %v6256_v36  ;;  %1854 = vmatpush2.msra.mxu1 %v6257_v7 }
 0x9c5   :  { %1784 = vmatprep.subr.mxu0 %v6258_v9  ;;  %1855 = vmatprep.subr.mxu1 %v6259_v58 }
 0x9c6   :  { %1785 = vmatpush2.msra.mxu0 %v6260_v19  ;;  %1856 = vmatpush2.msra.mxu1 %v6261_v56 }
 0x9c7   :  { %1786 = vmatprep.subr.mxu0 %v6262_v33  ;;  %1857 = vmatprep.subr.mxu1 %v6263_v43 }
 0x9c8   :  { %1787 = vmatpush2.msra.mxu0 %v6264_v54  ;;  %1858 = vmatpush2.msra.mxu1 %v6265_v8 }
 0x9c9   :  { %1789 = vmatmul.mubr.f32.vlgmr.msra.gmra.mxu0 %v4634_v6  ;;  %1860 = vmatmul.mubr.f32.vlgmr.msra.gmra.mxu1 %v4632_v27 }
 0xa48   :  { %v1646_v37 = vpop.f32.mrf.mxu0  ;;  %v1717_v41 = vpop.f32.mrf.mxu1 }
 0xa49   :  { %v1722_v23 = vsub.f32 %v1646_v37, %v1717_v41 }
 0xa4a   :  { %v1648_v26 = vpop.f32.mrf.mxu0  ;;  %v1719_v18 = vpop.f32.mrf.mxu1 }
 0xa4b   :  { %v1723_v31 = vsub.f32 %v1648_v26, %v1719_v18  ;;  %v1866_v10 = vmul.f32 %v1722_v23, %v4632_v27 }
 0xa4d   :  { %v1867_v44 = vmul.f32 %v1723_v31, %v4628_v0 }
 0xa89   :  { %v1790_v25 = vpop.f32.mrf.mxu0  ;;  %v1861_v32 = vpop.f32.mrf.mxu1 }
 0xa8a   :  { %v1862_v29 = vadd.f32 %v1861_v32, %v1790_v25 }
 0xa8b   :  { %v1792_v39 = vpop.f32.mrf.mxu0  ;;  %v1863_v60 = vpop.f32.mrf.mxu1 }
 0xa8c   :  { %v1868_v4 = vmul.f32 %v1862_v29, %v4634_v6  ;;  %v1864_v63 = vadd.f32 %v1863_v60, %v1792_v39 }
 0xa8e   :  { %v1869_v46 = vmul.f32 %v1864_v63, %v4630_v16  ;;  %v1870_v2 = vadd.f32 %v1868_v4, %v1866_v10 }
 0xa90   :  { %v1871_v57 = vadd.f32 %v1869_v46, %v1867_v44 }
 0xa92   :  { %v1872_v40 = vadd.f32 %v1871_v57, %v1870_v2 }
 0xa94   :  { %1873 = vadd.xlane.f32.xlu1 %v1872_v40 }
 0xb1d   :  { %v1874_v42 = vpop.xlane.xlu1 %1873 }
 0xb1e   :  { %v1875_v48 = vand.u32 2147483647, %v1874_v42 }
 0xb20   :  { %vm1876_vm15 = vcmp.lt.f32.partialorder %v1875_v48, 1e-12 }
 0xb21   :  { %v1879_v50 = vsel %vm1876_vm15, 1.0, %v1874_v42  ;;  %vm1877_vm5 = vmor %vm1579_vm4, %vm1876_vm15 }
 0xb22   :  { %1934 = vrcp.f32 %v1879_v50  ;;  %vm1878_vm6 = vmxor %vm1877_vm5, %vm2287_vm3 }
 0xb2f   :  { %v1935_v55 = vpop.eup %1934 }
 0xb30   :  { %v1881_v34 = vmul.f32 %v1935_v55, %v1576_v28 }
 0xb32   :  { %v1882_v17 = vsel %vm1878_vm6, %v1881_v34, 0.0 }
 0xb33   :  { %v1883_v30 = vmul.f32 %v1882_v17, %v4632_v27  ;;  %v1884_v13 = vmul.f32 %v1882_v17, %v4628_v0  ;;  %v1887_v22 = vmul.f32 %v1882_v17, %v4634_v6  ;;  %v1888_v59 = vmul.f32 %v1882_v17, %v4630_v16 }
 0xb35   :  { %v1885_v24 = vadd.f32 %v1883_v30, %v4606_v49  ;;  %v1886_v38 = vadd.f32 %v1884_v13, %v4609_v47  ;;  %v1889_v45 = vadd.f32 %v1887_v22, %v4612_v21  ;;  %v1890_v12 = vadd.f32 %v1888_v59, %v4615_v11 }
 0xb37   :  { %1891 = vst [vmem:[#allocation8] sm:$0xff] %v1885_v24  ;;  %1892 = vst [vmem:[#allocation8 + $0x8] sm:$0xff] %v1886_v38 }
 0xb38   :  { %1893 = vst [vmem:[#allocation8 + $0x10] sm:$0xff] %v1889_v45  ;;  %1894 = vst [vmem:[#allocation8 + $0x18] sm:$0xff] %v1890_v12 }
 0xb39   :  { %2267 = shalt.err (!%p2264_p5)
}
 0xb3a   :  { %1904 = dma.vmem_to_hbm [thread:$0]  %s1902_s2, 512, %s4800_s3, [#allocation4]  }
 0xb3b   :  { %2280 = dma.done.wait [#allocation4], 512  }
 0xb3c   :  { %2281 = vsyncadd [#allocation4], 4294966784 }
 0xb3d   :  { %1908 = vsyncpa [#allocation3], 1 }
 0xb3e   :  { %1909 = vsyncpa [#allocation6], 1 }
 0xb3f   :  { %1910 = vsyncpa [#allocation4], 1 }

</bundles_post_ra>
